<compile_context>
chip_gen: v6e
topology: v6e:2x2x1
jax: 0.10.0
libtpu: 0.0.40
codegen_flags: <defaults>
</compile_context>

<pallas_src>
import math

import jax
import jax.numpy as jnp
from jax import lax
from jax.experimental import pallas as pl
from jax.experimental.pallas import tpu as pltpu

# ---- globals of RHI_Train.py (chosen deterministically; synthetic values) ----
NUM_NEURON = 128          # num_neuron
NUM_S1 = 128              # num_S1 (same length as input_n / Spike here)
NUM_CONN = 4              # len(connection)
I_MAX = 10.0              # I_max
FIRE_THRESHOLD = 0.5      # fire_threshold
SIMULATION_TIME = 16      # Simulation_time
# IzhNodeMU parameters (standard BrainCog Izhikevich node)
PARAM_THRESHOLD = 30.0
PARAM_A = 0.02
PARAM_B = 0.2
PARAM_C = -65.0
PARAM_D = 8.0
PARAM_MEM = -70.0
PARAM_U = PARAM_B * PARAM_MEM
PARAM_DT = 1.0
PI = math.pi

TILE_B = 64               # samples per grid block (review: 64 sweet spot on all gens)

# Folded Izhikevich constants (dt == 1.0)
ONE_MINUS_A_DT = 1.0 - PARAM_A * PARAM_DT
AB_DT = PARAM_A * PARAM_B * PARAM_DT

# TODO(synk): the TrickID == 1 branch (Python lookup of spike_num_list via
# .item()) is a host-side table lookup; only the TrickID != 1 path
# (Simulation_time-step Izhikevich simulation) is implemented in-kernel.
# TODO(synk): only the 2-D (stacked) FR path of the PyTorch forward is
# implemented; the len(FR.shape)==1 path is the i==0 special case of it.
# TODO(synk): u is updated from the freshly integrated (possibly
# supra-threshold) mem and before the spike reset, matching the previous
# kernel's ordering of BrainCog IzhNodeMU; verify against the exact node impl.


def s1net_kernel(scal_ref,                              # (TILE_B, 2): [C, Fired]
                 fr_ref, w_ref, inp_ref, wlat_ref,      # VMEM inputs
                 fr_n_ref, input_n_ref, fired_out_ref, wlat_out_ref):
    N = NUM_NEURON

    # ---- FR_W = sum_i FR[i] * connection[i].weight -------------------------
    # One hoisted sublane broadcast of the shared weights, a single fused
    # multiply over the flat (TILE_B, NUM_CONN*N) tile, then a 3-add reduce
    # over the 128-lane blocks (lane slices at 128-multiples are vreg selects).
    wb = jnp.broadcast_to(w_ref[...], fr_ref.shape)     # (TILE_B, NUM_CONN*N)
    prod = fr_ref[...] * wb
    fr_w = prod[:, 0:N]
    for i in range(1, NUM_CONN):
        fr_w = fr_w + prod[:, i * N:(i + 1) * N]        # (TILE_B, N)

    sf = jnp.maximum(jnp.tanh(fr_w), 0.0)

    inp = inp_ref[...]                                  # (TILE_B, N)
    C = scal_ref[:, 0:1]                                # (TILE_B, 1) -> lane bcast
    fired = scal_ref[:, 1:2]                            # (TILE_B, 1)
    input_n = jnp.maximum(-C * (inp - sf) + inp, 0.0)
    input_r = jnp.round(input_n * I_MAX)                # Izhikevich input current

    # ---- node[0].n_reset() then Simulation_time steps of IzhNodeMU ---------
    bias = input_r + 140.0                              # hoisted out of the loop
    mem0 = jnp.full_like(inp, PARAM_MEM)
    u0 = jnp.full_like(inp, PARAM_U)
    cnt0 = jnp.zeros_like(inp)

    def izh_step(_, carry):
        mem, u, cnt = carry
        mem = mem + (mem * (0.04 * mem + 5.0) + bias - u)    # dt == 1 folded
        u = ONE_MINUS_A_DT * u + AB_DT * mem                 # u += a*(b*mem - u)
        fired_mask = mem > PARAM_THRESHOLD                   # one compare, reused
        spk = fired_mask.astype(jnp.float32)
        mem = jnp.where(fired_mask, PARAM_C, mem)            # reset to c on spike
        u = u + PARAM_D * spk                                # u += d on spike
        return (mem, u, cnt + spk)

    _, _, spikes = lax.fori_loop(0, SIMULATION_TIME, izh_step,
                                 (mem0, u0, cnt0), unroll=True)

    fr_n_ref[...] = spikes * (1.0 / SIMULATION_TIME)
    input_n_ref[...] = input_n

    # ---- S binarization; lateral-inhibition update gated on any firing -----
    S = jnp.where(input_n >= FIRE_THRESHOLD, 1.0, 0.0)  # binary {0,1}
    s_any = jnp.max(S, axis=1, keepdims=True)           # (TILE_B, 1): 1 iff any fired

    fired_new = fired + s_any                            # Fired += 1 where any neuron fired
    # Clamp the exp argument: Fired grows without bound over calls and
    # exp(>88) overflows f32 -> 0*inf = NaN where S==1 (latent in the PyTorch
    # original too).  Identical results for Fired <= 80.
    exp_f = jnp.exp(jnp.minimum(fired_new, 80.0))        # single hoisted EUP push

    wlat = wlat_ref[...]
    # 2 * acos(S) with S in {0,1}: acos(1)=0, acos(0)=pi/2  ->  pi * (1 - S)
    wlat_upd = jnp.tanh(wlat - PI * (1.0 - S) * exp_f - 1.0) + 1.0
    wlat_out_ref[...] = jnp.where(s_any > 0.0, wlat_upd, wlat)
    fired_out_ref[...] = fired_new


def s1net_forward(inp, fr, c, fired, w_latinh, conn_w, *, tile_b=TILE_B):
    """Batched S1Net forward.

    inp:      (B, NUM_NEURON)            per-sample input
    fr:       (B, NUM_CONN, NUM_NEURON)  stacked FR (2-D path), batch-major
    c:        (B, 1)                     per-sample C scalar
    fired:    (B, 1)                     per-sample Fired counter
    w_latinh: (B, NUM_NEURON)            recurrent lateral-inhibition weights
    conn_w:   (NUM_CONN, NUM_NEURON)     shared connection weights
    """
    B = inp.shape[0]
    assert B % tile_b == 0, "batch must be a multiple of the sublane tile"
    grid = (B // tile_b,)

    # Batch-major, contiguous FR slab: one DMA per grid block.
    fr_flat = fr.reshape(B, NUM_CONN * NUM_NEURON)
    w_flat = conn_w.reshape(1, NUM_CONN * NUM_NEURON)
    # Merge the per-sample scalars into one (B, 2) block: [:, 0]=C, [:, 1]=Fired.
    scal = jnp.concatenate([c, fired], axis=1)

    row_spec = pl.BlockSpec((tile_b, NUM_NEURON), lambda b: (b, 0))
    col_spec = pl.BlockSpec((tile_b, 1), lambda b: (b, 0))

    return pl.pallas_call(
        s1net_kernel,
        out_shape=(
            jax.ShapeDtypeStruct((B, NUM_S1), jnp.float32),      # FR_n
            jax.ShapeDtypeStruct((B, NUM_NEURON), jnp.float32),  # input_n
            jax.ShapeDtypeStruct((B, 1), jnp.float32),           # Fired
            jax.ShapeDtypeStruct((B, NUM_NEURON), jnp.float32),  # W_LatInh
        ),
        grid=grid,
        in_specs=[
            pl.BlockSpec((tile_b, 2), lambda b: (b, 0)),                     # [C, Fired]
            pl.BlockSpec((tile_b, NUM_CONN * NUM_NEURON), lambda b: (b, 0)),  # FR (flat)
            pl.BlockSpec((1, NUM_CONN * NUM_NEURON), lambda b: (0, 0)),       # conn weights
            row_spec,                                                         # input
            row_spec,                                                         # W_LatInh
        ],
        out_specs=(row_spec, row_spec, col_spec, row_spec),
        # Recurrent W_LatInh is updated in place — no separate HBM round-trip
        # for the carried buffer on repeated calls.
        input_output_aliases={4: 3},
        compiler_params=pltpu.CompilerParams(
            dimension_semantics=("parallel",)),       # v7x: 2 TCs split the batch
    )(scal, fr_flat, w_flat, inp, w_latinh)


if __name__ == "__main__":
    B = 2 * TILE_B                      # 128 samples -> 2 grid blocks (both v7x TCs busy)
    key = jax.random.PRNGKey(0)
    k_fr, k_w, k_in, k_lat, k_c = jax.random.split(key, 5)

    # connection[i].weight, stacked deterministically (shared across the batch)
    conn_w = 0.5 * jax.random.normal(k_w, (NUM_CONN, NUM_NEURON), dtype=jnp.float32)

    fr = jax.random.uniform(k_fr, (B, NUM_CONN, NUM_NEURON), dtype=jnp.float32)  # FR (2-D path)
    inp = jax.random.uniform(k_in, (B, NUM_NEURON), dtype=jnp.float32)           # input
    w_latinh = jax.random.uniform(k_lat, (B, NUM_NEURON), dtype=jnp.float32)     # W_LatInh
    c = 0.1 + 0.8 * jax.random.uniform(k_c, (B, 1), dtype=jnp.float32)           # C (per-sample scalar)
    fired = jnp.ones((B, 1), dtype=jnp.float32)                                  # Fired (per-sample scalar)

    fr_n, input_n, fired_out, w_latinh_out = jax.block_until_ready(
        s1net_forward(inp, fr, c, fired, w_latinh, conn_w))

    assert fr_n.shape == (B, NUM_S1)
    assert input_n.shape == (B, NUM_NEURON)
    assert fired_out.shape == (B, 1)
    assert w_latinh_out.shape == (B, NUM_NEURON)
    assert bool(jnp.all(jnp.isfinite(fr_n)))
    assert bool(jnp.all(jnp.isfinite(input_n)))
    assert bool(jnp.all(jnp.isfinite(w_latinh_out)))
    assert bool(jnp.all((fr_n >= 0.0) & (fr_n <= 1.0)))
    print("KERNEL_OK")
</pallas_src>

<mosaic_0001>
module attributes {stable_mosaic.version = 11 : i64} {
  func.func @s1net_kernel(%arg0: i32, %arg1: memref<64x2xf32, #tpu.memory_space<vmem>>, %arg2: memref<64x512xf32, #tpu.memory_space<vmem>>, %arg3: memref<1x512xf32, #tpu.memory_space<vmem>>, %arg4: memref<64x128xf32, #tpu.memory_space<vmem>>, %arg5: memref<64x128xf32, #tpu.memory_space<vmem>>, %arg6: memref<64x128xf32, #tpu.memory_space<vmem>>, %arg7: memref<64x128xf32, #tpu.memory_space<vmem>>, %arg8: memref<64x1xf32, #tpu.memory_space<vmem>>, %arg9: memref<64x128xf32, #tpu.memory_space<vmem>>) attributes {dimension_semantics = [#tpu.dimension_semantics<parallel>], iteration_bounds = array<i64: 2>, scalar_prefetch = 0 : i64, scratch_operands = 0 : i64, tpu.core_type = #tpu.core_type<tc>, window_params = [{transform_indices = @transform_0, window_bounds = array<i64: 64, 2>}, {transform_indices = @transform_1, window_bounds = array<i64: 64, 512>}, {pipeline_mode = #tpu.pipeline_mode<synchronous>, transform_indices = @transform_2, window_bounds = array<i64: 1, 512>}, {transform_indices = @transform_3, window_bounds = array<i64: 64, 128>}, {transform_indices = @transform_4, window_bounds = array<i64: 64, 128>}, {transform_indices = @transform_5, window_bounds = array<i64: 64, 128>}, {transform_indices = @transform_6, window_bounds = array<i64: 64, 128>}, {transform_indices = @transform_7, window_bounds = array<i64: 64, 1>}, {transform_indices = @transform_8, window_bounds = array<i64: 64, 128>}]} {
    %c0 = arith.constant 0 : index
    %c0_0 = arith.constant 0 : index
    %0 = vector.load %arg3[%c0, %c0_0] : memref<1x512xf32, #tpu.memory_space<vmem>>, vector<1x512xf32>
    %1 = vector.shape_cast %0 : vector<1x512xf32> to vector<1x512xf32>
    %2 = vector.broadcast %1 : vector<1x512xf32> to vector<64x512xf32>
    %c0_1 = arith.constant 0 : index
    %c0_2 = arith.constant 0 : index
    %3 = vector.load %arg2[%c0_1, %c0_2] : memref<64x512xf32, #tpu.memory_space<vmem>>, vector<64x512xf32>
    %4 = arith.mulf %3, %2 : vector<64x512xf32>
    %5 = vector.extract_strided_slice %4 {offsets = [0, 0], sizes = [64, 128], strides = [1, 1]} : vector<64x512xf32> to vector<64x128xf32>
    %6 = vector.extract_strided_slice %4 {offsets = [0, 128], sizes = [64, 128], strides = [1, 1]} : vector<64x512xf32> to vector<64x128xf32>
    %7 = arith.addf %5, %6 : vector<64x128xf32>
    %8 = vector.extract_strided_slice %4 {offsets = [0, 256], sizes = [64, 128], strides = [1, 1]} : vector<64x512xf32> to vector<64x128xf32>
    %9 = arith.addf %7, %8 : vector<64x128xf32>
    %10 = vector.extract_strided_slice %4 {offsets = [0, 384], sizes = [64, 128], strides = [1, 1]} : vector<64x512xf32> to vector<64x128xf32>
    %11 = arith.addf %9, %10 : vector<64x128xf32>
    %12 = math.tanh %11 : vector<64x128xf32>
    %cst = arith.constant 0.000000e+00 : f32
    %13 = vector.broadcast %cst : f32 to vector<64x128xf32>
    %14 = arith.maximumf %12, %13 : vector<64x128xf32>
    %c0_3 = arith.constant 0 : index
    %c0_4 = arith.constant 0 : index
    %15 = vector.load %arg4[%c0_3, %c0_4] : memref<64x128xf32, #tpu.memory_space<vmem>>, vector<64x128xf32>
    %c0_5 = arith.constant 0 : index
    %c0_6 = arith.constant 0 : index
    %16 = vector.load %arg1[%c0_5, %c0_6] : memref<64x2xf32, #tpu.memory_space<vmem>>, vector<64x1xf32>
    %c0_7 = arith.constant 0 : index
    %c1 = arith.constant 1 : index
    %17 = vector.load %arg1[%c0_7, %c1] : memref<64x2xf32, #tpu.memory_space<vmem>>, vector<64x1xf32>
    %cst_8 = arith.constant 0.000000e+00 : f32
    %18 = vector.broadcast %cst_8 : f32 to vector<64x1xf32>
    %19 = arith.subf %18, %16 : vector<64x1xf32>
    %20 = arith.subf %15, %14 : vector<64x128xf32>
    %21 = vector.broadcast %19 : vector<64x1xf32> to vector<64x128xf32>
    %22 = arith.mulf %21, %20 : vector<64x128xf32>
    %23 = arith.addf %22, %15 : vector<64x128xf32>
    %cst_9 = arith.constant 0.000000e+00 : f32
    %24 = vector.broadcast %cst_9 : f32 to vector<64x128xf32>
    %25 = arith.maximumf %23, %24 : vector<64x128xf32>
    %cst_10 = arith.constant 1.000000e+01 : f32
    %26 = vector.broadcast %cst_10 : f32 to vector<64x128xf32>
    %27 = arith.mulf %25, %26 : vector<64x128xf32>
    %28 = math.roundeven %27 : vector<64x128xf32>
    %cst_11 = arith.constant 1.400000e+02 : f32
    %29 = vector.broadcast %cst_11 : f32 to vector<64x128xf32>
    %30 = arith.addf %28, %29 : vector<64x128xf32>
    %cst_12 = arith.constant -7.000000e+01 : f32
    %31 = vector.broadcast %cst_12 : f32 to vector<64x128xf32>
    %cst_13 = arith.constant -1.400000e+01 : f32
    %32 = vector.broadcast %cst_13 : f32 to vector<64x128xf32>
    %cst_14 = arith.constant 0.000000e+00 : f32
    %33 = vector.broadcast %cst_14 : f32 to vector<64x128xf32>
    %c0_i32 = arith.constant 0 : i32
    %cst_15 = arith.constant 4.000000e-02 : f32
    %34 = vector.broadcast %cst_15 : f32 to vector<64x128xf32>
    %35 = arith.mulf %34, %31 : vector<64x128xf32>
    %cst_16 = arith.constant 5.000000e+00 : f32
    %36 = vector.broadcast %cst_16 : f32 to vector<64x128xf32>
    %37 = arith.addf %35, %36 : vector<64x128xf32>
    %38 = arith.mulf %31, %37 : vector<64x128xf32>
    %39 = arith.addf %38, %30 : vector<64x128xf32>
    %40 = arith.subf %39, %32 : vector<64x128xf32>
    %41 = arith.addf %31, %40 : vector<64x128xf32>
    %cst_17 = arith.constant 9.800000e-01 : f32
    %42 = vector.broadcast %cst_17 : f32 to vector<64x128xf32>
    %43 = arith.mulf %42, %32 : vector<64x128xf32>
    %cst_18 = arith.constant 4.000000e-03 : f32
    %44 = vector.broadcast %cst_18 : f32 to vector<64x128xf32>
    %45 = arith.mulf %44, %41 : vector<64x128xf32>
    %46 = arith.addf %43, %45 : vector<64x128xf32>
    %cst_19 = arith.constant 3.000000e+01 : f32
    %47 = vector.broadcast %cst_19 : f32 to vector<64x128xf32>
    %48 = arith.cmpf ogt, %41, %47 : vector<64x128xf32>
    %49 = arith.extui %48 : vector<64x128xi1> to vector<64x128xi32>
    %50 = arith.sitofp %49 : vector<64x128xi32> to vector<64x128xf32>
    %cst_20 = arith.constant -6.500000e+01 : f32
    %51 = vector.broadcast %cst_20 : f32 to vector<64x128xf32>
    %52 = arith.select %48, %51, %41 : vector<64x128xi1>, vector<64x128xf32>
    %cst_21 = arith.constant 8.000000e+00 : f32
    %53 = vector.broadcast %cst_21 : f32 to vector<64x128xf32>
    %54 = arith.mulf %53, %50 : vector<64x128xf32>
    %55 = arith.addf %46, %54 : vector<64x128xf32>
    %56 = arith.addf %33, %50 : vector<64x128xf32>
    %c1_i32 = arith.constant 1 : i32
    %cst_22 = arith.constant 4.000000e-02 : f32
    %57 = vector.broadcast %cst_22 : f32 to vector<64x128xf32>
    %58 = arith.mulf %57, %52 : vector<64x128xf32>
    %cst_23 = arith.constant 5.000000e+00 : f32
    %59 = vector.broadcast %cst_23 : f32 to vector<64x128xf32>
    %60 = arith.addf %58, %59 : vector<64x128xf32>
    %61 = arith.mulf %52, %60 : vector<64x128xf32>
    %62 = arith.addf %61, %30 : vector<64x128xf32>
    %63 = arith.subf %62, %55 : vector<64x128xf32>
    %64 = arith.addf %52, %63 : vector<64x128xf32>
    %cst_24 = arith.constant 9.800000e-01 : f32
    %65 = vector.broadcast %cst_24 : f32 to vector<64x128xf32>
    %66 = arith.mulf %65, %55 : vector<64x128xf32>
    %cst_25 = arith.constant 4.000000e-03 : f32
    %67 = vector.broadcast %cst_25 : f32 to vector<64x128xf32>
    %68 = arith.mulf %67, %64 : vector<64x128xf32>
    %69 = arith.addf %66, %68 : vector<64x128xf32>
    %cst_26 = arith.constant 3.000000e+01 : f32
    %70 = vector.broadcast %cst_26 : f32 to vector<64x128xf32>
    %71 = arith.cmpf ogt, %64, %70 : vector<64x128xf32>
    %72 = arith.extui %71 : vector<64x128xi1> to vector<64x128xi32>
    %73 = arith.sitofp %72 : vector<64x128xi32> to vector<64x128xf32>
    %cst_27 = arith.constant -6.500000e+01 : f32
    %74 = vector.broadcast %cst_27 : f32 to vector<64x128xf32>
    %75 = arith.select %71, %74, %64 : vector<64x128xi1>, vector<64x128xf32>
    %cst_28 = arith.constant 8.000000e+00 : f32
    %76 = vector.broadcast %cst_28 : f32 to vector<64x128xf32>
    %77 = arith.mulf %76, %73 : vector<64x128xf32>
    %78 = arith.addf %69, %77 : vector<64x128xf32>
    %79 = arith.addf %56, %73 : vector<64x128xf32>
    %c2_i32 = arith.constant 2 : i32
    %cst_29 = arith.constant 4.000000e-02 : f32
    %80 = vector.broadcast %cst_29 : f32 to vector<64x128xf32>
    %81 = arith.mulf %80, %75 : vector<64x128xf32>
    %cst_30 = arith.constant 5.000000e+00 : f32
    %82 = vector.broadcast %cst_30 : f32 to vector<64x128xf32>
    %83 = arith.addf %81, %82 : vector<64x128xf32>
    %84 = arith.mulf %75, %83 : vector<64x128xf32>
    %85 = arith.addf %84, %30 : vector<64x128xf32>
    %86 = arith.subf %85, %78 : vector<64x128xf32>
    %87 = arith.addf %75, %86 : vector<64x128xf32>
    %cst_31 = arith.constant 9.800000e-01 : f32
    %88 = vector.broadcast %cst_31 : f32 to vector<64x128xf32>
    %89 = arith.mulf %88, %78 : vector<64x128xf32>
    %cst_32 = arith.constant 4.000000e-03 : f32
    %90 = vector.broadcast %cst_32 : f32 to vector<64x128xf32>
    %91 = arith.mulf %90, %87 : vector<64x128xf32>
    %92 = arith.addf %89, %91 : vector<64x128xf32>
    %cst_33 = arith.constant 3.000000e+01 : f32
    %93 = vector.broadcast %cst_33 : f32 to vector<64x128xf32>
    %94 = arith.cmpf ogt, %87, %93 : vector<64x128xf32>
    %95 = arith.extui %94 : vector<64x128xi1> to vector<64x128xi32>
    %96 = arith.sitofp %95 : vector<64x128xi32> to vector<64x128xf32>
    %cst_34 = arith.constant -6.500000e+01 : f32
    %97 = vector.broadcast %cst_34 : f32 to vector<64x128xf32>
    %98 = arith.select %94, %97, %87 : vector<64x128xi1>, vector<64x128xf32>
    %cst_35 = arith.constant 8.000000e+00 : f32
    %99 = vector.broadcast %cst_35 : f32 to vector<64x128xf32>
    %100 = arith.mulf %99, %96 : vector<64x128xf32>
    %101 = arith.addf %92, %100 : vector<64x128xf32>
    %102 = arith.addf %79, %96 : vector<64x128xf32>
    %c3_i32 = arith.constant 3 : i32
    %cst_36 = arith.constant 4.000000e-02 : f32
    %103 = vector.broadcast %cst_36 : f32 to vector<64x128xf32>
    %104 = arith.mulf %103, %98 : vector<64x128xf32>
    %cst_37 = arith.constant 5.000000e+00 : f32
    %105 = vector.broadcast %cst_37 : f32 to vector<64x128xf32>
    %106 = arith.addf %104, %105 : vector<64x128xf32>
    %107 = arith.mulf %98, %106 : vector<64x128xf32>
    %108 = arith.addf %107, %30 : vector<64x128xf32>
    %109 = arith.subf %108, %101 : vector<64x128xf32>
    %110 = arith.addf %98, %109 : vector<64x128xf32>
    %cst_38 = arith.constant 9.800000e-01 : f32
    %111 = vector.broadcast %cst_38 : f32 to vector<64x128xf32>
    %112 = arith.mulf %111, %101 : vector<64x128xf32>
    %cst_39 = arith.constant 4.000000e-03 : f32
    %113 = vector.broadcast %cst_39 : f32 to vector<64x128xf32>
    %114 = arith.mulf %113, %110 : vector<64x128xf32>
    %115 = arith.addf %112, %114 : vector<64x128xf32>
    %cst_40 = arith.constant 3.000000e+01 : f32
    %116 = vector.broadcast %cst_40 : f32 to vector<64x128xf32>
    %117 = arith.cmpf ogt, %110, %116 : vector<64x128xf32>
    %118 = arith.extui %117 : vector<64x128xi1> to vector<64x128xi32>
    %119 = arith.sitofp %118 : vector<64x128xi32> to vector<64x128xf32>
    %cst_41 = arith.constant -6.500000e+01 : f32
    %120 = vector.broadcast %cst_41 : f32 to vector<64x128xf32>
    %121 = arith.select %117, %120, %110 : vector<64x128xi1>, vector<64x128xf32>
    %cst_42 = arith.constant 8.000000e+00 : f32
    %122 = vector.broadcast %cst_42 : f32 to vector<64x128xf32>
    %123 = arith.mulf %122, %119 : vector<64x128xf32>
    %124 = arith.addf %115, %123 : vector<64x128xf32>
    %125 = arith.addf %102, %119 : vector<64x128xf32>
    %c4_i32 = arith.constant 4 : i32
    %cst_43 = arith.constant 4.000000e-02 : f32
    %126 = vector.broadcast %cst_43 : f32 to vector<64x128xf32>
    %127 = arith.mulf %126, %121 : vector<64x128xf32>
    %cst_44 = arith.constant 5.000000e+00 : f32
    %128 = vector.broadcast %cst_44 : f32 to vector<64x128xf32>
    %129 = arith.addf %127, %128 : vector<64x128xf32>
    %130 = arith.mulf %121, %129 : vector<64x128xf32>
    %131 = arith.addf %130, %30 : vector<64x128xf32>
    %132 = arith.subf %131, %124 : vector<64x128xf32>
    %133 = arith.addf %121, %132 : vector<64x128xf32>
    %cst_45 = arith.constant 9.800000e-01 : f32
    %134 = vector.broadcast %cst_45 : f32 to vector<64x128xf32>
    %135 = arith.mulf %134, %124 : vector<64x128xf32>
    %cst_46 = arith.constant 4.000000e-03 : f32
    %136 = vector.broadcast %cst_46 : f32 to vector<64x128xf32>
    %137 = arith.mulf %136, %133 : vector<64x128xf32>
    %138 = arith.addf %135, %137 : vector<64x128xf32>
    %cst_47 = arith.constant 3.000000e+01 : f32
    %139 = vector.broadcast %cst_47 : f32 to vector<64x128xf32>
    %140 = arith.cmpf ogt, %133, %139 : vector<64x128xf32>
    %141 = arith.extui %140 : vector<64x128xi1> to vector<64x128xi32>
    %142 = arith.sitofp %141 : vector<64x128xi32> to vector<64x128xf32>
    %cst_48 = arith.constant -6.500000e+01 : f32
    %143 = vector.broadcast %cst_48 : f32 to vector<64x128xf32>
    %144 = arith.select %140, %143, %133 : vector<64x128xi1>, vector<64x128xf32>
    %cst_49 = arith.constant 8.000000e+00 : f32
    %145 = vector.broadcast %cst_49 : f32 to vector<64x128xf32>
    %146 = arith.mulf %145, %142 : vector<64x128xf32>
    %147 = arith.addf %138, %146 : vector<64x128xf32>
    %148 = arith.addf %125, %142 : vector<64x128xf32>
    %c5_i32 = arith.constant 5 : i32
    %cst_50 = arith.constant 4.000000e-02 : f32
    %149 = vector.broadcast %cst_50 : f32 to vector<64x128xf32>
    %150 = arith.mulf %149, %144 : vector<64x128xf32>
    %cst_51 = arith.constant 5.000000e+00 : f32
    %151 = vector.broadcast %cst_51 : f32 to vector<64x128xf32>
    %152 = arith.addf %150, %151 : vector<64x128xf32>
    %153 = arith.mulf %144, %152 : vector<64x128xf32>
    %154 = arith.addf %153, %30 : vector<64x128xf32>
    %155 = arith.subf %154, %147 : vector<64x128xf32>
    %156 = arith.addf %144, %155 : vector<64x128xf32>
    %cst_52 = arith.constant 9.800000e-01 : f32
    %157 = vector.broadcast %cst_52 : f32 to vector<64x128xf32>
    %158 = arith.mulf %157, %147 : vector<64x128xf32>
    %cst_53 = arith.constant 4.000000e-03 : f32
    %159 = vector.broadcast %cst_53 : f32 to vector<64x128xf32>
    %160 = arith.mulf %159, %156 : vector<64x128xf32>
    %161 = arith.addf %158, %160 : vector<64x128xf32>
    %cst_54 = arith.constant 3.000000e+01 : f32
    %162 = vector.broadcast %cst_54 : f32 to vector<64x128xf32>
    %163 = arith.cmpf ogt, %156, %162 : vector<64x128xf32>
    %164 = arith.extui %163 : vector<64x128xi1> to vector<64x128xi32>
    %165 = arith.sitofp %164 : vector<64x128xi32> to vector<64x128xf32>
    %cst_55 = arith.constant -6.500000e+01 : f32
    %166 = vector.broadcast %cst_55 : f32 to vector<64x128xf32>
    %167 = arith.select %163, %166, %156 : vector<64x128xi1>, vector<64x128xf32>
    %cst_56 = arith.constant 8.000000e+00 : f32
    %168 = vector.broadcast %cst_56 : f32 to vector<64x128xf32>
    %169 = arith.mulf %168, %165 : vector<64x128xf32>
    %170 = arith.addf %161, %169 : vector<64x128xf32>
    %171 = arith.addf %148, %165 : vector<64x128xf32>
    %c6_i32 = arith.constant 6 : i32
    %cst_57 = arith.constant 4.000000e-02 : f32
    %172 = vector.broadcast %cst_57 : f32 to vector<64x128xf32>
    %173 = arith.mulf %172, %167 : vector<64x128xf32>
    %cst_58 = arith.constant 5.000000e+00 : f32
    %174 = vector.broadcast %cst_58 : f32 to vector<64x128xf32>
    %175 = arith.addf %173, %174 : vector<64x128xf32>
    %176 = arith.mulf %167, %175 : vector<64x128xf32>
    %177 = arith.addf %176, %30 : vector<64x128xf32>
    %178 = arith.subf %177, %170 : vector<64x128xf32>
    %179 = arith.addf %167, %178 : vector<64x128xf32>
    %cst_59 = arith.constant 9.800000e-01 : f32
    %180 = vector.broadcast %cst_59 : f32 to vector<64x128xf32>
    %181 = arith.mulf %180, %170 : vector<64x128xf32>
    %cst_60 = arith.constant 4.000000e-03 : f32
    %182 = vector.broadcast %cst_60 : f32 to vector<64x128xf32>
    %183 = arith.mulf %182, %179 : vector<64x128xf32>
    %184 = arith.addf %181, %183 : vector<64x128xf32>
    %cst_61 = arith.constant 3.000000e+01 : f32
    %185 = vector.broadcast %cst_61 : f32 to vector<64x128xf32>
    %186 = arith.cmpf ogt, %179, %185 : vector<64x128xf32>
    %187 = arith.extui %186 : vector<64x128xi1> to vector<64x128xi32>
    %188 = arith.sitofp %187 : vector<64x128xi32> to vector<64x128xf32>
    %cst_62 = arith.constant -6.500000e+01 : f32
    %189 = vector.broadcast %cst_62 : f32 to vector<64x128xf32>
    %190 = arith.select %186, %189, %179 : vector<64x128xi1>, vector<64x128xf32>
    %cst_63 = arith.constant 8.000000e+00 : f32
    %191 = vector.broadcast %cst_63 : f32 to vector<64x128xf32>
    %192 = arith.mulf %191, %188 : vector<64x128xf32>
    %193 = arith.addf %184, %192 : vector<64x128xf32>
    %194 = arith.addf %171, %188 : vector<64x128xf32>
    %c7_i32 = arith.constant 7 : i32
    %cst_64 = arith.constant 4.000000e-02 : f32
    %195 = vector.broadcast %cst_64 : f32 to vector<64x128xf32>
    %196 = arith.mulf %195, %190 : vector<64x128xf32>
    %cst_65 = arith.constant 5.000000e+00 : f32
    %197 = vector.broadcast %cst_65 : f32 to vector<64x128xf32>
    %198 = arith.addf %196, %197 : vector<64x128xf32>
    %199 = arith.mulf %190, %198 : vector<64x128xf32>
    %200 = arith.addf %199, %30 : vector<64x128xf32>
    %201 = arith.subf %200, %193 : vector<64x128xf32>
    %202 = arith.addf %190, %201 : vector<64x128xf32>
    %cst_66 = arith.constant 9.800000e-01 : f32
    %203 = vector.broadcast %cst_66 : f32 to vector<64x128xf32>
    %204 = arith.mulf %203, %193 : vector<64x128xf32>
    %cst_67 = arith.constant 4.000000e-03 : f32
    %205 = vector.broadcast %cst_67 : f32 to vector<64x128xf32>
    %206 = arith.mulf %205, %202 : vector<64x128xf32>
    %207 = arith.addf %204, %206 : vector<64x128xf32>
    %cst_68 = arith.constant 3.000000e+01 : f32
    %208 = vector.broadcast %cst_68 : f32 to vector<64x128xf32>
    %209 = arith.cmpf ogt, %202, %208 : vector<64x128xf32>
    %210 = arith.extui %209 : vector<64x128xi1> to vector<64x128xi32>
    %211 = arith.sitofp %210 : vector<64x128xi32> to vector<64x128xf32>
    %cst_69 = arith.constant -6.500000e+01 : f32
    %212 = vector.broadcast %cst_69 : f32 to vector<64x128xf32>
    %213 = arith.select %209, %212, %202 : vector<64x128xi1>, vector<64x128xf32>
    %cst_70 = arith.constant 8.000000e+00 : f32
    %214 = vector.broadcast %cst_70 : f32 to vector<64x128xf32>
    %215 = arith.mulf %214, %211 : vector<64x128xf32>
    %216 = arith.addf %207, %215 : vector<64x128xf32>
    %217 = arith.addf %194, %211 : vector<64x128xf32>
    %c8_i32 = arith.constant 8 : i32
    %cst_71 = arith.constant 4.000000e-02 : f32
    %218 = vector.broadcast %cst_71 : f32 to vector<64x128xf32>
    %219 = arith.mulf %218, %213 : vector<64x128xf32>
    %cst_72 = arith.constant 5.000000e+00 : f32
    %220 = vector.broadcast %cst_72 : f32 to vector<64x128xf32>
    %221 = arith.addf %219, %220 : vector<64x128xf32>
    %222 = arith.mulf %213, %221 : vector<64x128xf32>
    %223 = arith.addf %222, %30 : vector<64x128xf32>
    %224 = arith.subf %223, %216 : vector<64x128xf32>
    %225 = arith.addf %213, %224 : vector<64x128xf32>
    %cst_73 = arith.constant 9.800000e-01 : f32
    %226 = vector.broadcast %cst_73 : f32 to vector<64x128xf32>
    %227 = arith.mulf %226, %216 : vector<64x128xf32>
    %cst_74 = arith.constant 4.000000e-03 : f32
    %228 = vector.broadcast %cst_74 : f32 to vector<64x128xf32>
    %229 = arith.mulf %228, %225 : vector<64x128xf32>
    %230 = arith.addf %227, %229 : vector<64x128xf32>
    %cst_75 = arith.constant 3.000000e+01 : f32
    %231 = vector.broadcast %cst_75 : f32 to vector<64x128xf32>
    %232 = arith.cmpf ogt, %225, %231 : vector<64x128xf32>
    %233 = arith.extui %232 : vector<64x128xi1> to vector<64x128xi32>
    %234 = arith.sitofp %233 : vector<64x128xi32> to vector<64x128xf32>
    %cst_76 = arith.constant -6.500000e+01 : f32
    %235 = vector.broadcast %cst_76 : f32 to vector<64x128xf32>
    %236 = arith.select %232, %235, %225 : vector<64x128xi1>, vector<64x128xf32>
    %cst_77 = arith.constant 8.000000e+00 : f32
    %237 = vector.broadcast %cst_77 : f32 to vector<64x128xf32>
    %238 = arith.mulf %237, %234 : vector<64x128xf32>
    %239 = arith.addf %230, %238 : vector<64x128xf32>
    %240 = arith.addf %217, %234 : vector<64x128xf32>
    %c9_i32 = arith.constant 9 : i32
    %cst_78 = arith.constant 4.000000e-02 : f32
    %241 = vector.broadcast %cst_78 : f32 to vector<64x128xf32>
    %242 = arith.mulf %241, %236 : vector<64x128xf32>
    %cst_79 = arith.constant 5.000000e+00 : f32
    %243 = vector.broadcast %cst_79 : f32 to vector<64x128xf32>
    %244 = arith.addf %242, %243 : vector<64x128xf32>
    %245 = arith.mulf %236, %244 : vector<64x128xf32>
    %246 = arith.addf %245, %30 : vector<64x128xf32>
    %247 = arith.subf %246, %239 : vector<64x128xf32>
    %248 = arith.addf %236, %247 : vector<64x128xf32>
    %cst_80 = arith.constant 9.800000e-01 : f32
    %249 = vector.broadcast %cst_80 : f32 to vector<64x128xf32>
    %250 = arith.mulf %249, %239 : vector<64x128xf32>
    %cst_81 = arith.constant 4.000000e-03 : f32
    %251 = vector.broadcast %cst_81 : f32 to vector<64x128xf32>
    %252 = arith.mulf %251, %248 : vector<64x128xf32>
    %253 = arith.addf %250, %252 : vector<64x128xf32>
    %cst_82 = arith.constant 3.000000e+01 : f32
    %254 = vector.broadcast %cst_82 : f32 to vector<64x128xf32>
    %255 = arith.cmpf ogt, %248, %254 : vector<64x128xf32>
    %256 = arith.extui %255 : vector<64x128xi1> to vector<64x128xi32>
    %257 = arith.sitofp %256 : vector<64x128xi32> to vector<64x128xf32>
    %cst_83 = arith.constant -6.500000e+01 : f32
    %258 = vector.broadcast %cst_83 : f32 to vector<64x128xf32>
    %259 = arith.select %255, %258, %248 : vector<64x128xi1>, vector<64x128xf32>
    %cst_84 = arith.constant 8.000000e+00 : f32
    %260 = vector.broadcast %cst_84 : f32 to vector<64x128xf32>
    %261 = arith.mulf %260, %257 : vector<64x128xf32>
    %262 = arith.addf %253, %261 : vector<64x128xf32>
    %263 = arith.addf %240, %257 : vector<64x128xf32>
    %c10_i32 = arith.constant 10 : i32
    %cst_85 = arith.constant 4.000000e-02 : f32
    %264 = vector.broadcast %cst_85 : f32 to vector<64x128xf32>
    %265 = arith.mulf %264, %259 : vector<64x128xf32>
    %cst_86 = arith.constant 5.000000e+00 : f32
    %266 = vector.broadcast %cst_86 : f32 to vector<64x128xf32>
    %267 = arith.addf %265, %266 : vector<64x128xf32>
    %268 = arith.mulf %259, %267 : vector<64x128xf32>
    %269 = arith.addf %268, %30 : vector<64x128xf32>
    %270 = arith.subf %269, %262 : vector<64x128xf32>
    %271 = arith.addf %259, %270 : vector<64x128xf32>
    %cst_87 = arith.constant 9.800000e-01 : f32
    %272 = vector.broadcast %cst_87 : f32 to vector<64x128xf32>
    %273 = arith.mulf %272, %262 : vector<64x128xf32>
    %cst_88 = arith.constant 4.000000e-03 : f32
    %274 = vector.broadcast %cst_88 : f32 to vector<64x128xf32>
    %275 = arith.mulf %274, %271 : vector<64x128xf32>
    %276 = arith.addf %273, %275 : vector<64x128xf32>
    %cst_89 = arith.constant 3.000000e+01 : f32
    %277 = vector.broadcast %cst_89 : f32 to vector<64x128xf32>
    %278 = arith.cmpf ogt, %271, %277 : vector<64x128xf32>
    %279 = arith.extui %278 : vector<64x128xi1> to vector<64x128xi32>
    %280 = arith.sitofp %279 : vector<64x128xi32> to vector<64x128xf32>
    %cst_90 = arith.constant -6.500000e+01 : f32
    %281 = vector.broadcast %cst_90 : f32 to vector<64x128xf32>
    %282 = arith.select %278, %281, %271 : vector<64x128xi1>, vector<64x128xf32>
    %cst_91 = arith.constant 8.000000e+00 : f32
    %283 = vector.broadcast %cst_91 : f32 to vector<64x128xf32>
    %284 = arith.mulf %283, %280 : vector<64x128xf32>
    %285 = arith.addf %276, %284 : vector<64x128xf32>
    %286 = arith.addf %263, %280 : vector<64x128xf32>
    %c11_i32 = arith.constant 11 : i32
    %cst_92 = arith.constant 4.000000e-02 : f32
    %287 = vector.broadcast %cst_92 : f32 to vector<64x128xf32>
    %288 = arith.mulf %287, %282 : vector<64x128xf32>
    %cst_93 = arith.constant 5.000000e+00 : f32
    %289 = vector.broadcast %cst_93 : f32 to vector<64x128xf32>
    %290 = arith.addf %288, %289 : vector<64x128xf32>
    %291 = arith.mulf %282, %290 : vector<64x128xf32>
    %292 = arith.addf %291, %30 : vector<64x128xf32>
    %293 = arith.subf %292, %285 : vector<64x128xf32>
    %294 = arith.addf %282, %293 : vector<64x128xf32>
    %cst_94 = arith.constant 9.800000e-01 : f32
    %295 = vector.broadcast %cst_94 : f32 to vector<64x128xf32>
    %296 = arith.mulf %295, %285 : vector<64x128xf32>
    %cst_95 = arith.constant 4.000000e-03 : f32
    %297 = vector.broadcast %cst_95 : f32 to vector<64x128xf32>
    %298 = arith.mulf %297, %294 : vector<64x128xf32>
    %299 = arith.addf %296, %298 : vector<64x128xf32>
    %cst_96 = arith.constant 3.000000e+01 : f32
    %300 = vector.broadcast %cst_96 : f32 to vector<64x128xf32>
    %301 = arith.cmpf ogt, %294, %300 : vector<64x128xf32>
    %302 = arith.extui %301 : vector<64x128xi1> to vector<64x128xi32>
    %303 = arith.sitofp %302 : vector<64x128xi32> to vector<64x128xf32>
    %cst_97 = arith.constant -6.500000e+01 : f32
    %304 = vector.broadcast %cst_97 : f32 to vector<64x128xf32>
    %305 = arith.select %301, %304, %294 : vector<64x128xi1>, vector<64x128xf32>
    %cst_98 = arith.constant 8.000000e+00 : f32
    %306 = vector.broadcast %cst_98 : f32 to vector<64x128xf32>
    %307 = arith.mulf %306, %303 : vector<64x128xf32>
    %308 = arith.addf %299, %307 : vector<64x128xf32>
    %309 = arith.addf %286, %303 : vector<64x128xf32>
    %c12_i32 = arith.constant 12 : i32
    %cst_99 = arith.constant 4.000000e-02 : f32
    %310 = vector.broadcast %cst_99 : f32 to vector<64x128xf32>
    %311 = arith.mulf %310, %305 : vector<64x128xf32>
    %cst_100 = arith.constant 5.000000e+00 : f32
    %312 = vector.broadcast %cst_100 : f32 to vector<64x128xf32>
    %313 = arith.addf %311, %312 : vector<64x128xf32>
    %314 = arith.mulf %305, %313 : vector<64x128xf32>
    %315 = arith.addf %314, %30 : vector<64x128xf32>
    %316 = arith.subf %315, %308 : vector<64x128xf32>
    %317 = arith.addf %305, %316 : vector<64x128xf32>
    %cst_101 = arith.constant 9.800000e-01 : f32
    %318 = vector.broadcast %cst_101 : f32 to vector<64x128xf32>
    %319 = arith.mulf %318, %308 : vector<64x128xf32>
    %cst_102 = arith.constant 4.000000e-03 : f32
    %320 = vector.broadcast %cst_102 : f32 to vector<64x128xf32>
    %321 = arith.mulf %320, %317 : vector<64x128xf32>
    %322 = arith.addf %319, %321 : vector<64x128xf32>
    %cst_103 = arith.constant 3.000000e+01 : f32
    %323 = vector.broadcast %cst_103 : f32 to vector<64x128xf32>
    %324 = arith.cmpf ogt, %317, %323 : vector<64x128xf32>
    %325 = arith.extui %324 : vector<64x128xi1> to vector<64x128xi32>
    %326 = arith.sitofp %325 : vector<64x128xi32> to vector<64x128xf32>
    %cst_104 = arith.constant -6.500000e+01 : f32
    %327 = vector.broadcast %cst_104 : f32 to vector<64x128xf32>
    %328 = arith.select %324, %327, %317 : vector<64x128xi1>, vector<64x128xf32>
    %cst_105 = arith.constant 8.000000e+00 : f32
    %329 = vector.broadcast %cst_105 : f32 to vector<64x128xf32>
    %330 = arith.mulf %329, %326 : vector<64x128xf32>
    %331 = arith.addf %322, %330 : vector<64x128xf32>
    %332 = arith.addf %309, %326 : vector<64x128xf32>
    %c13_i32 = arith.constant 13 : i32
    %cst_106 = arith.constant 4.000000e-02 : f32
    %333 = vector.broadcast %cst_106 : f32 to vector<64x128xf32>
    %334 = arith.mulf %333, %328 : vector<64x128xf32>
    %cst_107 = arith.constant 5.000000e+00 : f32
    %335 = vector.broadcast %cst_107 : f32 to vector<64x128xf32>
    %336 = arith.addf %334, %335 : vector<64x128xf32>
    %337 = arith.mulf %328, %336 : vector<64x128xf32>
    %338 = arith.addf %337, %30 : vector<64x128xf32>
    %339 = arith.subf %338, %331 : vector<64x128xf32>
    %340 = arith.addf %328, %339 : vector<64x128xf32>
    %cst_108 = arith.constant 9.800000e-01 : f32
    %341 = vector.broadcast %cst_108 : f32 to vector<64x128xf32>
    %342 = arith.mulf %341, %331 : vector<64x128xf32>
    %cst_109 = arith.constant 4.000000e-03 : f32
    %343 = vector.broadcast %cst_109 : f32 to vector<64x128xf32>
    %344 = arith.mulf %343, %340 : vector<64x128xf32>
    %345 = arith.addf %342, %344 : vector<64x128xf32>
    %cst_110 = arith.constant 3.000000e+01 : f32
    %346 = vector.broadcast %cst_110 : f32 to vector<64x128xf32>
    %347 = arith.cmpf ogt, %340, %346 : vector<64x128xf32>
    %348 = arith.extui %347 : vector<64x128xi1> to vector<64x128xi32>
    %349 = arith.sitofp %348 : vector<64x128xi32> to vector<64x128xf32>
    %cst_111 = arith.constant -6.500000e+01 : f32
    %350 = vector.broadcast %cst_111 : f32 to vector<64x128xf32>
    %351 = arith.select %347, %350, %340 : vector<64x128xi1>, vector<64x128xf32>
    %cst_112 = arith.constant 8.000000e+00 : f32
    %352 = vector.broadcast %cst_112 : f32 to vector<64x128xf32>
    %353 = arith.mulf %352, %349 : vector<64x128xf32>
    %354 = arith.addf %345, %353 : vector<64x128xf32>
    %355 = arith.addf %332, %349 : vector<64x128xf32>
    %c14_i32 = arith.constant 14 : i32
    %cst_113 = arith.constant 4.000000e-02 : f32
    %356 = vector.broadcast %cst_113 : f32 to vector<64x128xf32>
    %357 = arith.mulf %356, %351 : vector<64x128xf32>
    %cst_114 = arith.constant 5.000000e+00 : f32
    %358 = vector.broadcast %cst_114 : f32 to vector<64x128xf32>
    %359 = arith.addf %357, %358 : vector<64x128xf32>
    %360 = arith.mulf %351, %359 : vector<64x128xf32>
    %361 = arith.addf %360, %30 : vector<64x128xf32>
    %362 = arith.subf %361, %354 : vector<64x128xf32>
    %363 = arith.addf %351, %362 : vector<64x128xf32>
    %cst_115 = arith.constant 9.800000e-01 : f32
    %364 = vector.broadcast %cst_115 : f32 to vector<64x128xf32>
    %365 = arith.mulf %364, %354 : vector<64x128xf32>
    %cst_116 = arith.constant 4.000000e-03 : f32
    %366 = vector.broadcast %cst_116 : f32 to vector<64x128xf32>
    %367 = arith.mulf %366, %363 : vector<64x128xf32>
    %368 = arith.addf %365, %367 : vector<64x128xf32>
    %cst_117 = arith.constant 3.000000e+01 : f32
    %369 = vector.broadcast %cst_117 : f32 to vector<64x128xf32>
    %370 = arith.cmpf ogt, %363, %369 : vector<64x128xf32>
    %371 = arith.extui %370 : vector<64x128xi1> to vector<64x128xi32>
    %372 = arith.sitofp %371 : vector<64x128xi32> to vector<64x128xf32>
    %cst_118 = arith.constant -6.500000e+01 : f32
    %373 = vector.broadcast %cst_118 : f32 to vector<64x128xf32>
    %374 = arith.select %370, %373, %363 : vector<64x128xi1>, vector<64x128xf32>
    %cst_119 = arith.constant 8.000000e+00 : f32
    %375 = vector.broadcast %cst_119 : f32 to vector<64x128xf32>
    %376 = arith.mulf %375, %372 : vector<64x128xf32>
    %377 = arith.addf %368, %376 : vector<64x128xf32>
    %378 = arith.addf %355, %372 : vector<64x128xf32>
    %c15_i32 = arith.constant 15 : i32
    %cst_120 = arith.constant 4.000000e-02 : f32
    %379 = vector.broadcast %cst_120 : f32 to vector<64x128xf32>
    %380 = arith.mulf %379, %374 : vector<64x128xf32>
    %cst_121 = arith.constant 5.000000e+00 : f32
    %381 = vector.broadcast %cst_121 : f32 to vector<64x128xf32>
    %382 = arith.addf %380, %381 : vector<64x128xf32>
    %383 = arith.mulf %374, %382 : vector<64x128xf32>
    %384 = arith.addf %383, %30 : vector<64x128xf32>
    %385 = arith.subf %384, %377 : vector<64x128xf32>
    %386 = arith.addf %374, %385 : vector<64x128xf32>
    %cst_122 = arith.constant 9.800000e-01 : f32
    %387 = vector.broadcast %cst_122 : f32 to vector<64x128xf32>
    %388 = arith.mulf %387, %377 : vector<64x128xf32>
    %cst_123 = arith.constant 4.000000e-03 : f32
    %389 = vector.broadcast %cst_123 : f32 to vector<64x128xf32>
    %390 = arith.mulf %389, %386 : vector<64x128xf32>
    %391 = arith.addf %388, %390 : vector<64x128xf32>
    %cst_124 = arith.constant 3.000000e+01 : f32
    %392 = vector.broadcast %cst_124 : f32 to vector<64x128xf32>
    %393 = arith.cmpf ogt, %386, %392 : vector<64x128xf32>
    %394 = arith.extui %393 : vector<64x128xi1> to vector<64x128xi32>
    %395 = arith.sitofp %394 : vector<64x128xi32> to vector<64x128xf32>
    %cst_125 = arith.constant -6.500000e+01 : f32
    %396 = vector.broadcast %cst_125 : f32 to vector<64x128xf32>
    %397 = arith.select %393, %396, %386 : vector<64x128xi1>, vector<64x128xf32>
    %cst_126 = arith.constant 8.000000e+00 : f32
    %398 = vector.broadcast %cst_126 : f32 to vector<64x128xf32>
    %399 = arith.mulf %398, %395 : vector<64x128xf32>
    %400 = arith.addf %391, %399 : vector<64x128xf32>
    %401 = arith.addf %378, %395 : vector<64x128xf32>
    %cst_127 = arith.constant 6.250000e-02 : f32
    %402 = vector.broadcast %cst_127 : f32 to vector<64x128xf32>
    %403 = arith.mulf %401, %402 : vector<64x128xf32>
    %c0_128 = arith.constant 0 : index
    %c0_129 = arith.constant 0 : index
    %404 = vector.load %arg6[%c0_128, %c0_129] : memref<64x128xf32, #tpu.memory_space<vmem>>, vector<64x128xf32>
    tpu.vector_store %arg6[%c0_128, %c0_129], %403 {strides = array<i32>} : memref<64x128xf32, #tpu.memory_space<vmem>>, vector<64x128xf32>,
    %c0_130 = arith.constant 0 : index
    %c0_131 = arith.constant 0 : index
    %405 = vector.load %arg7[%c0_130, %c0_131] : memref<64x128xf32, #tpu.memory_space<vmem>>, vector<64x128xf32>
    tpu.vector_store %arg7[%c0_130, %c0_131], %25 {strides = array<i32>} : memref<64x128xf32, #tpu.memory_space<vmem>>, vector<64x128xf32>,
    %cst_132 = arith.constant 5.000000e-01 : f32
    %406 = vector.broadcast %cst_132 : f32 to vector<64x128xf32>
    %407 = arith.cmpf oge, %25, %406 : vector<64x128xf32>
    %cst_133 = arith.constant 1.000000e+00 : f32
    %cst_134 = arith.constant 0.000000e+00 : f32
    %408 = vector.broadcast %cst_133 : f32 to vector<64x128xf32>
    %409 = vector.broadcast %cst_134 : f32 to vector<64x128xf32>
    %410 = arith.select %407, %408, %409 : vector<64x128xi1>, vector<64x128xf32>
    %cst_135 = arith.constant dense<0xFF800000> : vector<64xf32>
    %411 = vector.multi_reduction <maximumf>, %410, %cst_135 [1] : vector<64x128xf32> to vector<64xf32>
    %412 = vector.shape_cast %411 : vector<64xf32> to vector<64x1xf32>
    %413 = arith.addf %17, %412 : vector<64x1xf32>
    %cst_136 = arith.constant 8.000000e+01 : f32
    %414 = vector.broadcast %cst_136 : f32 to vector<64x1xf32>
    %415 = arith.minimumf %413, %414 : vector<64x1xf32>
    %416 = math.exp %415 : vector<64x1xf32>
    %c0_137 = arith.constant 0 : index
    %c0_138 = arith.constant 0 : index
    %417 = vector.load %arg5[%c0_137, %c0_138] : memref<64x128xf32, #tpu.memory_space<vmem>>, vector<64x128xf32>
    %cst_139 = arith.constant 1.000000e+00 : f32
    %418 = vector.broadcast %cst_139 : f32 to vector<64x128xf32>
    %419 = arith.subf %418, %410 : vector<64x128xf32>
    %cst_140 = arith.constant 3.14159274 : f32
    %420 = vector.broadcast %cst_140 : f32 to vector<64x128xf32>
    %421 = arith.mulf %420, %419 : vector<64x128xf32>
    %422 = vector.broadcast %416 : vector<64x1xf32> to vector<64x128xf32>
    %423 = arith.mulf %421, %422 : vector<64x128xf32>
    %424 = arith.subf %417, %423 : vector<64x128xf32>
    %cst_141 = arith.constant 1.000000e+00 : f32
    %425 = vector.broadcast %cst_141 : f32 to vector<64x128xf32>
    %426 = arith.subf %424, %425 : vector<64x128xf32>
    %427 = math.tanh %426 : vector<64x128xf32>
    %cst_142 = arith.constant 1.000000e+00 : f32
    %428 = vector.broadcast %cst_142 : f32 to vector<64x128xf32>
    %429 = arith.addf %427, %428 : vector<64x128xf32>
    %cst_143 = arith.constant 0.000000e+00 : f32
    %430 = vector.broadcast %cst_143 : f32 to vector<64x1xf32>
    %431 = arith.cmpf ogt, %412, %430 : vector<64x1xf32>
    %432 = vector.shape_cast %431 : vector<64x1xi1> to vector<64x1xi1>
    %433 = vector.broadcast %432 : vector<64x1xi1> to vector<64x128xi1>
    %434 = arith.select %433, %429, %417 : vector<64x128xi1>, vector<64x128xf32>
    %c0_144 = arith.constant 0 : index
    %c0_145 = arith.constant 0 : index
    %435 = vector.load %arg9[%c0_144, %c0_145] : memref<64x128xf32, #tpu.memory_space<vmem>>, vector<64x128xf32>
    tpu.vector_store %arg9[%c0_144, %c0_145], %434 {strides = array<i32>} : memref<64x128xf32, #tpu.memory_space<vmem>>, vector<64x128xf32>,
    %c0_146 = arith.constant 0 : index
    %c0_147 = arith.constant 0 : index
    %436 = vector.load %arg8[%c0_146, %c0_147] : memref<64x1xf32, #tpu.memory_space<vmem>>, vector<64x1xf32>
    tpu.vector_store %arg8[%c0_146, %c0_147], %413 {strides = array<i32>} : memref<64x1xf32, #tpu.memory_space<vmem>>, vector<64x1xf32>,
    return
  }
  func.func @transform_0(%arg0: i32) -> (i32, i32) {
    %c0_i32 = arith.constant 0 : i32
    %c0_i32_0 = arith.constant 0 : i32
    return %arg0, %c0_i32 : i32, i32
  }
  func.func @transform_1(%arg0: i32) -> (i32, i32) {
    %c0_i32 = arith.constant 0 : i32
    %c0_i32_0 = arith.constant 0 : i32
    return %arg0, %c0_i32 : i32, i32
  }
  func.func @transform_2(%arg0: i32) -> (i32, i32) {
    %c0_i32 = arith.constant 0 : i32
    %c0_i32_0 = arith.constant 0 : i32
    %c0_i32_1 = arith.constant 0 : i32
    return %c0_i32, %c0_i32_0 : i32, i32
  }
  func.func @transform_3(%arg0: i32) -> (i32, i32) {
    %c0_i32 = arith.constant 0 : i32
    %c0_i32_0 = arith.constant 0 : i32
    return %arg0, %c0_i32 : i32, i32
  }
  func.func @transform_4(%arg0: i32) -> (i32, i32) {
    %c0_i32 = arith.constant 0 : i32
    %c0_i32_0 = arith.constant 0 : i32
    return %arg0, %c0_i32 : i32, i32
  }
  func.func @transform_5(%arg0: i32) -> (i32, i32) {
    %c0_i32 = arith.constant 0 : i32
    %c0_i32_0 = arith.constant 0 : i32
    return %arg0, %c0_i32 : i32, i32
  }
  func.func @transform_6(%arg0: i32) -> (i32, i32) {
    %c0_i32 = arith.constant 0 : i32
    %c0_i32_0 = arith.constant 0 : i32
    return %arg0, %c0_i32 : i32, i32
  }
  func.func @transform_7(%arg0: i32) -> (i32, i32) {
    %c0_i32 = arith.constant 0 : i32
    %c0_i32_0 = arith.constant 0 : i32
    return %arg0, %c0_i32 : i32, i32
  }
  func.func @transform_8(%arg0: i32) -> (i32, i32) {
    %c0_i32 = arith.constant 0 : i32
    %c0_i32_0 = arith.constant 0 : i32
    return %arg0, %c0_i32 : i32, i32
  }
}

</mosaic_0001>

<bundles_post_ra>
// kernel: tpu_custom_call.1
= control target key start
LH: loop header
LB: loop body
LE: loop exit
PB: predicated region body
PF: predicated region fallthrough
CT: control target
= control target key end

     0   :  { %14 = vsyncpa [#allocation3], 0  ;;  %s6389_s0 = inlined_call_operand.vmem [shape: f32[128,2], index: 0, kind: input, shape index: {}]   ;;  %s6390_s1 = inlined_call_operand.hbm [shape: f32[128,512], index: 1, kind: input, shape index: {}]   ;;  %s6391_s2 = inlined_call_operand.vmem [shape: f32[1,512], index: 2, kind: input, shape index: {}]   ;;  %s6392_s3 = inlined_call_operand.vmem [shape: f32[128,128], index: 3, kind: input, shape index: {}]   ;;  %s6393_s4 = inlined_call_operand.vmem [shape: f32[128,128], index: 4, kind: input, shape index: {}, may-alias: {4,8}]   ;;  %s6394_s5 = inlined_call_operand.hbm [shape: f32[128,128], index: 5, kind: output, shape index: {0}]   ;;  %s6395_s6 = inlined_call_operand.hbm [shape: f32[128,128], index: 6, kind: output, shape index: {1}]   ;;  %s6396_s7 = inlined_call_operand.vmem [shape: f32[128,1], index: 7, kind: output, shape index: {2}]   ;;  %s6397_s8 = inlined_call_operand.vmem [shape: f32[128,128], index: 8, kind: output, shape index: {3}, may-alias: {4,8}]  }
   0x1   :  { %16 = vsyncpa [#allocation3 + $0x1], 0 }
   0x2   :  { %17 = vsyncpa [#allocation4], 0 }
   0x3   :  { %19 = vsyncpa [#allocation4 + $0x1], 0 }
   0x4   :  { %20 = vsyncpa [#allocation7], 0 }
   0x5   :  { %22 = vsyncpa [#allocation7 + $0x1], 0  ;;  %s3702_s27 = smov 0   ;;  %s3704_s28 = smov 0  }
   0x6   :  { %s3706_s29 = smov 0   ;;  %s3708_s30 = smov 0  }
   0x7 LB: > { %s3723_s9 = sadd.s32 4294967295, %s3644_s30   ;;  %s3162_s10 = sadd.s32 4294967294, %s3644_s30   ;;  %s3644_s30 = sphi %s3708_s30, %s6547_s30   ;;  %s3640_s29 = sphi %s3706_s29, %s6546_s29   ;;  %s3636_s28 = sphi %s3704_s28, %s6545_s28   ;;  %s3632_s27 = sphi %s3702_s27, %s6544_s27  }
   0x8   : > { %s3727_s11 = sadd.s32 1, %s3644_s30   ;;  %s61_s12 = sadd.s32 1, %s3640_s29 }
   0x9   : > { %s58_s13 = ssub.s32 %s3644_s30, %s3727_s11  ;;  %p68_p0 = scmp.ne.s32.totalorder %s3640_s29, %s3636_s28 }
   0xa   : > { %p59_p1 = scmp.eq.s32.totalorder %s58_s13, 0  ;;  %p69_p2 = scmp.eq.s32.totalorder %s3644_s30, 0 }
   0xb   : > { %p74_p3 = scmp.ne.s32.totalorder %s3636_s28, %s3632_s27  ;;  %p75_p4 = scmp.eq.s32.totalorder %s3723_s9, 0 }
   0xc   : > { %s3739_s14 = scalar_select %p59_p1, %s3640_s29, %s61_s12  }
   0xd   : > { %p3741_p5 = por %p69_p2, %p68_p0  ;;  %p3745_p6 = por %p75_p4, %p74_p3 }
   0xe   : > { %6444 = sst [smem:[#allocation11_spill]] %s3739_s14  ;;  %p171_p7 = scmp.eq.s32.totalorder %s3723_s9, 1 }
   0xf   : > { %s6446_s16 = scalar_select %p3745_p6, 1, 0 }
  0x10   : > { %p177_p8 = scmp.eq.s32.totalorder %s3162_s10, 1  ;;  %p3420_p10 = scmp.lt.s32.totalorder %s3644_s30, 2 }
  0x11   : > { %p3752_p11 = por %p171_p7, %p68_p0  ;;  %s287_s19 = sand.u32 1, %s3640_s29  }
  0x12   : > { %p3756_p12 = por %p177_p8, %p74_p3  ;;  %s3336_s20 = sshll.u32 %s3644_s30, 12 }
  0x13   : > { %s6447_s17 = scalar_select %p3752_p11, 1, 0 }
  0x14   : > { %s6448_s18 = scalar_select %p3756_p12, 1, 0 }
  0x15   : > { %s3165_s21 = sshll.u32 %s287_s19, 8  ;;  %s3765_s24 = scalar_lea.hbm %s6390_s1, %s3336_s20 }
  0x16   : > { %s291_s25 = scalar_lea.vmem [#allocation2], %s3165_s21  ;;  %p3769_p13 = pnand %p3420_p10, %p3741_p5 }
  0x17   : > { %s299_s26 = sshll.u32 %s291_s25, 4  ;;  %s3775_s12 = scalar_lea.sflag [#allocation3], %s287_s19  ;;  %s3773_s26 = int_to_ptr.vmem [resolvable:$true] %s299_s26 }
  0x18   : > { %s3522_s13 = scalar_lea.hbm %s3765_s24, 4096  ;;  %p3524_p1 = pneg %p3769_p13 }
  0x19   : > { %p3523_p0 = scmp.ne.s32.totalorder %s3765_s24, %s3522_s13  ;;  %s3527_s21 = scalar_lea.hbm %s6390_s1, 8192 }
  0x1a   : > { %p3528_p4 = scmp.lt.s32.totalorder %s3765_s24, %s6390_s1  ;;  %p3529_p5 = scmp.lt.s32.totalorder %s3527_s21, %s3522_s13 }
  0x1b   : > { %p3525_p2 = pnand %p3524_p1, %p3523_p0 }
  0x1c   : > { %p3530_p7 = por %p3529_p5, %p3528_p4 }
  0x1d   : > { %p3526_p3 = pneg %p3525_p2 }
  0x1f   : > { %p3531_p8 = pnand %p3530_p7, %p3526_p3 }
  0x21   : > { %3534 = shalt.err (!%p3531_p8)
}
  0x22   : > { %s3535_s19 = scalar_lea.vmem %s3773_s26, 4096  ;;  %s3646_s25 = smov [#allocation2]  }
  0x23   : > { %p3536_p10 = scmp.ne.s32.totalorder %s3773_s26, %s3535_s19  ;;  %s3540_s14 = sshll.u32 %s3646_s25, 4  ;;  %s3541_s14 = int_to_ptr.vmem [resolvable:$false] %s3540_s14 }
  0x24   : > { %s3542_s20 = scalar_lea.vmem %s3541_s14, 8192  ;;  %p3543_p2 = scmp.lt.s32.totalorder %s3773_s26, %s3541_s14 }
  0x25   : > { %p3538_p9 = pnand %p3536_p10, %p3524_p1  ;;  %p3544_p12 = scmp.lt.s32.totalorder %s3542_s20, %s3535_s19 }
  0x27   : > { %p3539_p0 = pneg %p3538_p9  ;;  %p3545_p11 = por %p3544_p12, %p3543_p2 }
  0x29   : > { %p3546_p6 = pnand %p3545_p11, %p3539_p0 }
  0x2b   : > { %3549 = shalt.err (!%p3546_p6)
}
  0x2c   : > { %s3647_s13 = smov 512   ;;  %s3648_s22 = smov 32  }
  0x2d   : > { %3412 = dma.hbm_to_vmem [thread:$0]  (!%p3769_p13), %s3765_s24, 4096, %s3773_s26, %s3775_s12, %s3647_s13, %s3647_s13, %s3648_s22  }
  0x2e   : > { %p3169_p9 = scmp.ge.s32.totalorder %s3644_s30, 1  ;;  %p325_p1 = scmp.lt.s32.totalorder %s3644_s30, 3 }
  0x30   : > { %p326_p3 = pnand %p3169_p9, %p325_p1 }
  0x32   : > { %329 = sbr.rel (%p326_p3) target bundleno = 753 (0x2f1), region = 40 }
  0x37   : > { %s3799_s14 = sand.u32 1, %s3636_s28   ;;  %p6450_p6 = scmp.ne.s32.totalorder %s6446_s16, 0 }
  0x38   : > { %s3170_s21 = sshll.u32 %s3799_s14, 8  ;;  %s332_s15 = scalar_lea.sflag [#allocation3], %s3799_s14 }
  0x39   : > { %s3803_s23 = scalar_lea.vmem [#allocation2], %s3170_s21 }
  0x3a   : > { %3619 = dma.done.wait (%p6450_p6), %s332_s15, 4096  }
  0x3b   : > { %3621 = vsyncadd (%p6450_p6), %s332_s15, 4294963200  ;;  %s3173_s24 = sshll.u32 %s3723_s9, 3  ;;  %v3649_v0 = vmov 0   ;;  %v433_v17 = vlaneseq  ;;  %v431_v21 = vld [vmem:[%s6391_s2] sm:$0xf]  ;;  %v462_v26 = vld [vmem:[%s3803_s23 + $0x48] sm:$0xff] }
  0x3c   : > { %3463 = vset.pattern.permute.xlu1 %v3649_v0  ;;  %3462 = vset.pattern.permute.xlu0 %v3649_v0  ;;  %p399_p11 = scmp.lt.s32.totalorder %s3173_s24, 15  ;;  %v461_v25 = vld [vmem:[%s3803_s23 + $0x40] sm:$0xff]  ;;  %v454_v29 = vld [vmem:[%s3803_s23 + $0x8] sm:$0xff]  ;;  %v463_v33 = vld [vmem:[%s3803_s23 + $0x50] sm:$0xff]  ;;  %s3171_s21 = sshll.u32 %s3799_s14, 6 }
  0x3d   : > { %v434_v18 = vshrl.u32 %v433_v17, 7  ;;  %v453_v28 = vld [vmem:[%s3803_s23] sm:$0xff]  ;;  %v466_v35 = vld [vmem:[%s3803_s23 + $0x68] sm:$0xff]  ;;  %v455_v39 = vld [vmem:[%s3803_s23 + $0x10] sm:$0xff]  ;;  %s3921_s15 = scalar_lea.vmem [#allocation6], %s3171_s21  ;;  %p6525_p13 = scmp.ne.s32.totalorder %s6447_s17, 0 }
  0x3e   : > { %s6549_s24 = smov (!%p399_p11, %s3173_s24), 15  ;;  %v465_v34 = vld [vmem:[%s3803_s23 + $0x60] sm:$0xff]  ;;  %v458_v41 = vld [vmem:[%s3803_s23 + $0x28] sm:$0xff]  ;;  %v464_v46 = vld [vmem:[%s3803_s23 + $0x58] sm:$0xff]  ;;  %s3653_s16 = smov [#allocation6]  }
  0x3f   : > { %s3810_s26 = sshll.u32 %s6549_s24, 3  ;;  %v435_v19 = vsub.s32 0, %v434_v18  ;;  %v439_v20 = vsub.s32 1, %v434_v18  ;;  %v443_v22 = vsub.s32 2, %v434_v18  ;;  %v447_v27 = vsub.s32 3, %v434_v18  ;;  %v457_v40 = vld [vmem:[%s3803_s23 + $0x20] sm:$0xff] }
  0x40   : > { %s3816_s19 = scalar_lea.vmem %s6389_s0, %s3810_s26  ;;  %v467_v47 = vld [vmem:[%s3803_s23 + $0x70] sm:$0xff]  ;;  %v456_v52 = vld [vmem:[%s3803_s23 + $0x18] sm:$0xff]  ;;  %v473_v58 = vld [vmem:[%s3803_s23 + $0xa0] sm:$0xff]  ;;  %s3905_s22 = scalar_lea.vmem %s6392_s3, %s3810_s26 }
  0x41   : > { %v567_v1 = vld [vmem:[%s3816_s19 + $0x10] sm:$0xff]  ;;  %v565_v2 = vld [vmem:[%s3816_s19] sm:$0xff]  ;;  %v568_v3 = vld [vmem:[%s3816_s19 + $0x18] sm:$0xff]  ;;  %v3829_v23 = vrot.slane %v431_v21, %v435_v19  ;;  %v3831_v24 = vrot.slane %v431_v21, %v439_v20  ;;  %v3837_v30 = vrot.slane %v431_v21, %v443_v22  ;;  %v3846_v38 = vrot.slane %v431_v21, %v447_v27  ;;  %s5123_s12 = scalar_lea.vmem %s6393_s4, %s3810_s26  ;;  %s5229_s25 = scalar_lea.vmem %s6396_s7, %s3810_s26 }
  0x42   : > { %v575_v4 = vsub.f32 0.0, %v567_v1  ;;  %v573_v5 = vsub.f32 0.0, %v565_v2  ;;  %v566_v6 = vld [vmem:[%s3816_s19 + $0x8] sm:$0xff]  ;;  %v576_v7 = vsub.f32 0.0, %v568_v3  ;;  %v569_v10 = vld [vmem:[%s3816_s19 + $0x20] sm:$0xff]  ;;  %v572_v13 = vld [vmem:[%s3816_s19 + $0x38] sm:$0xff] }
  0x43   : > { %v574_v8 = vsub.f32 0.0, %v566_v6  ;;  %v570_v9 = vld [vmem:[%s3816_s19 + $0x28] sm:$0xff]  ;;  %v577_v12 = vsub.f32 0.0, %v569_v10  ;;  %v571_v14 = vld [vmem:[%s3816_s19 + $0x30] sm:$0xff]  ;;  %v580_v15 = vsub.f32 0.0, %v572_v13  ;;  %v493_v31 = vmul.f32 %v461_v25, %v3829_v23  ;;  %v468_v60 = vld [vmem:[%s3803_s23 + $0x78] sm:$0xff] }
  0x44   : > { %601 = vperm.xlu1 %3463, %v575_v4   ;;  %591 = vperm.xlu0 %3462, %v573_v5   ;;  %v578_v11 = vsub.f32 0.0, %v570_v9  ;;  %v579_v16 = vsub.f32 0.0, %v571_v14  ;;  %v494_v32 = vmul.f32 %v462_v26, %v3831_v24  ;;  %v485_v36 = vmul.f32 %v453_v28, %v3829_v23  ;;  %v459_v53 = vld [vmem:[%s3803_s23 + $0x30] sm:$0xff]  ;;  %v474_v59 = vld [vmem:[%s3803_s23 + $0xa8] sm:$0xff]  ;;  %v469_v1 = vld [vmem:[%s3803_s23 + $0x80] sm:$0xff] }
  0x45   : > { %v486_v37 = vmul.f32 %v454_v29, %v3831_v24  ;;  %v495_v42 = vmul.f32 %v463_v33, %v3837_v30  ;;  %v497_v44 = vmul.f32 %v465_v34, %v3829_v23  ;;  %v498_v45 = vmul.f32 %v466_v35, %v3831_v24  ;;  %v470_v2 = vld [vmem:[%s3803_s23 + $0x88] sm:$0xff]  ;;  %v460_v3 = vld [vmem:[%s3803_s23 + $0x38] sm:$0xff]  ;;  %v475_v9 = vld [vmem:[%s3803_s23 + $0xb0] sm:$0xff] }
  0x46   : > { %v519_v43 = vadd.f32 %v494_v32, %v493_v31  ;;  %v487_v48 = vmul.f32 %v455_v39, %v3837_v30  ;;  %v489_v50 = vmul.f32 %v457_v40, %v3829_v23  ;;  %v490_v51 = vmul.f32 %v458_v41, %v3831_v24  ;;  %v482_v17 = vld [vmem:[%s3803_s23 + $0xe8] sm:$0xff]  ;;  %v477_v20 = vld [vmem:[%s3803_s23 + $0xc0] sm:$0xff]  ;;  %v476_v25 = vld [vmem:[%s3803_s23 + $0xb8] sm:$0xff] }
  0x47   : > { %v517_v49 = vadd.f32 %v486_v37, %v485_v36  ;;  %v496_v54 = vmul.f32 %v464_v46, %v3846_v38  ;;  %v499_v56 = vmul.f32 %v467_v47, %v3837_v30  ;;  %v520_v57 = vadd.f32 %v498_v45, %v497_v44  ;;  %v478_v21 = vld [vmem:[%s3803_s23 + $0xc8] sm:$0xff]  ;;  %v472_v26 = vld [vmem:[%s3803_s23 + $0x98] sm:$0xff]  ;;  %v483_v33 = vld [vmem:[%s3803_s23 + $0xf0] sm:$0xff] }
  0x48   : > { %606 = vperm.xlu1 %3463, %v576_v7   ;;  %596 = vperm.xlu0 %3462, %v574_v8   ;;  %v527_v55 = vadd.f32 %v519_v43, %v495_v42  ;;  %v488_v61 = vmul.f32 %v456_v52, %v3846_v38  ;;  %v491_v63 = vmul.f32 %v459_v53, %v3837_v30  ;;  %v479_v39 = vld [vmem:[%s3803_s23 + $0xd0] sm:$0xff]  ;;  %v484_v44 = vld [vmem:[%s3803_s23 + $0xf8] sm:$0xff] }
  0x49   : > { %v525_v62 = vadd.f32 %v517_v49, %v487_v48  ;;  %v518_v0 = vadd.f32 %v490_v51, %v489_v50  ;;  %v505_v4 = vmul.f32 %v473_v58, %v3829_v23  ;;  %v506_v5 = vmul.f32 %v474_v59, %v3831_v24  ;;  %v480_v47 = vld [vmem:[%s3803_s23 + $0xd8] sm:$0xff]  ;;  %v559_v58 = vld [vmem:[%s3905_s22 + $0x10] sm:$0xff]  ;;  %v557_v59 = vld [vmem:[%s3905_s22] sm:$0xff] }
  0x4a   : > { %v535_v6 = vadd.f32 %v527_v55, %v496_v54  ;;  %v500_v7 = vmul.f32 %v468_v60, %v3846_v38  ;;  %v528_v8 = vadd.f32 %v520_v57, %v499_v56  ;;  %v501_v10 = vmul.f32 %v469_v1, %v3829_v23  ;;  %v558_v1 = vld [vmem:[%s3905_s22 + $0x8] sm:$0xff] }
  0x4b   : > { %v492_v13 = vmul.f32 %v460_v3, %v3846_v38  ;;  %v526_v14 = vadd.f32 %v518_v0, %v491_v63  ;;  %v507_v18 = vmul.f32 %v475_v9, %v3837_v30  ;;  %v522_v19 = vadd.f32 %v506_v5, %v505_v4  ;;  %v560_v0 = vld [vmem:[%s3905_s22 + $0x18] sm:$0xff] }
  0x4c   : > { %616 = vperm.xlu1 %3463, %v578_v11   ;;  %611 = vperm.xlu0 %3462, %v577_v12   ;;  %v502_v11 = vmul.f32 %v470_v2, %v3831_v24  ;;  %v533_v12 = vadd.f32 %v525_v62, %v488_v61  ;;  %3466 = vtanh.f32 %v535_v6  ;;  %v536_v22 = vadd.f32 %v528_v8, %v500_v7 }
  0x4d   : > { %v514_v31 = vmul.f32 %v482_v17, %v3831_v24  ;;  %v534_v32 = vadd.f32 %v526_v14, %v492_v13  ;;  %v509_v34 = vmul.f32 %v477_v20, %v3829_v23  ;;  %v510_v35 = vmul.f32 %v478_v21, %v3831_v24  ;;  %v562_v13 = vld [vmem:[%s3905_s22 + $0x28] sm:$0xff] }
  0x4e   : > { %v521_v28 = vadd.f32 %v502_v11, %v501_v10  ;;  %3468 = vtanh.f32 %v533_v12  ;;  %v508_v36 = vmul.f32 %v476_v25, %v3846_v38  ;;  %v530_v37 = vadd.f32 %v522_v19, %v507_v18 }
  0x4f   : > { %v504_v40 = vmul.f32 %v472_v26, %v3846_v38  ;;  %3470 = vtanh.f32 %v536_v22  ;;  %v515_v42 = vmul.f32 %v483_v33, %v3837_v30  ;;  %v511_v45 = vmul.f32 %v479_v39, %v3837_v30  ;;  %v561_v26 = vld [vmem:[%s3905_s22 + $0x20] sm:$0xff] }
  0x50   : > { %626 = vperm.xlu1 %3463, %v580_v15   ;;  %621 = vperm.xlu0 %3462, %v579_v16   ;;  %v471_v15 = vld [vmem:[%s3803_s23 + $0x90] sm:$0xff]  ;;  %v481_v16 = vld [vmem:[%s3803_s23 + $0xe0] sm:$0xff]  ;;  %3472 = vtanh.f32 %v534_v32  ;;  %v523_v46 = vadd.f32 %v510_v35, %v509_v34  ;;  %v516_v48 = vmul.f32 %v484_v44, %v3846_v38  ;;  %v512_v50 = vmul.f32 %v480_v47, %v3846_v38  ;;  %s3652_s23 = smov 127  }
  0x51   : > { %v503_v27 = vmul.f32 %v471_v15, %v3837_v30  ;;  %v513_v29 = vmul.f32 %v481_v16, %v3829_v23  ;;  %v538_v23 = vadd.f32 %v530_v37, %v508_v36 }
  0x52   : > { %v531_v51 = vadd.f32 %v523_v46, %v511_v45  ;;  %v563_v45 = vld [vmem:[%s3905_s22 + $0x30] sm:$0xff] }
  0x53   : > { %v529_v41 = vadd.f32 %v521_v28, %v503_v27  ;;  %v524_v43 = vadd.f32 %v514_v31, %v513_v29  ;;  %3474 = vtanh.f32 %v538_v23 }
  0x54   : > { %v539_v54 = vadd.f32 %v531_v51, %v512_v50 }
  0x55   : > { %v537_v24 = vadd.f32 %v529_v41, %v504_v40  ;;  %v532_v49 = vadd.f32 %v524_v43, %v515_v42  ;;  %v564_v42 = vld [vmem:[%s3905_s22 + $0x38] sm:$0xff]  ;;  %s5272_s22 = scalar_lea.vmem %s6397_s8, %s3810_s26  ;;  %s2963_s26 = sshll.u32 %s3921_s15, 4  ;;  %s5755_s26 = int_to_ptr.vmem [resolvable:$true] %s2963_s26 }
  0x57   : > { %3476 = vtanh.f32 %v537_v24  ;;  %v540_v53 = vadd.f32 %v532_v49, %v516_v48  ;;  %v6400_v49 = vmov 0.0  }
  0x59   : > { %v3467_v52 = vpop.eup %3466  ;;  %3478 = vtanh.f32 %v540_v53 }
  0x5a   : > { %v551_v56 = vmax.f32 %v3467_v52, 0.0  ;;  %3480 = vtanh.f32 %v539_v54 }
  0x5b   : > { %v3469_v55 = vpop.eup %3468 }
  0x5c   : > { %v3471_v30 = vpop.eup %3470  ;;  %v549_v38 = vmax.f32 %v3469_v55, 0.0  ;;  %v583_v60 = vsub.f32 %v559_v58, %v551_v56 }
  0x5d   : > { %v3473_v57 = vpop.eup %3472  ;;  %v552_v62 = vmax.f32 %v3471_v30, 0.0 }
  0x5e   : > { %v581_v61 = vsub.f32 %v557_v59, %v549_v38  ;;  %v550_v63 = vmax.f32 %v3473_v57, 0.0 }
  0x5f   : > { %v584_v8 = vsub.f32 %v560_v0, %v552_v62 }
  0x60   : > { %v3475_v2 = vpop.eup %3474  ;;  %v582_v9 = vsub.f32 %v558_v1, %v550_v63 }
  0x61   : > { %v554_v10 = vmax.f32 %v3475_v2, 0.0 }
  0x63   : > { %v586_v25 = vsub.f32 %v562_v13, %v554_v10 }
  0x64   : > { %v3477_v5 = vpop.eup %3476 }
  0x65   : > { %v553_v16 = vmax.f32 %v3477_v5, 0.0 }
  0x66   : > { %v3479_v17 = vpop.eup %3478 }
  0x67   : > { %v3481_v22 = vpop.eup %3480  ;;  %v585_v34 = vsub.f32 %v561_v26, %v553_v16  ;;  %v556_v35 = vmax.f32 %v3479_v17, 0.0 }
  0x68   : > { %v555_v36 = vmax.f32 %v3481_v22, 0.0 }
  0x69   : > { %v588_v51 = vsub.f32 %v564_v42, %v556_v35 }
  0x6a   : > { %v587_v54 = vsub.f32 %v563_v45, %v555_v36 }
  0xbf   : > { %v602_v3 = vpop.permute.xlu1 %601  ;;  %v592_v4 = vpop.permute.xlu0 %591 }
  0xc0   : > { %v631_v6 = vmul.f32 %v602_v3, %v583_v60  ;;  %v629_v7 = vmul.f32 %v592_v4, %v581_v61 }
  0xc2   : > { %v639_v11 = vadd.f32 %v631_v6, %v559_v58  ;;  %v637_v12 = vadd.f32 %v629_v7, %v557_v59 }
  0xc3   : > { %v607_v14 = vpop.permute.xlu1 %606  ;;  %v597_v15 = vpop.permute.xlu0 %596 }
  0xc4   : > { %v3913_v18 = vmax.f32 %v639_v11, 0.0  ;;  %v645_v19 = vmax.f32 %v637_v12, 0.0  ;;  %v632_v20 = vmul.f32 %v607_v14, %v584_v8  ;;  %v630_v21 = vmul.f32 %v597_v15, %v582_v9 }
  0xc6   : > { %v3917_v27 = vmul.f32 10.0, %v3913_v18  ;;  %2663 = vst [vmem:[%s3921_s15 + $0x10] sm:$0xff] %v3913_v18  ;;  %v3925_v28 = vmul.f32 10.0, %v645_v19  ;;  %2661 = vst [vmem:[%s3921_s15] sm:$0xff] %v645_v19  ;;  %v640_v29 = vadd.f32 %v632_v20, %v560_v0  ;;  %v638_v31 = vadd.f32 %v630_v21, %v558_v1 }
  0xc7   : > { %v617_v32 = vpop.permute.xlu1 %616  ;;  %v612_v41 = vpop.permute.xlu0 %611  ;;  %vm2669_vm0 = vcmp.ge.f32.partialorder %v645_v19, 0.5  ;;  %vm2671_vm1 = vcmp.ge.f32.partialorder %v3913_v18, 0.5 }
  0xc8   : > { %v3357_v33 = vcvt.f32.s32 %v3917_v27  ;;  %v3341_v37 = vcvt.f32.s32 %v3925_v28  ;;  %v3930_v39 = vmax.f32 %v640_v29, 0.0  ;;  %v3932_v40 = vmax.f32 %v638_v31, 0.0 }
  0xc9   : > { %v634_v44 = vmul.f32 %v617_v32, %v586_v25  ;;  %v633_v48 = vmul.f32 %v612_v41, %v585_v34  ;;  %v3947_v50 = vsel %vm2669_vm0, 1.0, %v6400_v49  ;;  %v3360_v30 = vand.u32 2147483648, %v3917_v27 }
  0xca   : > { %v3358_v43 = vcvt.s32.f32 %v3357_v33  ;;  %v3342_v46 = vcvt.s32.f32 %v3341_v37  ;;  %v3937_v23 = vmul.f32 10.0, %v3930_v39  ;;  %2664 = vst [vmem:[%s3921_s15 + $0x18] sm:$0xff] %v3930_v39  ;;  %v3942_v47 = vmul.f32 10.0, %v3932_v40  ;;  %2662 = vst [vmem:[%s3921_s15 + $0x8] sm:$0xff] %v3932_v40  ;;  %2685 = vmax.xlane.f32.xlu0 %v3947_v50 }
  0xcb   : > { %v642_v24 = vadd.f32 %v634_v44, %v562_v13  ;;  %v627_v53 = vpop.permute.xlu1 %626  ;;  %v3355_v57 = vand.u32 2147483647, %v3917_v27  ;;  %v3339_v58 = vand.u32 2147483647, %v3925_v28  ;;  %v3344_v61 = vand.u32 2147483648, %v3925_v28  ;;  %v622_v8 = vpop.permute.xlu0 %621 }
  0xcc   : > { %v3365_v52 = vcvt.f32.s32 %v3937_v23  ;;  %v3359_v55 = vand.u32 2147483647, %v3358_v43  ;;  %v3343_v56 = vand.u32 2147483647, %v3342_v46  ;;  %v3349_v38 = vcvt.f32.s32 %v3942_v47 }
  0xcd   : > { %v3955_v60 = vmax.f32 %v642_v24, 0.0  ;;  %v641_v63 = vadd.f32 %v633_v48, %v561_v26  ;;  %v636_v0 = vmul.f32 %v627_v53, %v588_v51  ;;  %v3363_v1 = vand.u32 2147483647, %v3937_v23 }
  0xce   : > { %v3366_v59 = vcvt.s32.f32 %v3365_v52  ;;  %v3350_v62 = vcvt.s32.f32 %v3349_v38  ;;  %v3361_v4 = vor.u32 %v3360_v30, %v3359_v55  ;;  %v3345_v5 = vor.u32 %v3344_v61, %v3343_v56 }
  0xcf   : > { %v3960_v3 = vmul.f32 10.0, %v3955_v60  ;;  %2666 = vst [vmem:[%s3921_s15 + $0x28] sm:$0xff] %v3955_v60  ;;  %v3347_v6 = vand.u32 2147483647, %v3942_v47  ;;  %v649_v7 = vmax.f32 %v641_v63, 0.0  ;;  %vm3966_vm2 = vcmp.lt.f32.partialorder %v3355_v57, 8388608.0 }
  0xd0   : > { %v3367_v2 = vand.u32 2147483647, %v3366_v59  ;;  %v3368_v10 = vand.u32 2147483648, %v3937_v23  ;;  %v3351_v11 = vand.u32 2147483647, %v3350_v62  ;;  %vm3972_vm3 = vcmp.lt.f32.partialorder %v3339_v58, 8388608.0 }
  0xd1   : > { %v3381_v12 = vcvt.f32.s32 %v3960_v3  ;;  %v3352_v14 = vand.u32 2147483648, %v3942_v47  ;;  %v3977_v15 = vmul.f32 10.0, %v649_v7  ;;  %2665 = vst [vmem:[%s3921_s15 + $0x20] sm:$0xff] %v649_v7  ;;  %v644_v16 = vadd.f32 %v636_v0, %v564_v42 }
  0xd2   : > { %vm3980_vm4 = vcmp.lt.f32.partialorder %v3363_v1, 8388608.0  ;;  %v3369_v19 = vor.u32 %v3368_v10, %v3367_v2  ;;  %v635_v21 = vmul.f32 %v622_v8, %v587_v54  ;;  %v3362_v22 = vsel %vm3966_vm2, %v3361_v4, %v3917_v27 }
  0xd3   : > { %v3382_v20 = vcvt.s32.f32 %v3381_v12  ;;  %v3346_v25 = vsel %vm3972_vm3, %v3345_v5, %v3925_v28  ;;  %vm3990_vm5 = vcmp.lt.f32.partialorder %v3347_v6, 8388608.0  ;;  %v3373_v29 = vcvt.f32.s32 %v3977_v15 }
  0xd4   : > { %v3353_v31 = vor.u32 %v3352_v14, %v3351_v11  ;;  %v3379_v32 = vand.u32 2147483647, %v3960_v3  ;;  %v3384_v33 = vand.u32 2147483648, %v3960_v3  ;;  %v3997_v34 = vmax.f32 %v644_v16, 0.0 }
  0xd5   : > { %v3383_v35 = vand.u32 2147483647, %v3382_v20  ;;  %v3374_v36 = vcvt.s32.f32 %v3373_v29  ;;  %v643_v27 = vadd.f32 %v635_v21, %v563_v45  ;;  %vm2670_vm6 = vcmp.ge.f32.partialorder %v3932_v40, 0.5 }
  0xd6   : > { %v3370_v28 = vsel %vm3980_vm4, %v3369_v19, %v3937_v23  ;;  %v660_v37 = vmul.f32 10.0, %v3997_v34  ;;  %2668 = vst [vmem:[%s3921_s15 + $0x38] sm:$0xff] %v3997_v34  ;;  %v4007_v41 = vsel %vm2670_vm6, 1.0, %v6400_v49  ;;  %v4012_v42 = vsel %vm2671_vm1, 1.0, %v6400_v49 }
  0xd7   : > { %v3371_v43 = vand.u32 2147483647, %v3977_v15  ;;  %v3375_v40 = vand.u32 2147483647, %v3374_v36  ;;  %v3376_v44 = vand.u32 2147483648, %v3977_v15  ;;  %v651_v45 = vmax.f32 %v643_v27, 0.0  ;;  %2687 = vmax.xlane.f32.xlu1 %v4007_v41  ;;  %2689 = vmax.xlane.f32.xlu0 %v4012_v42 }
  0xd8   : > { %v4018_v46 = vadd.f32 140.0, %v3362_v22  ;;  %v3354_v23 = vsel %vm3990_vm5, %v3353_v31, %v3942_v47  ;;  %v3397_v24 = vcvt.f32.s32 %v660_v37  ;;  %v4023_v18 = vadd.f32 140.0, %v3346_v25 }
  0xd9   : > { %v3385_v48 = vor.u32 %v3384_v33, %v3383_v35  ;;  %v3377_v51 = vor.u32 %v3376_v44, %v3375_v40  ;;  %v659_v52 = vmul.f32 10.0, %v651_v45  ;;  %2667 = vst [vmem:[%s3921_s15 + $0x30] sm:$0xff] %v651_v45  ;;  %v4026_v53 = vadd.f32 140.0, %v3370_v28  ;;  %s6439_s15 = sshll.u32 %s3723_s9, 10 }
  0xda   : > { %vm4028_vm7 = vcmp.lt.f32.partialorder %v3379_v32, 8388608.0  ;;  %v3398_v55 = vcvt.s32.f32 %v3397_v24  ;;  %vm2673_vm8 = vcmp.ge.f32.partialorder %v649_v7, 0.5  ;;  %v4032_v30 = vadd.f32 140.0, %v3354_v23  ;;  %s5793_s10 = scalar_lea.hbm %s6395_s6, %s6439_s15 }
  0xdb   : > { %vm4034_vm9 = vcmp.lt.f32.partialorder %v3371_v43, 8388608.0  ;;  %v3395_v47 = vand.u32 2147483647, %v660_v37  ;;  %v3389_v38 = vcvt.f32.s32 %v659_v52  ;;  %v3400_v58 = vand.u32 2147483648, %v660_v37 }
  0xdc   : > { %v3399_v57 = vand.u32 2147483647, %v3398_v55  ;;  %v4039_v59 = vsel %vm2673_vm8, 1.0, %v6400_v49  ;;  %vm2672_vm10 = vcmp.ge.f32.partialorder %v3930_v39, 0.5  ;;  %v3386_v61 = vsel %vm4028_vm7, %v3385_v48, %v3960_v3 }
  0xdd   : > { %6463 = vst [vmem:[#allocation12_spill] sm:$0xff] %v4039_v59  ;;  %v3378_v62 = vsel %vm4034_vm9, %v3377_v51, %v3977_v15  ;;  %v3390_v63 = vcvt.s32.f32 %v3389_v38  ;;  %2693 = vmax.xlane.f32.xlu1 %v4039_v59  ;;  %v4050_v0 = vsel %vm2672_vm10, 1.0, %v6400_v49  ;;  %v3387_v2 = vand.u32 2147483647, %v659_v52 }
  0xde   : > { %6464 = vst [vmem:[#allocation13_spill] sm:$0xff] %v4050_v0  ;;  %v3401_v1 = vor.u32 %v3400_v58, %v3399_v57  ;;  %2691 = vmax.xlane.f32.xlu0 %v4050_v0  ;;  %vm2675_vm11 = vcmp.ge.f32.partialorder %v651_v45, 0.5  ;;  %vm2674_vm12 = vcmp.ge.f32.partialorder %v3955_v60, 0.5  ;;  %vm3396_vm13 = vcmp.lt.f32.partialorder %v3395_v47, 8388608.0 }
  0xdf   : > { %v3391_v39 = vand.u32 2147483647, %v3390_v63  ;;  %v3392_v3 = vand.u32 2147483648, %v659_v52  ;;  %v4055_v4 = vsel %vm2675_vm11, 1.0, %v6400_v49  ;;  %v4057_v5 = vadd.f32 140.0, %v3386_v61 }
  0xe0   : > { %6465 = vst [vmem:[#allocation14_spill] sm:$0xff] %v4055_v4  ;;  %v4059_v6 = vadd.f32 140.0, %v3378_v62  ;;  %v3402_v7 = vsel %vm3396_vm13, %v3401_v1, %v660_v37  ;;  %v4065_v10 = vsel %vm2674_vm12, 1.0, %v6400_v49  ;;  %v677_v60 = vadd.f32 -154.0, %v4023_v18 }
  0xe1   : > { %v4061_v8 = vadd.f32 140.0, %v3402_v7  ;;  %v3393_v9 = vor.u32 %v3392_v3, %v3391_v39  ;;  %2697 = vmax.xlane.f32.xlu1 %v4055_v4  ;;  %6467 = vst [vmem:[#allocation16_spill] sm:$0xff] %v4065_v10  ;;  %vm3388_vm14 = vcmp.lt.f32.partialorder %v3387_v2, 8388608.0  ;;  %vm2676_vm15 = vcmp.ge.f32.partialorder %v3997_v34, 0.5 }
  0xe2   : > { %2695 = vmax.xlane.f32.xlu0 %v4065_v10  ;;  %v678_v11 = vadd.f32 -154.0, %v4032_v30  ;;  %v679_v13 = vadd.f32 -154.0, %v4018_v46  ;;  %v680_v14 = vadd.f32 -154.0, %v4026_v53  ;;  %v681_v16 = vadd.f32 -154.0, %v4059_v6 }
  0xe3   : > { %6466 = vst [vmem:[#allocation15_spill] sm:$0xff] %v4061_v8  ;;  %v3394_v12 = vsel %vm3388_vm14, %v3393_v9, %v659_v52  ;;  %v682_v17 = vadd.f32 -154.0, %v4057_v5  ;;  %v684_v19 = vadd.f32 -154.0, %v4061_v8  ;;  %v4079_v20 = vsel %vm2676_vm15, 1.0, %v6400_v49 }
  0xe4   : > { %v4073_v15 = vadd.f32 140.0, %v3394_v12  ;;  %6469 = vst [vmem:[#allocation18_spill] sm:$0xff] %v4079_v20  ;;  %v3183_v21 = vadd.f32 14.0, %v677_v60  ;;  %v3184_v22 = vadd.f32 14.0, %v678_v11  ;;  %v3185_v25 = vadd.f32 14.0, %v679_v13 }
  0xe5   : > { %v3186_v29 = vadd.f32 14.0, %v680_v14  ;;  %v3187_v31 = vadd.f32 14.0, %v681_v16  ;;  %v3188_v32 = vadd.f32 14.0, %v682_v17  ;;  %v3190_v33 = vadd.f32 14.0, %v684_v19 }
  0xe6   : > { %6468 = vst [vmem:[#allocation17_spill] sm:$0xff] %v4073_v15  ;;  %2699 = vmax.xlane.f32.xlu0 %v4079_v20  ;;  %v683_v26 = vadd.f32 -154.0, %v4073_v15  ;;  %v693_v34 = vadd.f32 -70.0, %v3183_v21  ;;  %v694_v35 = vadd.f32 -70.0, %v3184_v22  ;;  %v695_v36 = vadd.f32 -70.0, %v3185_v25 }
  0xe7   : > { %v696_v28 = vadd.f32 -70.0, %v3186_v29  ;;  %v697_v37 = vadd.f32 -70.0, %v3187_v31  ;;  %v698_v43 = vadd.f32 -70.0, %v3188_v32  ;;  %v700_v40 = vadd.f32 -70.0, %v3190_v33 }
  0xe8   : > { %v3189_v27 = vadd.f32 14.0, %v683_v26  ;;  %v701_v44 = vmul.f32 0.004, %v693_v34  ;;  %v702_v45 = vmul.f32 0.004, %v694_v35  ;;  %vm717_vm0 = vcmp.gt.f32.partialorder %v693_v34, 30.0 }
  0xe9   : > { %v703_v24 = vmul.f32 0.004, %v695_v36  ;;  %v704_v48 = vmul.f32 0.004, %v696_v28  ;;  %v705_v51 = vmul.f32 0.004, %v697_v37 }
  0xea   : > { %v699_v23 = vadd.f32 -70.0, %v3189_v27  ;;  %v706_v52 = vmul.f32 0.004, %v698_v43  ;;  %v708_v55 = vmul.f32 0.004, %v700_v40  ;;  %vm718_vm1 = vcmp.gt.f32.partialorder %v694_v35, 30.0 }
  0xeb   : > { %v709_v56 = vadd.f32 -13.72, %v701_v44  ;;  %v710_v47 = vadd.f32 -13.72, %v702_v45  ;;  %v711_v38 = vadd.f32 -13.72, %v703_v24 }
  0xec   : > { %v707_v54 = vmul.f32 0.004, %v699_v23  ;;  %v712_v57 = vadd.f32 -13.72, %v704_v48  ;;  %v713_v58 = vadd.f32 -13.72, %v705_v51 }
  0xed   : > { %v714_v61 = vadd.f32 -13.72, %v706_v52  ;;  %vm719_vm2 = vcmp.gt.f32.partialorder %v695_v36, 30.0  ;;  %vm720_vm3 = vcmp.gt.f32.partialorder %v696_v28, 30.0  ;;  %vm721_vm4 = vcmp.gt.f32.partialorder %v697_v37, 30.0 }
  0xee   : > { %vm722_vm5 = vcmp.gt.f32.partialorder %v698_v43, 30.0  ;;  %v715_v62 = vadd.f32 -13.72, %v707_v54  ;;  %v716_v63 = vadd.f32 -13.72, %v708_v55  ;;  %vm723_vm6 = vcmp.gt.f32.partialorder %v699_v23, 30.0 }
  0xef   : > { %vm724_vm7 = vcmp.gt.f32.partialorder %v700_v40, 30.0  ;;  %v4085_v1 = vsel %vm717_vm0, 1.0, %v6400_v49  ;;  %v4089_v2 = vsel %vm718_vm1, 1.0, %v6400_v49  ;;  %v4093_v39 = vsel %vm719_vm2, 1.0, %v6400_v49 }
  0xf0   : > { %v4097_v3 = vsel %vm720_vm3, 1.0, %v6400_v49  ;;  %v4101_v7 = vsel %vm721_vm4, 1.0, %v6400_v49  ;;  %v4105_v9 = vsel %vm722_vm5, 1.0, %v6400_v49  ;;  %v4109_v60 = vsel %vm723_vm6, 1.0, %v6400_v49 }
  0xf1   : > { %v4113_v11 = vsel %vm724_vm7, 1.0, %v6400_v49  ;;  %v4116_v12 = vsel %vm717_vm0, -65.0, %v693_v34  ;;  %v4119_v13 = vsel %vm718_vm1, -65.0, %v694_v35  ;;  %v4122_v14 = vsel %vm719_vm2, -65.0, %v695_v36 }
  0xf2   : > { %v4125_v16 = vsel %vm720_vm3, -65.0, %v696_v28  ;;  %v4128_v17 = vsel %vm721_vm4, -65.0, %v697_v37  ;;  %v4131_v19 = vsel %vm722_vm5, -65.0, %v698_v43  ;;  %v749_v21 = vmul.f32 8.0, %v4085_v1 }
  0xf3   : > { %v750_v22 = vmul.f32 8.0, %v4089_v2  ;;  %v751_v25 = vmul.f32 8.0, %v4093_v39  ;;  %v752_v26 = vmul.f32 8.0, %v4097_v3  ;;  %v753_v29 = vmul.f32 8.0, %v4101_v7 }
  0xf4   : > { %v754_v31 = vmul.f32 8.0, %v4105_v9  ;;  %v747_v32 = vsel %vm723_vm6, -65.0, %v699_v23  ;;  %v755_v33 = vmul.f32 8.0, %v4109_v60  ;;  %v756_v34 = vmul.f32 8.0, %v4113_v11 }
  0xf5   : > { %v3651_v35 = vmov 1   ;;  %v748_v36 = vsel %vm724_vm7, -65.0, %v700_v40  ;;  %v757_v27 = vadd.f32 %v749_v21, %v709_v56  ;;  %v758_v28 = vadd.f32 %v750_v22, %v710_v47 }
  0xf6   : > { %3464 = vset.pattern.permute.xlu1 %v3651_v35  ;;  %3465 = vset.pattern.permute.xlu0 %v3651_v35  ;;  %v773_v37 = vmul.f32 0.04, %v4116_v12  ;;  %v759_v43 = vadd.f32 %v751_v25, %v711_v38  ;;  %v760_v44 = vadd.f32 %v752_v26, %v712_v57  ;;  %v761_v45 = vadd.f32 %v753_v29, %v713_v58 }
  0xf7   : > { %v762_v24 = vadd.f32 %v754_v31, %v714_v61  ;;  %v763_v48 = vadd.f32 %v755_v33, %v715_v62  ;;  %v774_v23 = vmul.f32 0.04, %v4119_v13  ;;  %v775_v51 = vmul.f32 0.04, %v4122_v14 }
  0xf8   : > { %v776_v52 = vmul.f32 0.04, %v4125_v16  ;;  %v764_v54 = vadd.f32 %v756_v34, %v716_v63  ;;  %v777_v55 = vmul.f32 0.04, %v4128_v17  ;;  %v778_v40 = vmul.f32 0.04, %v4131_v19 }
  0xf9   : > { %v779_v56 = vmul.f32 0.04, %v747_v32  ;;  %v780_v47 = vmul.f32 0.04, %v748_v36  ;;  %v781_v21 = vadd.f32 5.0, %v773_v37  ;;  %v782_v22 = vadd.f32 5.0, %v774_v23 }
  0xfa   : > { %v783_v38 = vadd.f32 5.0, %v775_v51  ;;  %v784_v57 = vadd.f32 5.0, %v776_v52  ;;  %v785_v58 = vadd.f32 5.0, %v777_v55  ;;  %v786_v61 = vadd.f32 5.0, %v778_v40 }
  0xfb   : > { %v787_v62 = vadd.f32 5.0, %v779_v56  ;;  %v788_v25 = vadd.f32 5.0, %v780_v47  ;;  %v789_v26 = vmul.f32 %v781_v21, %v4116_v12  ;;  %v790_v29 = vmul.f32 %v782_v22, %v4119_v13 }
  0xfc   : > { %v791_v63 = vmul.f32 %v783_v38, %v4122_v14  ;;  %v792_v31 = vmul.f32 %v784_v57, %v4125_v16  ;;  %v793_v33 = vmul.f32 %v785_v58, %v4128_v17  ;;  %v794_v34 = vmul.f32 %v786_v61, %v4131_v19 }
  0xfd   : > { %v795_v35 = vmul.f32 %v787_v62, %v747_v32  ;;  %v796_v37 = vmul.f32 %v788_v25, %v748_v36  ;;  %v797_v23 = vadd.f32 %v789_v26, %v4023_v18  ;;  %v798_v51 = vadd.f32 %v790_v29, %v4032_v30 }
  0xfe   : > { %v799_v52 = vadd.f32 %v791_v63, %v4018_v46  ;;  %v800_v55 = vadd.f32 %v792_v31, %v4026_v53  ;;  %v801_v40 = vadd.f32 %v793_v33, %v4059_v6  ;;  %v802_v56 = vadd.f32 %v794_v34, %v4057_v5 }
  0xff   : > { %v803_v47 = vadd.f32 %v795_v35, %v4073_v15  ;;  %v804_v21 = vadd.f32 %v796_v37, %v4061_v8  ;;  %v805_v22 = vsub.f32 %v797_v23, %v757_v27  ;;  %v806_v38 = vsub.f32 %v798_v51, %v758_v28 }
 0x100   : > { %v807_v57 = vsub.f32 %v799_v52, %v759_v43  ;;  %v808_v58 = vsub.f32 %v800_v55, %v760_v44  ;;  %v809_v61 = vsub.f32 %v801_v40, %v761_v45  ;;  %v810_v62 = vsub.f32 %v802_v56, %v762_v24 }
 0x101   : > { %v811_v25 = vsub.f32 %v803_v47, %v763_v48  ;;  %v812_v26 = vsub.f32 %v804_v21, %v764_v54  ;;  %v813_v29 = vadd.f32 %v805_v22, %v4116_v12  ;;  %v814_v63 = vadd.f32 %v806_v38, %v4119_v13 }
 0x102   : > { %v815_v31 = vadd.f32 %v807_v57, %v4122_v14  ;;  %v816_v33 = vadd.f32 %v808_v58, %v4125_v16  ;;  %v817_v34 = vadd.f32 %v809_v61, %v4128_v17  ;;  %v818_v35 = vadd.f32 %v810_v62, %v4131_v19 }
 0x103   : > { %v819_v37 = vadd.f32 %v811_v25, %v747_v32  ;;  %v821_v23 = vmul.f32 0.98, %v757_v27  ;;  %v822_v51 = vmul.f32 0.98, %v758_v28  ;;  %v820_v52 = vadd.f32 %v812_v26, %v748_v36 }
 0x104   : > { %v823_v55 = vmul.f32 0.98, %v759_v43  ;;  %v824_v40 = vmul.f32 0.98, %v760_v44  ;;  %v825_v56 = vmul.f32 0.98, %v761_v45 }
 0x105   : > { %v826_v47 = vmul.f32 0.98, %v762_v24  ;;  %v827_v21 = vmul.f32 0.98, %v763_v48  ;;  %v829_v12 = vmul.f32 0.004, %v813_v29 }
 0x106   : > { %v830_v22 = vmul.f32 0.004, %v814_v63  ;;  %v831_v13 = vmul.f32 0.004, %v815_v31  ;;  %v832_v38 = vmul.f32 0.004, %v816_v33 }
 0x107   : > { %v828_v14 = vmul.f32 0.98, %v764_v54  ;;  %v833_v57 = vmul.f32 0.004, %v817_v34  ;;  %v834_v16 = vmul.f32 0.004, %v818_v35  ;;  %v837_v61 = vadd.f32 %v829_v12, %v821_v23 }
 0x108   : > { %v835_v58 = vmul.f32 0.004, %v819_v37  ;;  %v836_v17 = vmul.f32 0.004, %v820_v52  ;;  %v838_v19 = vadd.f32 %v830_v22, %v822_v51  ;;  %v839_v32 = vadd.f32 %v831_v13, %v823_v55 }
 0x109   : > { %v840_v27 = vadd.f32 %v832_v38, %v824_v40  ;;  %v841_v28 = vadd.f32 %v833_v57, %v825_v56  ;;  %vm845_vm8 = vcmp.gt.f32.partialorder %v813_v29, 30.0  ;;  %v842_v36 = vadd.f32 %v834_v16, %v826_v47 }
 0x10a   : > { %vm846_vm9 = vcmp.gt.f32.partialorder %v814_v63, 30.0  ;;  %vm847_vm10 = vcmp.gt.f32.partialorder %v815_v31, 30.0  ;;  %vm848_vm11 = vcmp.gt.f32.partialorder %v816_v33, 30.0  ;;  %vm849_vm12 = vcmp.gt.f32.partialorder %v817_v34, 30.0 }
 0x10b   : > { %vm850_vm13 = vcmp.gt.f32.partialorder %v818_v35, 30.0  ;;  %vm851_vm14 = vcmp.gt.f32.partialorder %v819_v37, 30.0  ;;  %vm852_vm15 = vcmp.gt.f32.partialorder %v820_v52, 30.0  ;;  %v843_v43 = vadd.f32 %v835_v58, %v827_v21 }
 0x10c   : > { %v844_v44 = vadd.f32 %v836_v17, %v828_v14  ;;  %v3199_v45 = vsel %vm845_vm8, 1.0, %v6400_v49  ;;  %v3200_v24 = vsel %vm846_vm9, 1.0, %v6400_v49  ;;  %v3201_v48 = vsel %vm847_vm10, 1.0, %v6400_v49 }
 0x10d   : > { %v3202_v54 = vsel %vm848_vm11, 1.0, %v6400_v49  ;;  %v3203_v62 = vsel %vm849_vm12, 1.0, %v6400_v49  ;;  %v3204_v25 = vsel %vm850_vm13, 1.0, %v6400_v49  ;;  %v3205_v26 = vsel %vm851_vm14, 1.0, %v6400_v49 }
 0x10e   : > { %v3206_v23 = vsel %vm852_vm15, 1.0, %v6400_v49  ;;  %v4186_v51 = vsel %vm845_vm8, -65.0, %v813_v29  ;;  %v4189_v55 = vsel %vm846_vm9, -65.0, %v814_v63  ;;  %v4192_v40 = vsel %vm847_vm10, -65.0, %v815_v31 }
 0x10f   : > { %v4195_v56 = vsel %vm848_vm11, -65.0, %v816_v33  ;;  %v4198_v47 = vsel %vm849_vm12, -65.0, %v817_v34  ;;  %v4201_v21 = vsel %vm850_vm13, -65.0, %v818_v35  ;;  %v877_v12 = vmul.f32 8.0, %v3199_v45 }
 0x110   : > { %v878_v22 = vmul.f32 8.0, %v3200_v24  ;;  %v879_v13 = vmul.f32 8.0, %v3201_v48  ;;  %v880_v29 = vmul.f32 8.0, %v3202_v54  ;;  %v4204_v38 = vsel %vm851_vm14, -65.0, %v819_v37 }
 0x111   : > { %v4207_v63 = vsel %vm852_vm15, -65.0, %v820_v52  ;;  %v881_v31 = vmul.f32 8.0, %v3203_v62  ;;  %v882_v14 = vmul.f32 8.0, %v3204_v25  ;;  %v883_v33 = vmul.f32 8.0, %v3205_v26 }
 0x112   : > { %v884_v57 = vmul.f32 8.0, %v3206_v23  ;;  %v4209_v16 = vadd.f32 %v877_v12, %v837_v61  ;;  %v886_v34 = vadd.f32 %v878_v22, %v838_v19  ;;  %v887_v58 = vadd.f32 %v879_v13, %v839_v32 }
 0x113   : > { %v4211_v35 = vadd.f32 %v880_v29, %v840_v27  ;;  %v4213_v17 = vadd.f32 %v881_v31, %v841_v28  ;;  %v4215_v49 = vadd.f32 %v882_v14, %v842_v36  ;;  %v4218_v37 = vadd.f32 %v3199_v45, %v4085_v1 }
 0x114   : > { %v4221_v52 = vadd.f32 %v3200_v24, %v4089_v2  ;;  %v4224_v20 = vadd.f32 %v3201_v48, %v4093_v39  ;;  %v4227_v61 = vadd.f32 %v3202_v54, %v4097_v3  ;;  %v4230_v19 = vadd.f32 %v3203_v62, %v4101_v7 }
 0x115   : > { %v4233_v32 = vadd.f32 %v3204_v25, %v4105_v9  ;;  %v4236_v27 = vadd.f32 %v3205_v26, %v4109_v60  ;;  %v4239_v1 = vadd.f32 %v3206_v23, %v4113_v11  ;;  %v891_v2 = vadd.f32 %v883_v33, %v843_v43 }
 0x116   : > { %v901_v28 = vmul.f32 0.04, %v4186_v51  ;;  %v902_v39 = vmul.f32 0.04, %v4189_v55  ;;  %v903_v3 = vmul.f32 0.04, %v4192_v40  ;;  %v892_v36 = vadd.f32 %v884_v57, %v844_v44 }
 0x117   : > { %v904_v7 = vmul.f32 0.04, %v4195_v56  ;;  %v905_v45 = vmul.f32 0.04, %v4198_v47  ;;  %v906_v9 = vmul.f32 0.04, %v4201_v21 }
 0x118   : > { %v907_v60 = vmul.f32 0.04, %v4204_v38  ;;  %v908_v24 = vmul.f32 0.04, %v4207_v63  ;;  %v909_v11 = vadd.f32 5.0, %v901_v28  ;;  %v910_v48 = vadd.f32 5.0, %v902_v39 }
 0x119   : > { %v911_v43 = vadd.f32 5.0, %v903_v3  ;;  %v912_v54 = vadd.f32 5.0, %v904_v7  ;;  %v913_v62 = vadd.f32 5.0, %v905_v45  ;;  %v914_v25 = vadd.f32 5.0, %v906_v9 }
 0x11a   : > { %v915_v26 = vadd.f32 5.0, %v907_v60  ;;  %v916_v23 = vadd.f32 5.0, %v908_v24  ;;  %v917_v44 = vmul.f32 %v909_v11, %v4186_v51  ;;  %v918_v12 = vmul.f32 %v910_v48, %v4189_v55 }
 0x11b   : > { %v919_v22 = vmul.f32 %v911_v43, %v4192_v40  ;;  %v920_v13 = vmul.f32 %v912_v54, %v4195_v56  ;;  %v921_v29 = vmul.f32 %v913_v62, %v4198_v47  ;;  %v922_v31 = vmul.f32 %v914_v25, %v4201_v21 }
 0x11c   : > { %v923_v14 = vmul.f32 %v915_v26, %v4204_v38  ;;  %v924_v33 = vmul.f32 %v916_v23, %v4207_v63  ;;  %v925_v57 = vadd.f32 %v917_v44, %v4023_v18  ;;  %v926_v28 = vadd.f32 %v918_v12, %v4032_v30 }
 0x11d   : > { %v927_v39 = vadd.f32 %v919_v22, %v4018_v46  ;;  %v928_v3 = vadd.f32 %v920_v13, %v4026_v53  ;;  %v929_v7 = vadd.f32 %v921_v29, %v4059_v6  ;;  %v930_v45 = vadd.f32 %v922_v31, %v4057_v5 }
 0x11e   : > { %v931_v9 = vadd.f32 %v923_v14, %v4073_v15  ;;  %v932_v60 = vadd.f32 %v924_v33, %v4061_v8  ;;  %v933_v24 = vsub.f32 %v925_v57, %v4209_v16  ;;  %v934_v11 = vsub.f32 %v926_v28, %v886_v34 }
 0x11f   : > { %v935_v48 = vsub.f32 %v927_v39, %v887_v58  ;;  %v936_v43 = vsub.f32 %v928_v3, %v4211_v35  ;;  %v937_v54 = vsub.f32 %v929_v7, %v4213_v17  ;;  %v938_v62 = vsub.f32 %v930_v45, %v4215_v49 }
 0x120   : > { %v939_v25 = vsub.f32 %v931_v9, %v891_v2  ;;  %v940_v26 = vsub.f32 %v932_v60, %v892_v36  ;;  %v941_v23 = vadd.f32 %v933_v24, %v4186_v51  ;;  %v942_v44 = vadd.f32 %v934_v11, %v4189_v55 }
 0x121   : > { %v943_v12 = vadd.f32 %v935_v48, %v4192_v40  ;;  %v944_v22 = vadd.f32 %v936_v43, %v4195_v56  ;;  %v945_v13 = vadd.f32 %v937_v54, %v4198_v47  ;;  %v946_v29 = vadd.f32 %v938_v62, %v4201_v21 }
 0x122   : > { %v947_v31 = vadd.f32 %v939_v25, %v4204_v38  ;;  %v949_v14 = vmul.f32 0.98, %v4209_v16  ;;  %v950_v33 = vmul.f32 0.98, %v886_v34  ;;  %v951_v57 = vmul.f32 0.98, %v887_v58 }
 0x123   : > { %v948_v28 = vadd.f32 %v940_v26, %v4207_v63  ;;  %v952_v51 = vmul.f32 0.98, %v4211_v35  ;;  %v953_v55 = vmul.f32 0.98, %v4213_v17  ;;  %v954_v40 = vmul.f32 0.98, %v4215_v49 }
 0x124   : > { %v957_v39 = vmul.f32 0.004, %v941_v23  ;;  %v958_v56 = vmul.f32 0.004, %v942_v44  ;;  %v959_v3 = vmul.f32 0.004, %v943_v12 }
 0x125   : > { %v955_v47 = vmul.f32 0.98, %v891_v2  ;;  %v960_v7 = vmul.f32 0.004, %v944_v22  ;;  %v961_v21 = vmul.f32 0.004, %v945_v13 }
 0x126   : > { %v956_v45 = vmul.f32 0.98, %v892_v36  ;;  %v962_v38 = vmul.f32 0.004, %v946_v29  ;;  %v963_v9 = vmul.f32 0.004, %v947_v31  ;;  %v965_v34 = vadd.f32 %v957_v39, %v949_v14 }
 0x127   : > { %v964_v16 = vmul.f32 0.004, %v948_v28  ;;  %v966_v58 = vadd.f32 %v958_v56, %v950_v33  ;;  %v967_v60 = vadd.f32 %v959_v3, %v951_v57  ;;  %v968_v63 = vadd.f32 %v960_v7, %v952_v51 }
 0x128   : > { %v969_v24 = vadd.f32 %v961_v21, %v953_v55  ;;  %vm973_vm0 = vcmp.gt.f32.partialorder %v941_v23, 30.0  ;;  %vm974_vm1 = vcmp.gt.f32.partialorder %v942_v44, 30.0  ;;  %vm975_vm2 = vcmp.gt.f32.partialorder %v943_v12, 30.0 }
 0x129   : > { %vm976_vm3 = vcmp.gt.f32.partialorder %v944_v22, 30.0  ;;  %vm977_vm4 = vcmp.gt.f32.partialorder %v945_v13, 30.0  ;;  %vm978_vm5 = vcmp.gt.f32.partialorder %v946_v29, 30.0  ;;  %v970_v49 = vadd.f32 %v962_v38, %v954_v40 }
 0x12a   : > { %v971_v35 = vadd.f32 %v963_v9, %v955_v47  ;;  %vm979_vm6 = vcmp.gt.f32.partialorder %v947_v31, 30.0  ;;  %vm980_vm7 = vcmp.gt.f32.partialorder %v948_v28, 30.0  ;;  %v4281_v17 = vadd.f32 %v964_v16, %v956_v45 }
 0x12b   : > { %v6470_v2 = vmov 0.0   ;;  %v4300_v14 = vsel %vm973_vm0, -65.0, %v941_v23  ;;  %v4303_v33 = vsel %vm974_vm1, -65.0, %v942_v44  ;;  %v4306_v57 = vsel %vm975_vm2, -65.0, %v943_v12 }
 0x12c   : > { %v3207_v36 = vsel %vm973_vm0, 1.0, %v6470_v2  ;;  %v3208_v11 = vsel %vm974_vm1, 1.0, %v6470_v2  ;;  %v3209_v48 = vsel %vm975_vm2, 1.0, %v6470_v2  ;;  %v3210_v43 = vsel %vm976_vm3, 1.0, %v6470_v2 }
 0x12d   : > { %v3211_v54 = vsel %vm977_vm4, 1.0, %v6470_v2  ;;  %v3212_v62 = vsel %vm978_vm5, 1.0, %v6470_v2  ;;  %v3213_v25 = vsel %vm979_vm6, 1.0, %v6470_v2  ;;  %v3214_v26 = vsel %vm980_vm7, 1.0, %v6470_v2 }
 0x12e   : > { %v4309_v51 = vsel %vm976_vm3, -65.0, %v944_v22  ;;  %v4312_v55 = vsel %vm977_vm4, -65.0, %v945_v13  ;;  %v1005_v40 = vmul.f32 8.0, %v3207_v36  ;;  %v1006_v39 = vmul.f32 8.0, %v3208_v11 }
 0x12f   : > { %v4315_v56 = vsel %vm978_vm5, -65.0, %v946_v29  ;;  %v1007_v3 = vmul.f32 8.0, %v3209_v48  ;;  %v1008_v23 = vmul.f32 8.0, %v3210_v43  ;;  %v1009_v47 = vmul.f32 8.0, %v3211_v54 }
 0x130   : > { %v4318_v44 = vsel %vm979_vm6, -65.0, %v947_v31  ;;  %v4321_v12 = vsel %vm980_vm7, -65.0, %v948_v28  ;;  %v1010_v7 = vmul.f32 8.0, %v3212_v62  ;;  %v1011_v22 = vmul.f32 8.0, %v3213_v25 }
 0x131   : > { %v1012_v21 = vmul.f32 8.0, %v3214_v26  ;;  %v4323_v45 = vadd.f32 %v1005_v40, %v965_v34  ;;  %v4325_v13 = vadd.f32 %v1006_v39, %v966_v58  ;;  %v4327_v38 = vadd.f32 %v1007_v3, %v967_v60 }
 0x132   : > { %v4329_v29 = vadd.f32 %v1008_v23, %v968_v63  ;;  %v4331_v9 = vadd.f32 %v1009_v47, %v969_v24  ;;  %v4334_v16 = vadd.f32 %v3207_v36, %v4218_v37  ;;  %v4337_v31 = vadd.f32 %v3208_v11, %v4221_v52 }
 0x133   : > { %v4340_v28 = vadd.f32 %v3209_v48, %v4224_v20  ;;  %v4343_v34 = vadd.f32 %v3210_v43, %v4227_v61  ;;  %v4346_v58 = vadd.f32 %v3211_v54, %v4230_v19  ;;  %v4349_v60 = vadd.f32 %v3212_v62, %v4233_v32 }
 0x134   : > { %v4352_v63 = vadd.f32 %v3213_v25, %v4236_v27  ;;  %v4355_v37 = vadd.f32 %v3214_v26, %v4239_v1  ;;  %v1029_v52 = vmul.f32 0.04, %v4300_v14  ;;  %v1030_v20 = vmul.f32 0.04, %v4303_v33 }
 0x135   : > { %v1018_v24 = vadd.f32 %v1010_v7, %v970_v49  ;;  %v1031_v61 = vmul.f32 0.04, %v4306_v57  ;;  %v1032_v36 = vmul.f32 0.04, %v4309_v51  ;;  %v1033_v19 = vmul.f32 0.04, %v4312_v55 }
 0x136   : > { %v1019_v11 = vadd.f32 %v1011_v22, %v971_v35  ;;  %v1034_v32 = vmul.f32 0.04, %v4315_v56  ;;  %v1035_v27 = vmul.f32 0.04, %v4318_v44  ;;  %v1036_v48 = vmul.f32 0.04, %v4321_v12 }
 0x137   : > { %v1037_v1 = vadd.f32 5.0, %v1029_v52  ;;  %v1038_v43 = vadd.f32 5.0, %v1030_v20  ;;  %v1039_v54 = vadd.f32 5.0, %v1031_v61  ;;  %v1040_v62 = vadd.f32 5.0, %v1032_v36 }
 0x138   : > { %v1041_v25 = vadd.f32 5.0, %v1033_v19  ;;  %v1042_v26 = vadd.f32 5.0, %v1034_v32  ;;  %v1043_v49 = vadd.f32 5.0, %v1035_v27  ;;  %v1044_v40 = vadd.f32 5.0, %v1036_v48 }
 0x139   : > { %v1045_v39 = vmul.f32 %v1037_v1, %v4300_v14  ;;  %v1046_v3 = vmul.f32 %v1038_v43, %v4303_v33  ;;  %v1047_v35 = vmul.f32 %v1039_v54, %v4306_v57  ;;  %v1048_v23 = vmul.f32 %v1040_v62, %v4309_v51 }
 0x13a   : > { %v1049_v47 = vmul.f32 %v1041_v25, %v4312_v55  ;;  %v1050_v7 = vmul.f32 %v1042_v26, %v4315_v56  ;;  %v1051_v22 = vmul.f32 %v1043_v49, %v4318_v44  ;;  %v1052_v52 = vmul.f32 %v1044_v40, %v4321_v12 }
 0x13b   : > { %v1053_v20 = vadd.f32 %v1045_v39, %v4023_v18  ;;  %v1054_v61 = vadd.f32 %v1046_v3, %v4032_v30  ;;  %v1055_v36 = vadd.f32 %v1047_v35, %v4018_v46  ;;  %v1056_v19 = vadd.f32 %v1048_v23, %v4026_v53 }
 0x13c   : > { %v1057_v32 = vadd.f32 %v1049_v47, %v4059_v6  ;;  %v1058_v27 = vadd.f32 %v1050_v7, %v4057_v5  ;;  %v1059_v48 = vadd.f32 %v1051_v22, %v4073_v15  ;;  %v1060_v1 = vadd.f32 %v1052_v52, %v4061_v8 }
 0x13d   : > { %v1061_v43 = vsub.f32 %v1053_v20, %v4323_v45  ;;  %v1062_v54 = vsub.f32 %v1054_v61, %v4325_v13  ;;  %v1063_v62 = vsub.f32 %v1055_v36, %v4327_v38  ;;  %v1064_v25 = vsub.f32 %v1056_v19, %v4329_v29 }
 0x13e   : > { %v1020_v26 = vadd.f32 %v1012_v21, %v4281_v17  ;;  %v1065_v49 = vsub.f32 %v1057_v32, %v4331_v9  ;;  %v1066_v40 = vsub.f32 %v1058_v27, %v1018_v24  ;;  %v1067_v39 = vsub.f32 %v1059_v48, %v1019_v11 }
 0x13f   : > { %v1069_v35 = vadd.f32 %v1061_v43, %v4300_v14  ;;  %v1070_v23 = vadd.f32 %v1062_v54, %v4303_v33  ;;  %v1071_v47 = vadd.f32 %v1063_v62, %v4306_v57  ;;  %v1072_v7 = vadd.f32 %v1064_v25, %v4309_v51 }
 0x140   : > { %v1068_v3 = vsub.f32 %v1060_v1, %v1020_v26  ;;  %v1073_v52 = vadd.f32 %v1065_v49, %v4312_v55  ;;  %v1074_v20 = vadd.f32 %v1066_v40, %v4315_v56  ;;  %v1075_v17 = vadd.f32 %v1067_v39, %v4318_v44 }
 0x141   : > { %v1077_v21 = vmul.f32 0.98, %v4323_v45  ;;  %v1078_v61 = vmul.f32 0.98, %v4325_v13  ;;  %v1079_v14 = vmul.f32 0.98, %v4327_v38 }
 0x142   : > { %v1076_v33 = vadd.f32 %v1068_v3, %v4321_v12  ;;  %v1085_v36 = vmul.f32 0.004, %v1069_v35  ;;  %v1086_v57 = vmul.f32 0.004, %v1070_v23  ;;  %v1087_v19 = vmul.f32 0.004, %v1071_v47 }
 0x143   : > { %v1080_v51 = vmul.f32 0.98, %v4329_v29  ;;  %v1081_v32 = vmul.f32 0.98, %v4331_v9  ;;  %v1088_v55 = vmul.f32 0.004, %v1072_v7 }
 0x144   : > { %v1082_v27 = vmul.f32 0.98, %v1018_v24  ;;  %v1083_v56 = vmul.f32 0.98, %v1019_v11  ;;  %v1084_v48 = vmul.f32 0.98, %v1020_v26  ;;  %v1093_v13 = vadd.f32 %v1085_v36, %v1077_v21 }
 0x145   : > { %v1089_v44 = vmul.f32 0.004, %v1073_v52  ;;  %v1090_v1 = vmul.f32 0.004, %v1074_v20  ;;  %v1091_v45 = vmul.f32 0.004, %v1075_v17  ;;  %v1094_v54 = vadd.f32 %v1086_v57, %v1078_v61 }
 0x146   : > { %v1092_v43 = vmul.f32 0.004, %v1076_v33  ;;  %v4401_v38 = vadd.f32 %v1087_v19, %v1079_v14  ;;  %v4403_v12 = vadd.f32 %v1088_v55, %v1080_v51  ;;  %vm1101_vm8 = vcmp.gt.f32.partialorder %v1069_v35, 30.0 }
 0x147   : > { %vm1102_vm9 = vcmp.gt.f32.partialorder %v1070_v23, 30.0  ;;  %vm1103_vm10 = vcmp.gt.f32.partialorder %v1071_v47, 30.0  ;;  %vm1104_vm11 = vcmp.gt.f32.partialorder %v1072_v7, 30.0  ;;  %vm1105_vm12 = vcmp.gt.f32.partialorder %v1073_v52, 30.0 }
 0x148   : > { %vm1106_vm13 = vcmp.gt.f32.partialorder %v1074_v20, 30.0  ;;  %vm1107_vm14 = vcmp.gt.f32.partialorder %v1075_v17, 30.0  ;;  %v4405_v29 = vadd.f32 %v1089_v44, %v1081_v32  ;;  %v4407_v9 = vadd.f32 %v1090_v1, %v1082_v27 }
 0x149   : > { %v4409_v24 = vadd.f32 %v1091_v45, %v1083_v56  ;;  %vm1108_vm15 = vcmp.gt.f32.partialorder %v1076_v33, 30.0  ;;  %v4411_v11 = vadd.f32 %v1092_v43, %v1084_v48  ;;  %v3215_v62 = vsel %vm1101_vm8, 1.0, %v6470_v2  ;;  %v3514_v56 = vld [vmem:[%s3816_s19] sm:$0xff] }
 0x14a   : > { %v3216_v25 = vsel %vm1102_vm9, 1.0, %v6470_v2  ;;  %v3217_v26 = vsel %vm1103_vm10, 1.0, %v6470_v2  ;;  %v3218_v49 = vsel %vm1104_vm11, 1.0, %v6470_v2  ;;  %v3219_v40 = vsel %vm1105_vm12, 1.0, %v6470_v2 }
 0x14b   : > { %v3220_v39 = vsel %vm1106_vm13, 1.0, %v6470_v2  ;;  %v3221_v3 = vsel %vm1107_vm14, 1.0, %v6470_v2  ;;  %v3222_v21 = vsel %vm1108_vm15, 1.0, %v6470_v2  ;;  %v4430_v61 = vsel %vm1101_vm8, -65.0, %v1069_v35 }
 0x14c   : > { %v4433_v14 = vsel %vm1102_vm9, -65.0, %v1070_v23  ;;  %v4436_v36 = vsel %vm1103_vm10, -65.0, %v1071_v47  ;;  %v4439_v57 = vsel %vm1104_vm11, -65.0, %v1072_v7  ;;  %v4442_v19 = vsel %vm1105_vm12, -65.0, %v1073_v52 }
 0x14d   : > { %v4445_v51 = vsel %vm1106_vm13, -65.0, %v1074_v20  ;;  %v4448_v32 = vsel %vm1107_vm14, -65.0, %v1075_v17  ;;  %v4453_v23 = vsel %vm1108_vm15, -65.0, %v1076_v33  ;;  %v1133_v55 = vmul.f32 8.0, %v3215_v62 }
 0x14e   : > { %v1134_v47 = vmul.f32 8.0, %v3216_v25  ;;  %v1135_v27 = vmul.f32 8.0, %v3217_v26  ;;  %v1136_v52 = vmul.f32 8.0, %v3218_v49  ;;  %v1137_v48 = vmul.f32 8.0, %v3219_v40 }
 0x14f   : > { %v1138_v44 = vmul.f32 8.0, %v3220_v39  ;;  %v1139_v20 = vmul.f32 8.0, %v3221_v3  ;;  %v4459_v1 = vmul.f32 8.0, %v3222_v21  ;;  %v4462_v17 = vadd.f32 %v3215_v62, %v4334_v16 }
 0x150   : > { %v4465_v45 = vadd.f32 %v3216_v25, %v4337_v31  ;;  %v4469_v43 = vadd.f32 %v3217_v26, %v4340_v28  ;;  %v4475_v22 = vadd.f32 %v3219_v40, %v4346_v58  ;;  %v4481_v16 = vadd.f32 %v3221_v3, %v4352_v63 }
 0x151   : > { %v4484_v31 = vadd.f32 %v3222_v21, %v4355_v37  ;;  %v1157_v62 = vmul.f32 0.04, %v4430_v61  ;;  %v4487_v28 = vadd.f32 %v1133_v55, %v1093_v13  ;;  %v1159_v26 = vmul.f32 0.04, %v4436_v36 }
 0x152   : > { %v4491_v58 = vadd.f32 %v1134_v47, %v1094_v54  ;;  %v1162_v63 = vmul.f32 0.04, %v4445_v51  ;;  %v1163_v37 = vmul.f32 0.04, %v4448_v32  ;;  %v1164_v40 = vmul.f32 0.04, %v4453_v23 }
 0x153   : > { %v4450_v35 = vpop.xlane.xlu0 %2685  ;;  %v1167_v3 = vadd.f32 5.0, %v1159_v26 }
 0x154   : > { %6471 = vst [vmem:[#allocation19_spill] sm:$0xff] %v4450_v35  ;;  %v4457_v7 = vadd.f32 %v3514_v56, %v4450_v35  ;;  %v4472_v56 = vadd.f32 %v3218_v49, %v4343_v34  ;;  %v4478_v35 = vadd.f32 %v3220_v39, %v4349_v60  ;;  %v1158_v34 = vmul.f32 0.04, %v4433_v14 }
 0x155   : > { %v1160_v60 = vmul.f32 0.04, %v4439_v57  ;;  %v1161_v49 = vmul.f32 0.04, %v4442_v19  ;;  %v1165_v39 = vadd.f32 5.0, %v1157_v62  ;;  %v1171_v10 = vadd.f32 5.0, %v1163_v37 }
 0x156   : > { %v2709_v33 = vmin.f32 %v4457_v7, 80.0  ;;  %v1166_v13 = vadd.f32 5.0, %v1158_v34  ;;  %v1172_v54 = vadd.f32 5.0, %v1164_v40  ;;  %v1175_v0 = vmul.f32 %v1167_v3, %v4436_v36 }
 0x157   : > { %v1168_v21 = vadd.f32 5.0, %v1160_v60  ;;  %v1169_v55 = vadd.f32 5.0, %v1161_v49  ;;  %v1173_v47 = vmul.f32 %v1165_v39, %v4430_v61  ;;  %v1179_v34 = vmul.f32 %v1171_v10, %v4448_v32 }
 0x158   : > { %v2717_v25 = vmul.f32 1.442695, %v2709_v33  ;;  %v1170_v33 = vadd.f32 5.0, %v1162_v63  ;;  %v1174_v4 = vmul.f32 %v1166_v13, %v4433_v14  ;;  %v1180_v26 = vmul.f32 %v1172_v54, %v4453_v23 }
 0x159   : > { %v1177_v59 = vmul.f32 %v1169_v55, %v4442_v19  ;;  %v1181_v60 = vadd.f32 %v1173_v47, %v4023_v18  ;;  %v1143_v49 = vadd.f32 %v1135_v27, %v4401_v38  ;;  %v1183_v37 = vadd.f32 %v1175_v0, %v4018_v46 }
 0x15a   : > { %3482 = vpow2.f32 %v2717_v25  ;;  %v1176_v25 = vmul.f32 %v1168_v21, %v4439_v57  ;;  %v1178_v62 = vmul.f32 %v1170_v33, %v4445_v51  ;;  %v1182_v63 = vadd.f32 %v1174_v4, %v4032_v30  ;;  %v3515_v33 = vld [vmem:[%s3816_s19 + $0x8] sm:$0xff]  ;;  %v3516_v4 = vld [vmem:[%s3816_s19 + $0x10] sm:$0xff] }
 0x15b   : > { %v1144_v3 = vadd.f32 %v1136_v52, %v4403_v12  ;;  %v1145_v10 = vadd.f32 %v1137_v48, %v4405_v29  ;;  %v1185_v21 = vadd.f32 %v1177_v59, %v4059_v6  ;;  %v1146_v27 = vadd.f32 %v1138_v44, %v4407_v9 }
 0x15c   : > { %v1184_v40 = vadd.f32 %v1176_v25, %v4026_v53  ;;  %v1186_v55 = vadd.f32 %v1178_v62, %v4057_v5  ;;  %v1187_v54 = vadd.f32 %v1179_v34, %v4073_v15  ;;  %v1147_v12 = vadd.f32 %v1139_v20, %v4409_v24 }
 0x15d   : > { %v1188_v29 = vadd.f32 %v1180_v26, %v4061_v8  ;;  %v1189_v59 = vsub.f32 %v1181_v60, %v4487_v28  ;;  %v1190_v52 = vsub.f32 %v1182_v63, %v4491_v58  ;;  %v1191_v25 = vsub.f32 %v1183_v37, %v1143_v49 }
 0x15e   : > { %v1192_v62 = vsub.f32 %v1184_v40, %v1144_v3  ;;  %v1148_v24 = vadd.f32 %v4459_v1, %v4411_v11  ;;  %v1193_v44 = vsub.f32 %v1185_v21, %v1145_v10  ;;  %v1194_v20 = vsub.f32 %v1186_v55, %v1146_v27  ;;  %v3517_v1 = vld [vmem:[%s3816_s19 + $0x20] sm:$0xff] }
 0x15f   : > { %v1195_v63 = vsub.f32 %v1187_v54, %v1147_v12  ;;  %v4558_v54 = vadd.f32 %v1191_v25, %v4436_v36 }
 0x160   : > { %v4511_v39 = vpop.xlane.xlu1 %2687  ;;  %v4513_v13 = vpop.xlane.xlu0 %2689  ;;  %v1196_v40 = vsub.f32 %v1188_v29, %v1148_v24  ;;  %v4568_v29 = vadd.f32 %v1193_v44, %v4442_v19  ;;  %v1207_v44 = vmul.f32 0.98, %v1143_v49 }
 0x161   : > { %6472 = vst [vmem:[#allocation20_spill] sm:$0xff] %v4511_v39  ;;  %6473 = vst [vmem:[#allocation21_spill] sm:$0xff] %v4513_v13  ;;  %v4521_v38 = vadd.f32 %v3515_v33, %v4511_v39  ;;  %v4525_v0 = vadd.f32 %v3516_v4, %v4513_v13  ;;  %v6474_v33 = vsub.f32 1.0, %v3947_v50  ;;  %v4546_v50 = vadd.f32 %v1189_v59, %v4430_v61  ;;  %v3518_v61 = vld [vmem:[%s3816_s19 + $0x18] sm:$0xff] }
 0x162   : > { %v4571_v59 = vadd.f32 %v1194_v20, %v4445_v51  ;;  %v4575_v36 = vadd.f32 %v1195_v63, %v4448_v32  ;;  %v4583_v19 = vadd.f32 %v1196_v40, %v4453_v23  ;;  %v1208_v51 = vmul.f32 0.98, %v1144_v3  ;;  %v3519_v20 = vld [vmem:[%s3816_s19 + $0x30] sm:$0xff]  ;;  %v3521_v4 = vld [vmem:[%s3816_s19 + $0x38] sm:$0xff] }
 0x163   : > { %v2710_v48 = vmin.f32 %v4521_v38, 80.0  ;;  %v2711_v47 = vmin.f32 %v4525_v0, 80.0  ;;  %v4537_v9 = vmul.f32 3.1415927, %v6474_v33  ;;  %v4549_v33 = vadd.f32 %v1190_v52, %v4433_v14 }
 0x164   : > { %v1210_v63 = vmul.f32 0.98, %v1146_v27  ;;  %vm1229_vm0 = vcmp.gt.f32.partialorder %v4546_v50, 30.0  ;;  %v1211_v23 = vmul.f32 0.98, %v1147_v12  ;;  %vm1231_vm2 = vcmp.gt.f32.partialorder %v4558_v54, 30.0 }
 0x165   : > { %6475 = vst [vmem:[#allocation22_spill] sm:$0xff] %v4537_v9  ;;  %v2719_v26 = vmul.f32 1.442695, %v2710_v48  ;;  %v2721_v60 = vmul.f32 1.442695, %v2711_v47  ;;  %v4561_v48 = vadd.f32 %v1192_v62, %v4439_v57  ;;  %vm1230_vm1 = vcmp.gt.f32.partialorder %v4549_v33, 30.0 }
 0x166   : > { %v4543_v37 = vpop.xlane.xlu1 %2693  ;;  %v1205_v57 = vmul.f32 0.98, %v4487_v28  ;;  %v1206_v47 = vmul.f32 0.98, %v4491_v58  ;;  %v1213_v3 = vmul.f32 0.004, %v4546_v50 }
 0x167   : > { %6476 = vst [vmem:[#allocation23_spill] sm:$0xff] %v4543_v37  ;;  %v3483_v11 = vpop.eup %3482  ;;  %3484 = vpow2.f32 %v2719_v26  ;;  %v4553_v21 = vadd.f32 %v3517_v1, %v4543_v37  ;;  %v4555_v55 = vpop.xlane.xlu0 %2691  ;;  %v1214_v40 = vmul.f32 0.004, %v4549_v33  ;;  %v1215_v27 = vmul.f32 0.004, %v4558_v54 }
 0x168   : > { %6477 = vst [vmem:[#allocation24_spill] sm:$0xff] %v4555_v55  ;;  %3486 = vpow2.f32 %v2721_v60  ;;  %v4565_v14 = vadd.f32 %v3518_v61, %v4555_v55  ;;  %2759 = vperm.xlu1 %3464, %v3483_v11   ;;  %v1209_v60 = vmul.f32 0.98, %v1145_v10  ;;  %v3520_v11 = vld [vmem:[%s3816_s19 + $0x28] sm:$0xff]  ;;  %v1216_v61 = vmul.f32 0.004, %v4561_v48 }
 0x169   : > { %v2713_v52 = vmin.f32 %v4553_v21, 80.0  ;;  %v1217_v12 = vmul.f32 0.004, %v4568_v29  ;;  %v1221_v37 = vadd.f32 %v1213_v3, %v1205_v57  ;;  %v1222_v55 = vadd.f32 %v1214_v40, %v1206_v47  ;;  %s3550_s19 = scalar_lea.vmem %s5755_s26, 1024 }
 0x16a   : > { %6478 = vst [vmem:[#allocation25_spill] sm:$0xff] %v4565_v14  ;;  %v2712_v25 = vmin.f32 %v4565_v14, 80.0  ;;  %v4580_v62 = vpop.xlane.xlu1 %2697  ;;  %v1224_v13 = vadd.f32 %v1216_v61, %v1208_v51  ;;  %vm1232_vm3 = vcmp.gt.f32.partialorder %v4561_v48, 30.0  ;;  %vm1233_vm4 = vcmp.gt.f32.partialorder %v4568_v29, 30.0  ;;  %p3551_p12 = scmp.ne.s32.totalorder %s5755_s26, %s3550_s19 }
 0x16b   : > { %6479 = vst [vmem:[#allocation26_spill] sm:$0xff] %v4580_v62  ;;  %v4587_v26 = vadd.f32 %v3519_v20, %v4580_v62  ;;  %v4589_v32 = vpop.xlane.xlu0 %2695  ;;  %v2725_v28 = vmul.f32 1.442695, %v2713_v52  ;;  %v1212_v20 = vmul.f32 0.98, %v1148_v24  ;;  %v1223_v24 = vadd.f32 %v1215_v27, %v1207_v44 }
 0x16c   : > { %6480 = vst [vmem:[#allocation27_spill] sm:$0xff] %v4589_v32  ;;  %v2723_v58 = vmul.f32 1.442695, %v2712_v25  ;;  %v4594_v1 = vadd.f32 %v3520_v11, %v4589_v32  ;;  %v1219_v32 = vmul.f32 0.004, %v4575_v36  ;;  %vm1234_vm5 = vcmp.gt.f32.partialorder %v4571_v59, 30.0  ;;  %p3552_p4 = pnand %p3551_p12, %p6525_p13 }
 0x16d   : > { %v2715_v49 = vmin.f32 %v4587_v26, 80.0  ;;  %v1220_v62 = vmul.f32 0.004, %v4583_v19  ;;  %vm1235_vm6 = vcmp.gt.f32.partialorder %v4575_v36, 30.0  ;;  %vm1236_vm7 = vcmp.gt.f32.partialorder %v4583_v19, 30.0 }
 0x16e   : > { %6481 = vst [vmem:[#allocation28_spill] sm:$0xff] %v4594_v1  ;;  %3488 = vpow2.f32 %v2723_v58  ;;  %v2714_v10 = vmin.f32 %v4594_v1, 80.0  ;;  %v1218_v58 = vmul.f32 0.004, %v4571_v59  ;;  %v1227_v47 = vadd.f32 %v1219_v32, %v1211_v23  ;;  %p3553_p5 = pneg %p3552_p4 }
 0x16f   : > { %v2729_v52 = vmul.f32 1.442695, %v2715_v49  ;;  %v4603_v25 = vpop.xlane.xlu0 %2699  ;;  %3490 = vpow2.f32 %v2725_v28  ;;  %v1225_v28 = vadd.f32 %v1217_v12, %v1209_v60  ;;  %v1228_v44 = vadd.f32 %v1220_v62, %v1212_v20 }
 0x170   : > { %6482 = vst [vmem:[#allocation29_spill] sm:$0xff] %v4603_v25  ;;  %v2727_v11 = vmul.f32 1.442695, %v2714_v10  ;;  %v4608_v34 = vadd.f32 %v3521_v4, %v4603_v25  ;;  %v1226_v3 = vadd.f32 %v1218_v58, %v1210_v63  ;;  %v3223_v51 = vsel %vm1229_vm0, 1.0, %v6470_v2 }
 0x171   : > { %3492 = vpow2.f32 %v2729_v52  ;;  %v3224_v60 = vsel %vm1230_vm1, 1.0, %v6470_v2  ;;  %v3225_v40 = vsel %vm1231_vm2, 1.0, %v6470_v2  ;;  %v3226_v62 = vsel %vm1232_vm3, 1.0, %v6470_v2 }
 0x172   : > { %6483 = vst [vmem:[#allocation30_spill] sm:$0xff] %v4608_v34  ;;  %v2716_v49 = vmin.f32 %v4608_v34, 80.0  ;;  %3494 = vpow2.f32 %v2727_v11  ;;  %v3227_v32 = vsel %vm1233_vm4, 1.0, %v6470_v2  ;;  %v3228_v63 = vsel %vm1234_vm5, 1.0, %v6470_v2 }
 0x173   : > { %v3229_v23 = vsel %vm1235_vm6, 1.0, %v6470_v2  ;;  %v3230_v27 = vsel %vm1236_vm7, 1.0, %v6470_v2  ;;  %v4647_v61 = vsel %vm1229_vm0, -65.0, %v4546_v50  ;;  %v4652_v52 = vsel %vm1230_vm1, -65.0, %v4549_v33 }
 0x174   : > { %v3485_v4 = vpop.eup %3484  ;;  %v2731_v10 = vmul.f32 1.442695, %v2716_v49  ;;  %v4657_v20 = vsel %vm1231_vm2, -65.0, %v4558_v54  ;;  %v4664_v12 = vsel %vm1232_vm3, -65.0, %v4561_v48  ;;  %v4669_v50 = vsel %vm1233_vm4, -65.0, %v4568_v29 }
 0x175   : > { %v3487_v57 = vpop.eup %3486  ;;  %2764 = vperm.xlu0 %3465, %v3485_v4   ;;  %v1261_v33 = vmul.f32 8.0, %v3223_v51  ;;  %v1262_v11 = vmul.f32 8.0, %v3224_v60  ;;  %v1263_v58 = vmul.f32 8.0, %v3225_v40  ;;  %v1264_v49 = vmul.f32 8.0, %v3226_v62 }
 0x176   : > { %3496 = vpow2.f32 %v2731_v10  ;;  %2769 = vperm.xlu1 %3464, %v3487_v57   ;;  %v1265_v54 = vmul.f32 8.0, %v3227_v32  ;;  %v1266_v4 = vmul.f32 8.0, %v3228_v63  ;;  %v4679_v48 = vsel %vm1235_vm6, -65.0, %v4575_v36 }
 0x177   : > { %v4684_v29 = vsel %vm1236_vm7, -65.0, %v4583_v19  ;;  %v1267_v57 = vmul.f32 8.0, %v3229_v23  ;;  %v1268_v25 = vmul.f32 8.0, %v3230_v27  ;;  %v4686_v39 = vadd.f32 %v1261_v33, %v1221_v37 }
 0x178   : > { %v4688_v9 = vadd.f32 %v1262_v11, %v1222_v55  ;;  %v4690_v34 = vadd.f32 %v1263_v58, %v1223_v24  ;;  %v4694_v36 = vadd.f32 %v1264_v49, %v1224_v13  ;;  %v4696_v1 = vadd.f32 %v1265_v54, %v1225_v28 }
 0x179   : > { %2889 = vrot.lane.b32.xlu0 %v4525_v0, %s3652_s23  ;;  %v4674_v0 = vsel %vm1234_vm5, -65.0, %v4571_v59  ;;  %v4698_v14 = vadd.f32 %v1266_v4, %v1226_v3  ;;  %v4701_v19 = vadd.f32 %v3223_v51, %v4462_v17  ;;  %v4704_v37 = vadd.f32 %v3224_v60, %v4465_v45 }
 0x17a   : > { %v4707_v55 = vadd.f32 %v3225_v40, %v4469_v43  ;;  %v4710_v24 = vadd.f32 %v3226_v62, %v4472_v56  ;;  %v4713_v13 = vadd.f32 %v3227_v32, %v4475_v22  ;;  %v4719_v28 = vadd.f32 %v3229_v23, %v4481_v16 }
 0x17b   : > { %v3489_v10 = vpop.eup %3488  ;;  %v4722_v17 = vadd.f32 %v3230_v27, %v4484_v31  ;;  %v1285_v45 = vmul.f32 0.04, %v4647_v61  ;;  %v1275_v43 = vadd.f32 %v1267_v57, %v1227_v47  ;;  %v1286_v56 = vmul.f32 0.04, %v4652_v52 }
 0x17c   : > { %2774 = vperm.xlu1 %3464, %v3489_v10   ;;  %v3491_v59 = vpop.eup %3490  ;;  %v1287_v51 = vmul.f32 0.04, %v4657_v20  ;;  %v1288_v22 = vmul.f32 0.04, %v4664_v12  ;;  %v1289_v16 = vmul.f32 0.04, %v4669_v50 }
 0x17d   : > { %2893 = vrot.lane.b32.xlu0 %v4553_v21, %s3652_s23  ;;  %v4716_v21 = vadd.f32 %v3228_v63, %v4478_v35  ;;  %v1276_v35 = vadd.f32 %v1268_v25, %v1228_v44  ;;  %v1290_v31 = vmul.f32 0.04, %v4674_v0  ;;  %v1293_v60 = vadd.f32 5.0, %v1285_v45 }
 0x17e   : > { %v3493_v10 = vpop.eup %3492  ;;  %v1291_v40 = vmul.f32 0.04, %v4679_v48  ;;  %v1292_v62 = vmul.f32 0.04, %v4684_v29  ;;  %v1294_v47 = vadd.f32 5.0, %v1286_v56  ;;  %v1295_v32 = vadd.f32 5.0, %v1287_v51 }
 0x17f   : > { %v3495_v3 = vpop.eup %3494  ;;  %v1296_v23 = vadd.f32 5.0, %v1288_v22  ;;  %v1297_v27 = vadd.f32 5.0, %v1289_v16  ;;  %v1298_v33 = vadd.f32 5.0, %v1290_v31  ;;  %v1301_v11 = vmul.f32 %v1293_v60, %v4647_v61 }
 0x180   : > { %2779 = vperm.xlu1 %3464, %v3491_v59   ;;  %v1300_v25 = vadd.f32 5.0, %v1292_v62  ;;  %v1302_v44 = vmul.f32 %v1294_v47, %v4652_v52  ;;  %v1303_v58 = vmul.f32 %v1295_v32, %v4657_v20  ;;  %v6484_v32 = vsub.f32 1.0, %v4007_v41 }
 0x181   : > { %2897 = vrot.lane.b32.xlu0 %v4587_v26, %s3652_s23  ;;  %v1299_v26 = vadd.f32 5.0, %v1291_v40  ;;  %v1304_v49 = vmul.f32 %v1296_v23, %v4664_v12  ;;  %v1305_v54 = vmul.f32 %v1297_v27, %v4669_v50  ;;  %v1306_v4 = vmul.f32 %v1298_v33, %v4674_v0 }
 0x182   : > { %v1309_v57 = vadd.f32 %v1301_v11, %v4023_v18  ;;  %v1308_v45 = vmul.f32 %v1300_v25, %v4684_v29  ;;  %v1311_v56 = vadd.f32 %v1303_v58, %v4018_v46  ;;  %v4755_v23 = vmul.f32 3.1415927, %v6484_v32 }
 0x183   : > { %v3497_v63 = vpop.eup %3496  ;;  %v1307_v59 = vmul.f32 %v1299_v26, %v4679_v48  ;;  %v1312_v51 = vadd.f32 %v1304_v49, %v4026_v53  ;;  %v1313_v22 = vadd.f32 %v1305_v54, %v4059_v6  ;;  %v1314_v16 = vadd.f32 %v1306_v4, %v4057_v5 }
 0x184   : > { %2784 = vperm.xlu1 %3464, %v3495_v3   ;;  %v1310_v3 = vadd.f32 %v1302_v44, %v4032_v30  ;;  %v1317_v31 = vsub.f32 %v1309_v57, %v4686_v39  ;;  %v1316_v40 = vadd.f32 %v1308_v45, %v4061_v8  ;;  %v1319_v47 = vsub.f32 %v1311_v56, %v4690_v34 }
 0x185   : > { %v1315_v60 = vadd.f32 %v1307_v59, %v4073_v15  ;;  %v1320_v27 = vsub.f32 %v1312_v51, %v4694_v36  ;;  %v1321_v33 = vsub.f32 %v1313_v22, %v4696_v1  ;;  %v1322_v11 = vsub.f32 %v1314_v16, %v4698_v14 }
 0x186   : > { %v1318_v62 = vsub.f32 %v1310_v3, %v4688_v9  ;;  %v1324_v44 = vsub.f32 %v1316_v40, %v1276_v35  ;;  %v1325_v58 = vadd.f32 %v1317_v31, %v4647_v61  ;;  %v1327_v41 = vadd.f32 %v1319_v47, %v4657_v20 }
 0x187   : > { %v1323_v25 = vsub.f32 %v1315_v60, %v1275_v43  ;;  %v1328_v54 = vadd.f32 %v1320_v27, %v4664_v12  ;;  %v1329_v4 = vadd.f32 %v1321_v33, %v4669_v50  ;;  %v1330_v57 = vadd.f32 %v1322_v11, %v4674_v0 }
 0x188   : > { %2789 = vperm.xlu1 %3464, %v3493_v10   ;;  %v6485_v10 = vsub.f32 1.0, %v4012_v42  ;;  %v1326_v49 = vadd.f32 %v1318_v62, %v4652_v52  ;;  %v1333_v42 = vmul.f32 0.98, %v4686_v39  ;;  %v1334_v45 = vmul.f32 0.98, %v4688_v9 }
 0x189   : > { %v1331_v59 = vadd.f32 %v1323_v25, %v4679_v48  ;;  %v1332_v3 = vadd.f32 %v1324_v44, %v4684_v29  ;;  %v1335_v61 = vmul.f32 0.98, %v4690_v34  ;;  %v1336_v52 = vmul.f32 0.98, %v4694_v36 }
 0x18a   : > { %v4762_v26 = vmul.f32 3.1415927, %v6485_v10  ;;  %v1337_v20 = vmul.f32 0.98, %v4696_v1  ;;  %v1338_v12 = vmul.f32 0.98, %v4698_v14 }
 0x18b   : > { %v1339_v50 = vmul.f32 0.98, %v1275_v43  ;;  %v1342_v56 = vmul.f32 0.004, %v1326_v49  ;;  %v1343_v0 = vmul.f32 0.004, %v1327_v41 }
 0x18c   : > { %2794 = vperm.xlu1 %3464, %v3497_v63   ;;  %v1341_v63 = vmul.f32 0.004, %v1325_v58  ;;  %v1344_v51 = vmul.f32 0.004, %v1328_v54  ;;  %v1340_v39 = vmul.f32 0.98, %v1276_v35 }
 0x18d   : > { %v1345_v9 = vmul.f32 0.004, %v1329_v4  ;;  %v1346_v48 = vmul.f32 0.004, %v1330_v57  ;;  %v1347_v29 = vmul.f32 0.004, %v1331_v59  ;;  %v1350_v16 = vadd.f32 %v1342_v56, %v1334_v45 }
 0x18e   : > { %v1348_v22 = vmul.f32 0.004, %v1332_v3  ;;  %v1349_v34 = vadd.f32 %v1341_v63, %v1333_v42  ;;  %v1351_v36 = vadd.f32 %v1343_v0, %v1335_v61  ;;  %v1352_v31 = vadd.f32 %v1344_v51, %v1336_v52  ;;  %v6486_v10 = vld [vmem:[#allocation25_spill] sm:$0xff] }
 0x18f   : > { %v1353_v1 = vadd.f32 %v1345_v9, %v1337_v20  ;;  %vm1357_vm8 = vcmp.gt.f32.partialorder %v1325_v58, 30.0  ;;  %v1354_v14 = vadd.f32 %v1346_v48, %v1338_v12  ;;  %vm1358_vm9 = vcmp.gt.f32.partialorder %v1326_v49, 30.0 }
 0x190   : > { %2885 = vrot.lane.b32.xlu1 %v4457_v7, %s3652_s23  ;;  %vm1359_vm10 = vcmp.gt.f32.partialorder %v1327_v41, 30.0  ;;  %vm1360_vm11 = vcmp.gt.f32.partialorder %v1328_v54, 30.0  ;;  %vm1361_vm12 = vcmp.gt.f32.partialorder %v1329_v4, 30.0  ;;  %vm1362_vm13 = vcmp.gt.f32.partialorder %v1330_v57, 30.0 }
 0x191   : > { %vm1363_vm14 = vcmp.gt.f32.partialorder %v1331_v59, 30.0  ;;  %vm1364_vm15 = vcmp.gt.f32.partialorder %v1332_v3, 30.0  ;;  %v1355_v7 = vadd.f32 %v1347_v29, %v1339_v50  ;;  %v1356_v43 = vadd.f32 %v1348_v22, %v1340_v39 }
 0x192   : > { %v3231_v35 = vsel %vm1357_vm8, 1.0, %v6470_v2  ;;  %v3232_v60 = vsel %vm1358_vm9, 1.0, %v6470_v2  ;;  %v3233_v40 = vsel %vm1359_vm10, 1.0, %v6470_v2  ;;  %v3234_v62 = vsel %vm1360_vm11, 1.0, %v6470_v2 }
 0x193   : > { %v3236_v47 = vsel %vm1362_vm13, 1.0, %v6470_v2  ;;  %v3237_v32 = vsel %vm1363_vm14, 1.0, %v6470_v2  ;;  %v3238_v27 = vsel %vm1364_vm15, 1.0, %v6470_v2  ;;  %v4799_v33 = vsel %vm1357_vm8, -65.0, %v1325_v58 }
 0x194   : > { %2887 = vrot.lane.b32.xlu1 %v4521_v38, %s3652_s23  ;;  %v3235_v38 = vsel %vm1361_vm12, 1.0, %v6470_v2  ;;  %v4802_v11 = vsel %vm1358_vm9, -65.0, %v1326_v49  ;;  %v4807_v25 = vsel %vm1359_vm10, -65.0, %v1327_v41  ;;  %v4810_v44 = vsel %vm1360_vm11, -65.0, %v1328_v54 }
 0x195   : > { %v4813_v42 = vsel %vm1361_vm12, -65.0, %v1329_v4  ;;  %v4816_v45 = vsel %vm1362_vm13, -65.0, %v1330_v57  ;;  %v1389_v58 = vmul.f32 8.0, %v3231_v35  ;;  %v1390_v61 = vmul.f32 8.0, %v3232_v60  ;;  %v6487_v57 = vld [vmem:[#allocation28_spill] sm:$0xff] }
 0x196   : > { %v1391_v52 = vmul.f32 8.0, %v3233_v40  ;;  %v1392_v49 = vmul.f32 8.0, %v3234_v62  ;;  %v4819_v20 = vsel %vm1363_vm14, -65.0, %v1331_v59  ;;  %v4822_v12 = vsel %vm1364_vm15, -65.0, %v1332_v3 }
 0x197   : > { %v1393_v41 = vmul.f32 8.0, %v3235_v38  ;;  %v1394_v50 = vmul.f32 8.0, %v3236_v47  ;;  %v1395_v54 = vmul.f32 8.0, %v3237_v32  ;;  %v1396_v63 = vmul.f32 8.0, %v3238_v27 }
 0x198   : > { %2891 = vrot.lane.b32.xlu1 %v6486_v10, %s3652_s23  ;;  %v4824_v56 = vadd.f32 %v1389_v58, %v1349_v34  ;;  %v4826_v4 = vadd.f32 %v1390_v61, %v1350_v16  ;;  %v4830_v0 = vadd.f32 %v1391_v52, %v1351_v36  ;;  %v4832_v51 = vadd.f32 %v1392_v49, %v1352_v31  ;;  %v6488_v31 = vld [vmem:[#allocation30_spill] sm:$0xff] }
 0x199   : > { %v4834_v59 = vadd.f32 %v1393_v41, %v1353_v1  ;;  %v4836_v39 = vadd.f32 %v1394_v50, %v1354_v14  ;;  %v4839_v3 = vadd.f32 %v3231_v35, %v4701_v19  ;;  %v4842_v9 = vadd.f32 %v3232_v60, %v4704_v37 }
 0x19a   : > { %v4845_v48 = vadd.f32 %v3233_v40, %v4707_v55  ;;  %v4848_v29 = vadd.f32 %v3234_v62, %v4710_v24  ;;  %v4851_v22 = vadd.f32 %v3235_v38, %v4713_v13  ;;  %v4854_v34 = vadd.f32 %v3236_v47, %v4716_v21 }
 0x19b   : > { %v4857_v16 = vadd.f32 %v3237_v32, %v4719_v28  ;;  %v4860_v19 = vadd.f32 %v3238_v27, %v4722_v17  ;;  %v1403_v37 = vadd.f32 %v1395_v54, %v1355_v7  ;;  %v1413_v36 = vmul.f32 0.04, %v4799_v33 }
 0x19c   : > { %2895 = vrot.lane.b32.xlu1 %v6487_v57, %s3652_s23  ;;  %v1414_v55 = vmul.f32 0.04, %v4802_v11  ;;  %v1415_v24 = vmul.f32 0.04, %v4807_v25  ;;  %v1404_v13 = vadd.f32 %v1396_v63, %v1356_v43  ;;  %v1416_v21 = vmul.f32 0.04, %v4810_v44 }
 0x19d   : > { %v1417_v1 = vmul.f32 0.04, %v4813_v42  ;;  %v1418_v28 = vmul.f32 0.04, %v4816_v45  ;;  %v1419_v17 = vmul.f32 0.04, %v4819_v20 }
 0x19e   : > { %v1420_v14 = vmul.f32 0.04, %v4822_v12  ;;  %v1421_v7 = vadd.f32 5.0, %v1413_v36  ;;  %v1422_v35 = vadd.f32 5.0, %v1414_v55  ;;  %v1423_v60 = vadd.f32 5.0, %v1415_v24 }
 0x19f   : > { %v1424_v40 = vadd.f32 5.0, %v1416_v21  ;;  %v1425_v62 = vadd.f32 5.0, %v1417_v1  ;;  %v1426_v38 = vadd.f32 5.0, %v1418_v28  ;;  %v1427_v47 = vadd.f32 5.0, %v1419_v17 }
 0x1a0   : > { %2899 = vrot.lane.b32.xlu1 %v6488_v31, %s3652_s23  ;;  %v1428_v32 = vadd.f32 5.0, %v1420_v14  ;;  %v1429_v43 = vmul.f32 %v1421_v7, %v4799_v33  ;;  %v1430_v27 = vmul.f32 %v1422_v35, %v4802_v11  ;;  %v1431_v10 = vmul.f32 %v1423_v60, %v4807_v25  ;;  %v6489_v35 = vld [vmem:[#allocation12_spill] sm:$0xff] }
 0x1a1   : > { %v1432_v58 = vmul.f32 %v1424_v40, %v4810_v44  ;;  %v1433_v61 = vmul.f32 %v1425_v62, %v4813_v42  ;;  %v1434_v52 = vmul.f32 %v1426_v38, %v4816_v45  ;;  %v1435_v49 = vmul.f32 %v1427_v47, %v4819_v20  ;;  %v6490_v40 = vld [vmem:[#allocation13_spill] sm:$0xff] }
 0x1a2   : > { %v1436_v41 = vmul.f32 %v1428_v32, %v4822_v12  ;;  %v1437_v50 = vadd.f32 %v1429_v43, %v4023_v18  ;;  %v1438_v54 = vadd.f32 %v1430_v27, %v4032_v30  ;;  %v1439_v63 = vadd.f32 %v1431_v10, %v4018_v46 }
 0x1a3   : > { %v1440_v57 = vadd.f32 %v1432_v58, %v4026_v53  ;;  %v1441_v36 = vadd.f32 %v1433_v61, %v4059_v6  ;;  %v1442_v55 = vadd.f32 %v1434_v52, %v4057_v5  ;;  %v1443_v24 = vadd.f32 %v1435_v49, %v4073_v15 }
 0x1a4   : > { %v1444_v31 = vadd.f32 %v1436_v41, %v4061_v8  ;;  %v1445_v21 = vsub.f32 %v1437_v50, %v4824_v56  ;;  %v1446_v1 = vsub.f32 %v1438_v54, %v4826_v4  ;;  %v1447_v28 = vsub.f32 %v1439_v63, %v4830_v0 }
 0x1a5   : > { %v1448_v17 = vsub.f32 %v1440_v57, %v4832_v51  ;;  %v1449_v14 = vsub.f32 %v1441_v36, %v4834_v59  ;;  %v1450_v7 = vsub.f32 %v1442_v55, %v4836_v39  ;;  %v1451_v38 = vsub.f32 %v1443_v24, %v1403_v37 }
 0x1a6   : > { %v1452_v47 = vsub.f32 %v1444_v31, %v1404_v13  ;;  %v1453_v32 = vadd.f32 %v1445_v21, %v4799_v33  ;;  %v1454_v43 = vadd.f32 %v1446_v1, %v4802_v11  ;;  %v1455_v27 = vadd.f32 %v1447_v28, %v4807_v25 }
 0x1a7   : > { %v1456_v10 = vadd.f32 %v1448_v17, %v4810_v44  ;;  %v1457_v58 = vadd.f32 %v1449_v14, %v4813_v42  ;;  %v1458_v61 = vadd.f32 %v1450_v7, %v4816_v45  ;;  %v1459_v52 = vadd.f32 %v1451_v38, %v4819_v20 }
 0x1a8   : > { %v1461_v49 = vmul.f32 0.98, %v4824_v56  ;;  %v1460_v41 = vadd.f32 %v1452_v47, %v4822_v12  ;;  %v1462_v50 = vmul.f32 0.98, %v4826_v4  ;;  %v1463_v33 = vmul.f32 0.98, %v4830_v0 }
 0x1a9   : > { %v1464_v11 = vmul.f32 0.98, %v4832_v51  ;;  %v1465_v25 = vmul.f32 0.98, %v4834_v59  ;;  %v1466_v44 = vmul.f32 0.98, %v4836_v39 }
 0x1aa   : > { %v1467_v54 = vmul.f32 0.98, %v1403_v37  ;;  %v1469_v42 = vmul.f32 0.004, %v1453_v32  ;;  %v1470_v63 = vmul.f32 0.004, %v1454_v43 }
 0x1ab   : > { %v1471_v45 = vmul.f32 0.004, %v1455_v27  ;;  %v1472_v57 = vmul.f32 0.004, %v1456_v10  ;;  %v1473_v20 = vmul.f32 0.004, %v1457_v58 }
 0x1ac   : > { %v1474_v36 = vmul.f32 0.004, %v1458_v61  ;;  %v1468_v56 = vmul.f32 0.98, %v1404_v13  ;;  %v1475_v55 = vmul.f32 0.004, %v1459_v52  ;;  %v1477_v24 = vadd.f32 %v1469_v42, %v1461_v49 }
 0x1ad   : > { %v1476_v12 = vmul.f32 0.004, %v1460_v41  ;;  %v1478_v4 = vadd.f32 %v1470_v63, %v1462_v50  ;;  %v1479_v31 = vadd.f32 %v1471_v45, %v1463_v33  ;;  %v1480_v0 = vadd.f32 %v1472_v57, %v1464_v11 }
 0x1ae   : > { %v1481_v21 = vadd.f32 %v1473_v20, %v1465_v25  ;;  %v1482_v51 = vadd.f32 %v1474_v36, %v1466_v44  ;;  %vm1485_vm0 = vcmp.gt.f32.partialorder %v1453_v32, 30.0  ;;  %vm1486_vm1 = vcmp.gt.f32.partialorder %v1454_v43, 30.0 }
 0x1af   : > { %vm1487_vm2 = vcmp.gt.f32.partialorder %v1455_v27, 30.0  ;;  %vm1488_vm3 = vcmp.gt.f32.partialorder %v1456_v10, 30.0  ;;  %vm1489_vm4 = vcmp.gt.f32.partialorder %v1457_v58, 30.0  ;;  %vm1490_vm5 = vcmp.gt.f32.partialorder %v1458_v61, 30.0 }
 0x1b0   : > { %v1483_v59 = vadd.f32 %v1475_v55, %v1467_v54  ;;  %v1484_v39 = vadd.f32 %v1476_v12, %v1468_v56  ;;  %vm1491_vm6 = vcmp.gt.f32.partialorder %v1459_v52, 30.0  ;;  %vm1492_vm7 = vcmp.gt.f32.partialorder %v1460_v41, 30.0 }
 0x1b1   : > { %v3239_v37 = vsel %vm1485_vm0, 1.0, %v6470_v2  ;;  %v3240_v13 = vsel %vm1486_vm1, 1.0, %v6470_v2  ;;  %v3241_v1 = vsel %vm1487_vm2, 1.0, %v6470_v2  ;;  %v3242_v28 = vsel %vm1488_vm3, 1.0, %v6470_v2 }
 0x1b2   : > { %v3243_v17 = vsel %vm1489_vm4, 1.0, %v6470_v2  ;;  %v3244_v14 = vsel %vm1490_vm5, 1.0, %v6470_v2  ;;  %v3245_v7 = vsel %vm1491_vm6, 1.0, %v6470_v2  ;;  %v3246_v38 = vsel %vm1492_vm7, 1.0, %v6470_v2 }
 0x1b3   : > { %v4927_v47 = vsel %vm1485_vm0, -65.0, %v1453_v32  ;;  %v4930_v49 = vsel %vm1486_vm1, -65.0, %v1454_v43  ;;  %v4933_v50 = vsel %vm1487_vm2, -65.0, %v1455_v27  ;;  %v4936_v33 = vsel %vm1488_vm3, -65.0, %v1456_v10 }
 0x1b4   : > { %v4939_v11 = vsel %vm1489_vm4, -65.0, %v1457_v58  ;;  %v4942_v25 = vsel %vm1490_vm5, -65.0, %v1458_v61  ;;  %v1517_v44 = vmul.f32 8.0, %v3239_v37  ;;  %v1518_v54 = vmul.f32 8.0, %v3240_v13 }
 0x1b5   : > { %v1519_v42 = vmul.f32 8.0, %v3241_v1  ;;  %v1520_v32 = vmul.f32 8.0, %v3242_v28  ;;  %v1521_v63 = vmul.f32 8.0, %v3243_v17  ;;  %v1522_v45 = vmul.f32 8.0, %v3244_v14 }
 0x1b6   : > { %v4945_v43 = vsel %vm1491_vm6, -65.0, %v1459_v52  ;;  %v4948_v27 = vsel %vm1492_vm7, -65.0, %v1460_v41  ;;  %v1523_v10 = vmul.f32 8.0, %v3245_v7  ;;  %v1524_v57 = vmul.f32 8.0, %v3246_v38 }
 0x1b7   : > { %v4950_v20 = vadd.f32 %v1517_v44, %v1477_v24  ;;  %v4952_v58 = vadd.f32 %v1518_v54, %v1478_v4  ;;  %v4954_v61 = vadd.f32 %v1519_v42, %v1479_v31  ;;  %v4956_v36 = vadd.f32 %v1520_v32, %v1480_v0 }
 0x1b8   : > { %v4958_v56 = vadd.f32 %v1521_v63, %v1481_v21  ;;  %v4960_v55 = vadd.f32 %v1522_v45, %v1482_v51  ;;  %v4963_v52 = vadd.f32 %v3239_v37, %v4839_v3  ;;  %v4966_v41 = vadd.f32 %v3240_v13, %v4842_v9 }
 0x1b9   : > { %v4969_v12 = vadd.f32 %v3241_v1, %v4845_v48  ;;  %v4972_v24 = vadd.f32 %v3242_v28, %v4848_v29  ;;  %v4975_v4 = vadd.f32 %v3243_v17, %v4851_v22  ;;  %v4978_v31 = vadd.f32 %v3244_v14, %v4854_v34 }
 0x1ba   : > { %v4981_v0 = vadd.f32 %v3245_v7, %v4857_v16  ;;  %v4984_v3 = vadd.f32 %v3246_v38, %v4860_v19  ;;  %v1541_v9 = vmul.f32 0.04, %v4927_v47  ;;  %v1542_v48 = vmul.f32 0.04, %v4930_v49 }
 0x1bb   : > { %v1531_v21 = vadd.f32 %v1523_v10, %v1483_v59  ;;  %v1543_v29 = vmul.f32 0.04, %v4933_v50  ;;  %v1544_v51 = vmul.f32 0.04, %v4936_v33  ;;  %v1545_v22 = vmul.f32 0.04, %v4939_v11 }
 0x1bc   : > { %v1532_v37 = vadd.f32 %v1524_v57, %v1484_v39  ;;  %v1546_v34 = vmul.f32 0.04, %v4942_v25  ;;  %v1547_v16 = vmul.f32 0.04, %v4945_v43  ;;  %v1548_v13 = vmul.f32 0.04, %v4948_v27 }
 0x1bd   : > { %v1549_v19 = vadd.f32 5.0, %v1541_v9  ;;  %v1550_v1 = vadd.f32 5.0, %v1542_v48  ;;  %v1551_v28 = vadd.f32 5.0, %v1543_v29  ;;  %v1552_v17 = vadd.f32 5.0, %v1544_v51 }
 0x1be   : > { %v1553_v14 = vadd.f32 5.0, %v1545_v22  ;;  %v1554_v7 = vadd.f32 5.0, %v1546_v34  ;;  %v1555_v59 = vadd.f32 5.0, %v1547_v16  ;;  %v1556_v38 = vadd.f32 5.0, %v1548_v13 }
 0x1bf   : > { %v1557_v44 = vmul.f32 %v1549_v19, %v4927_v47  ;;  %v1558_v54 = vmul.f32 %v1550_v1, %v4930_v49  ;;  %v1559_v39 = vmul.f32 %v1551_v28, %v4933_v50  ;;  %v1560_v42 = vmul.f32 %v1552_v17, %v4936_v33 }
 0x1c0   : > { %v1561_v32 = vmul.f32 %v1553_v14, %v4939_v11  ;;  %v1562_v63 = vmul.f32 %v1554_v7, %v4942_v25  ;;  %v1563_v45 = vmul.f32 %v1555_v59, %v4945_v43  ;;  %v1564_v10 = vmul.f32 %v1556_v38, %v4948_v27  ;;  %v6491_v38 = vld [vmem:[#allocation14_spill] sm:$0xff] }
 0x1c1   : > { %v1565_v57 = vadd.f32 %v1557_v44, %v4023_v18  ;;  %v1566_v9 = vadd.f32 %v1558_v54, %v4032_v30  ;;  %v1567_v48 = vadd.f32 %v1559_v39, %v4018_v46  ;;  %v1568_v29 = vadd.f32 %v1560_v42, %v4026_v53  ;;  %v6492_v54 = vld [vmem:[#allocation16_spill] sm:$0xff]  ;;  %v6493_v42 = vld [vmem:[#allocation18_spill] sm:$0xff] }
 0x1c2   : > { %v1569_v51 = vadd.f32 %v1561_v32, %v4059_v6  ;;  %v1570_v22 = vadd.f32 %v1562_v63, %v4057_v5  ;;  %v1571_v34 = vadd.f32 %v1563_v45, %v4073_v15  ;;  %v1572_v16 = vadd.f32 %v1564_v10, %v4061_v8 }
 0x1c3   : > { %v1573_v13 = vsub.f32 %v1565_v57, %v4950_v20  ;;  %v1574_v19 = vsub.f32 %v1566_v9, %v4952_v58  ;;  %v1575_v1 = vsub.f32 %v1567_v48, %v4954_v61  ;;  %v1576_v28 = vsub.f32 %v1568_v29, %v4956_v36 }
 0x1c4   : > { %v1577_v17 = vsub.f32 %v1569_v51, %v4958_v56  ;;  %v1578_v14 = vsub.f32 %v1570_v22, %v4960_v55  ;;  %v1579_v7 = vsub.f32 %v1571_v34, %v1531_v21  ;;  %v1580_v59 = vsub.f32 %v1572_v16, %v1532_v37 }
 0x1c5   : > { %v1581_v63 = vadd.f32 %v1573_v13, %v4927_v47  ;;  %v1582_v45 = vadd.f32 %v1574_v19, %v4930_v49  ;;  %v1583_v10 = vadd.f32 %v1575_v1, %v4933_v50  ;;  %v1584_v57 = vadd.f32 %v1576_v28, %v4936_v33 }
 0x1c6   : > { %v1585_v9 = vadd.f32 %v1577_v17, %v4939_v11  ;;  %v1586_v48 = vadd.f32 %v1578_v14, %v4942_v25  ;;  %v1587_v29 = vadd.f32 %v1579_v7, %v4945_v43  ;;  %v1589_v51 = vmul.f32 0.98, %v4950_v20 }
 0x1c7   : > { %v1590_v22 = vmul.f32 0.98, %v4952_v58  ;;  %v1588_v34 = vadd.f32 %v1580_v59, %v4948_v27  ;;  %v1591_v47 = vmul.f32 0.98, %v4954_v61  ;;  %v1592_v49 = vmul.f32 0.98, %v4956_v36 }
 0x1c8   : > { %v1593_v50 = vmul.f32 0.98, %v4958_v56  ;;  %v1594_v33 = vmul.f32 0.98, %v4960_v55  ;;  %v1595_v16 = vmul.f32 0.98, %v1531_v21 }
 0x1c9   : > { %v1597_v11 = vmul.f32 0.004, %v1581_v63  ;;  %v1598_v13 = vmul.f32 0.004, %v1582_v45  ;;  %v1599_v25 = vmul.f32 0.004, %v1583_v10 }
 0x1ca   : > { %v1600_v19 = vmul.f32 0.004, %v1584_v57  ;;  %v1596_v43 = vmul.f32 0.98, %v1532_v37  ;;  %v1601_v1 = vmul.f32 0.004, %v1585_v9 }
 0x1cb   : > { %v1602_v20 = vmul.f32 0.004, %v1586_v48  ;;  %v1603_v28 = vmul.f32 0.004, %v1587_v29  ;;  %v1604_v58 = vmul.f32 0.004, %v1588_v34  ;;  %v1605_v17 = vadd.f32 %v1597_v11, %v1589_v51 }
 0x1cc   : > { %v1606_v27 = vadd.f32 %v1598_v13, %v1590_v22  ;;  %v1607_v14 = vadd.f32 %v1599_v25, %v1591_v47  ;;  %v1608_v61 = vadd.f32 %v1600_v19, %v1592_v49  ;;  %v1609_v7 = vadd.f32 %v1601_v1, %v1593_v50 }
 0x1cd   : > { %vm1613_vm8 = vcmp.gt.f32.partialorder %v1581_v63, 30.0  ;;  %v1610_v36 = vadd.f32 %v1602_v20, %v1594_v33  ;;  %vm1614_vm9 = vcmp.gt.f32.partialorder %v1582_v45, 30.0  ;;  %vm1615_vm10 = vcmp.gt.f32.partialorder %v1583_v10, 30.0 }
 0x1ce   : > { %vm1616_vm11 = vcmp.gt.f32.partialorder %v1584_v57, 30.0  ;;  %vm1617_vm12 = vcmp.gt.f32.partialorder %v1585_v9, 30.0  ;;  %vm1618_vm13 = vcmp.gt.f32.partialorder %v1586_v48, 30.0  ;;  %vm1619_vm14 = vcmp.gt.f32.partialorder %v1587_v29, 30.0 }
 0x1cf   : > { %vm1620_vm15 = vcmp.gt.f32.partialorder %v1588_v34, 30.0  ;;  %v1611_v56 = vadd.f32 %v1603_v28, %v1595_v16  ;;  %v1612_v55 = vadd.f32 %v1604_v58, %v1596_v43  ;;  %v3247_v21 = vsel %vm1613_vm8, 1.0, %v6470_v2 }
 0x1d0   : > { %v3248_v37 = vsel %vm1614_vm9, 1.0, %v6470_v2  ;;  %v3249_v59 = vsel %vm1615_vm10, 1.0, %v6470_v2  ;;  %v3250_v51 = vsel %vm1616_vm11, 1.0, %v6470_v2  ;;  %v3251_v22 = vsel %vm1617_vm12, 1.0, %v6470_v2 }
 0x1d1   : > { %v3252_v47 = vsel %vm1618_vm13, 1.0, %v6470_v2  ;;  %v3253_v49 = vsel %vm1619_vm14, 1.0, %v6470_v2  ;;  %v3254_v50 = vsel %vm1620_vm15, 1.0, %v6470_v2  ;;  %v5050_v33 = vsel %vm1613_vm8, -65.0, %v1581_v63 }
 0x1d2   : > { %v5053_v16 = vsel %vm1614_vm9, -65.0, %v1582_v45  ;;  %v5056_v11 = vsel %vm1615_vm10, -65.0, %v1583_v10  ;;  %v5059_v13 = vsel %vm1616_vm11, -65.0, %v1584_v57  ;;  %v5062_v25 = vsel %vm1617_vm12, -65.0, %v1585_v9 }
 0x1d3   : > { %v5065_v19 = vsel %vm1618_vm13, -65.0, %v1586_v48  ;;  %v1645_v43 = vmul.f32 8.0, %v3247_v21  ;;  %v1646_v1 = vmul.f32 8.0, %v3248_v37  ;;  %v1647_v20 = vmul.f32 8.0, %v3249_v59 }
 0x1d4   : > { %v1648_v63 = vmul.f32 8.0, %v3250_v51  ;;  %v5068_v28 = vsel %vm1619_vm14, -65.0, %v1587_v29  ;;  %v5071_v45 = vsel %vm1620_vm15, -65.0, %v1588_v34  ;;  %v1649_v10 = vmul.f32 8.0, %v3251_v22 }
 0x1d5   : > { %v1650_v58 = vmul.f32 8.0, %v3252_v47  ;;  %v1651_v57 = vmul.f32 8.0, %v3253_v49  ;;  %v1652_v32 = vmul.f32 8.0, %v3254_v50  ;;  %v5073_v39 = vadd.f32 %v1645_v43, %v1605_v17 }
 0x1d6   : > { %v5075_v9 = vadd.f32 %v1646_v1, %v1606_v27  ;;  %v5077_v48 = vadd.f32 %v1647_v20, %v1607_v14  ;;  %v5079_v44 = vadd.f32 %v1648_v63, %v1608_v61  ;;  %v5081_v62 = vadd.f32 %v1649_v10, %v1609_v7  ;;  %v5130_v1 = vld [vmem:[%s5123_s12] sm:$0xff] }
 0x1d7   : > { %v5083_v60 = vadd.f32 %v1650_v58, %v1610_v36  ;;  %v5086_v29 = vadd.f32 %v3247_v21, %v4963_v52  ;;  %v5089_v34 = vadd.f32 %v3248_v37, %v4966_v41  ;;  %v5092_v17 = vadd.f32 %v3249_v59, %v4969_v12 }
 0x1d8   : > { %v5095_v27 = vadd.f32 %v3250_v51, %v4972_v24  ;;  %v5098_v14 = vadd.f32 %v3251_v22, %v4975_v4  ;;  %v5101_v61 = vadd.f32 %v3252_v47, %v4978_v31  ;;  %v5104_v7 = vadd.f32 %v3253_v49, %v4981_v0 }
 0x1d9   : > { %v5107_v52 = vadd.f32 %v3254_v50, %v4984_v3  ;;  %v5109_v41 = vadd.f32 %v1651_v57, %v1611_v56  ;;  %v1669_v12 = vmul.f32 0.04, %v5050_v33  ;;  %v1670_v36 = vmul.f32 0.04, %v5053_v16 }
 0x1da   : > { %v1671_v24 = vmul.f32 0.04, %v5056_v11  ;;  %v5114_v21 = vadd.f32 %v1652_v32, %v1612_v55  ;;  %v1672_v4 = vmul.f32 0.04, %v5059_v13  ;;  %v1673_v31 = vmul.f32 0.04, %v5062_v25 }
 0x1db   : > { %v1674_v0 = vmul.f32 0.04, %v5065_v19  ;;  %v1675_v3 = vmul.f32 0.04, %v5068_v28  ;;  %v1676_v56 = vmul.f32 0.04, %v5071_v45 }
 0x1dc   : > { %v1677_v37 = vadd.f32 5.0, %v1669_v12  ;;  %v1678_v59 = vadd.f32 5.0, %v1670_v36  ;;  %v1679_v32 = vadd.f32 5.0, %v1671_v24  ;;  %v1680_v55 = vadd.f32 5.0, %v1672_v4  ;;  %v6494_v12 = vld [vmem:[#allocation22_spill] sm:$0xff] }
 0x1dd   : > { %v1681_v51 = vadd.f32 5.0, %v1673_v31  ;;  %v1682_v22 = vadd.f32 5.0, %v1674_v0  ;;  %v1683_v47 = vadd.f32 5.0, %v1675_v3  ;;  %v1684_v49 = vadd.f32 5.0, %v1676_v56 }
 0x1de   : > { %v1685_v50 = vmul.f32 %v1677_v37, %v5050_v33  ;;  %v1686_v43 = vmul.f32 %v1678_v59, %v5053_v16  ;;  %v1687_v63 = vmul.f32 %v1679_v32, %v5056_v11  ;;  %v1688_v10 = vmul.f32 %v1680_v55, %v5059_v13 }
 0x1df   : > { %v1689_v58 = vmul.f32 %v1681_v51, %v5062_v25  ;;  %v1690_v57 = vmul.f32 %v1682_v22, %v5065_v19  ;;  %v1691_v24 = vmul.f32 %v1683_v47, %v5068_v28  ;;  %v1692_v4 = vmul.f32 %v1684_v49, %v5071_v45 }
 0x1e0   : > { %v1693_v31 = vadd.f32 %v1685_v50, %v4023_v18  ;;  %v1694_v0 = vadd.f32 %v1686_v43, %v4032_v30  ;;  %v1695_v3 = vadd.f32 %v1687_v63, %v4018_v46  ;;  %v1696_v56 = vadd.f32 %v1688_v10, %v4026_v53 }
 0x1e1   : > { %v1697_v37 = vadd.f32 %v1689_v58, %v4059_v6  ;;  %v1698_v32 = vadd.f32 %v1690_v57, %v4057_v5  ;;  %v1699_v55 = vadd.f32 %v1691_v24, %v4073_v15  ;;  %v1700_v51 = vadd.f32 %v1692_v4, %v4061_v8 }
 0x1e2   : > { %v1701_v22 = vsub.f32 %v1693_v31, %v5073_v39  ;;  %v1702_v47 = vsub.f32 %v1694_v0, %v5075_v9  ;;  %v1703_v49 = vsub.f32 %v1695_v3, %v5077_v48  ;;  %v1704_v50 = vsub.f32 %v1696_v56, %v5079_v44 }
 0x1e3   : > { %v2760_v20 = vpop.permute.xlu1 %2759  ;;  %v1706_v63 = vsub.f32 %v1698_v32, %v5083_v60  ;;  %v1707_v10 = vsub.f32 %v1699_v55, %v5109_v41  ;;  %v6495_v58 = vsub.f32 1.0, %v6489_v35  ;;  %v6497_v24 = vsub.f32 1.0, %v6491_v38  ;;  %v5205_v55 = vld [vmem:[%s5123_s12 + $0x8] sm:$0xff] }
 0x1e4   : > { %v2797_v36 = vmul.f32 %v2760_v20, %v6494_v12  ;;  %v1705_v20 = vsub.f32 %v1697_v37, %v5081_v62  ;;  %v6496_v12 = vsub.f32 1.0, %v6490_v40  ;;  %v1708_v31 = vsub.f32 %v1700_v51, %v5114_v21 }
 0x1e5   : > { %v5157_v57 = vmul.f32 3.1415927, %v6495_v58  ;;  %v5165_v4 = vmul.f32 3.1415927, %v6497_v24  ;;  %v5169_v0 = vadd.f32 %v1701_v22, %v5050_v33  ;;  %v5172_v3 = vadd.f32 %v1702_v47, %v5053_v16  ;;  %v5211_v22 = vld [vmem:[%s5123_s12 + $0x10] sm:$0xff] }
 0x1e6   : > { %v2805_v59 = vsub.f32 %v5130_v1, %v2797_v36  ;;  %v5161_v36 = vmul.f32 3.1415927, %v6496_v12  ;;  %v5175_v35 = vadd.f32 %v1703_v49, %v5056_v11  ;;  %v6498_v40 = vsub.f32 1.0, %v6492_v54 }
 0x1e7   : > { %v5182_v38 = vadd.f32 %v1704_v50, %v5059_v13  ;;  %v5185_v37 = vadd.f32 %v1705_v20, %v5062_v25  ;;  %v5188_v33 = vadd.f32 %v1706_v63, %v5065_v19  ;;  %v6499_v16 = vsub.f32 1.0, %v6493_v42  ;;  %v6500_v50 = vld [vmem:[#allocation19_spill] sm:$0xff] }
 0x1e8   : > { %v3319_v43 = vadd.f32 -1.0, %v2805_v59  ;;  %v5179_v56 = vmul.f32 3.1415927, %v6498_v40  ;;  %vm2909_vm0 = vcmask 7168   ;;  %v5195_v11 = vadd.f32 %v1707_v10, %v5068_v28 }
 0x1e9   : > { %v5192_v59 = vmul.f32 3.1415927, %v6499_v16  ;;  %v1717_v54 = vmul.f32 0.98, %v5073_v39  ;;  %v5199_v32 = vadd.f32 %v1708_v31, %v5071_v45  ;;  %v1718_v13 = vmul.f32 0.98, %v5075_v9 }
 0x1ea   : > { %3498 = vtanh.f32 %v3319_v43  ;;  %v1719_v25 = vmul.f32 0.98, %v5077_v48  ;;  %v1720_v19 = vmul.f32 0.98, %v5079_v44  ;;  %v1725_v42 = vmul.f32 0.004, %v5169_v0 }
 0x1eb   : > { %v1726_v51 = vmul.f32 0.004, %v5172_v3  ;;  %v1727_v28 = vmul.f32 0.004, %v5175_v35  ;;  %v1728_v39 = vmul.f32 0.004, %v5182_v38 }
 0x1ec   : > { %v1729_v45 = vmul.f32 0.004, %v5185_v37  ;;  %v1730_v9 = vmul.f32 0.004, %v5188_v33  ;;  %v1721_v44 = vmul.f32 0.98, %v5081_v62 }
 0x1ed   : > { %v1722_v47 = vmul.f32 0.98, %v5083_v60  ;;  %v1731_v49 = vmul.f32 0.004, %v5195_v11  ;;  %vm2837_vm1 = vcmp.gt.f32.partialorder %v6500_v50, 0.0  ;;  %v5231_v60 = vadd.f32 %v1725_v42, %v1717_v54  ;;  %v5259_v42 = vld [vmem:[%s5123_s12 + $0x18] sm:$0xff] }
 0x1ee   : > { %v1723_v63 = vmul.f32 0.98, %v5109_v41  ;;  %v1724_v10 = vmul.f32 0.98, %v5114_v21  ;;  %v1732_v58 = vmul.f32 0.004, %v5199_v32  ;;  %v5233_v62 = vadd.f32 %v1726_v51, %v1718_v13 }
 0x1ef   : > { %v5235_v24 = vadd.f32 %v1727_v28, %v1719_v25  ;;  %v5238_v41 = vadd.f32 %v1728_v39, %v1720_v19  ;;  %v5240_v21 = vadd.f32 %v1729_v45, %v1721_v44  ;;  %v5242_v31 = vadd.f32 %v1730_v9, %v1722_v47  ;;  %v5276_v44 = vld [vmem:[%s5123_s12 + $0x30] sm:$0xff]  ;;  %v5279_v47 = vld [vmem:[%s5123_s12 + $0x38] sm:$0xff] }
 0x1f0   : > { %v2765_v48 = vpop.permute.xlu0 %2764  ;;  %v5245_v16 = vadd.f32 %v1731_v49, %v1723_v63  ;;  %vm1741_vm2 = vcmp.gt.f32.partialorder %v5169_v0, 30.0  ;;  %vm1742_vm3 = vcmp.gt.f32.partialorder %v5172_v3, 30.0  ;;  %v5251_v13 = vadd.f32 %v1732_v58, %v1724_v10 }
 0x1f1   : > { %v2770_v43 = vpop.permute.xlu1 %2769  ;;  %v2798_v20 = vmul.f32 %v2765_v48, %v4755_v23  ;;  %vm1743_vm4 = vcmp.gt.f32.partialorder %v5175_v35, 30.0  ;;  %vm1744_vm5 = vcmp.gt.f32.partialorder %v5182_v38, 30.0  ;;  %vm1745_vm6 = vcmp.gt.f32.partialorder %v5185_v37, 30.0 }
 0x1f2   : > { %v2799_v12 = vmul.f32 %v2770_v43, %v4762_v26  ;;  %6501 = vst [vmem:[#allocation25_spill] sm:$0xff] %v5245_v16  ;;  %6502 = vst [vmem:[#allocation28_spill] sm:$0xff] %v5251_v13  ;;  %vm1746_vm7 = vcmp.gt.f32.partialorder %v5188_v33, 30.0  ;;  %vm1747_vm8 = vcmp.gt.f32.partialorder %v5195_v11, 30.0  ;;  %vm1748_vm9 = vcmp.gt.f32.partialorder %v5199_v32, 30.0 }
 0x1f3   : > { %v2806_v23 = vsub.f32 %v5205_v55, %v2798_v20  ;;  %v3255_v28 = vsel %vm1741_vm2, 1.0, %v6470_v2  ;;  %v3256_v39 = vsel %vm1742_vm3, 1.0, %v6470_v2  ;;  %v3257_v49 = vsel %vm1743_vm4, 1.0, %v6470_v2 }
 0x1f4   : > { %v2807_v26 = vsub.f32 %v5211_v22, %v2799_v12  ;;  %v2890_v40 = vpop.permute.xlu0 %2889  ;;  %v3258_v43 = vsel %vm1744_vm5, 1.0, %v6470_v2  ;;  %v3260_v20 = vsel %vm1746_vm7, 1.0, %v6470_v2  ;;  %v3261_v63 = vsel %vm1747_vm8, 1.0, %v6470_v2  ;;  %v5303_v12 = vld [vmem:[%s5123_s12 + $0x20] sm:$0xff] }
 0x1f5   : > { %v3320_v54 = vadd.f32 -1.0, %v2806_v23  ;;  %2912 = vst.msk [vmem:[%s5229_s25 + $0x10] sm:$0xff] %vm2909_vm0, %v2890_v40  ;;  %6503 = vst [vmem:[#allocation30_spill] sm:$0xff] %v5303_v12  ;;  %v5306_v23 = vld [vmem:[%s5123_s12 + $0x28] sm:$0xff]  ;;  %v5314_v40 = vsel %vm1741_vm2, -65.0, %v5169_v0  ;;  %v5325_v50 = vsel %vm1743_vm4, -65.0, %v5175_v35  ;;  %v5379_v8 = vadd.f32 %v3255_v28, %v5086_v29 }
 0x1f6   : > { %v3321_v25 = vadd.f32 -1.0, %v2807_v26  ;;  %v3262_v26 = vsel %vm1748_vm9, 1.0, %v6470_v2  ;;  %v5343_v35 = vsel %vm1746_vm7, -65.0, %v5188_v33  ;;  %v6505_v33 = vld [vmem:[#allocation21_spill] sm:$0xff]  ;;  %v5382_v15 = vadd.f32 %v3256_v39, %v5089_v34  ;;  %s2924_s12 = scalar_lea.sflag [#allocation7], %s3799_s14 }
 0x1f7   : > { %v3499_v19 = vpop.eup %3498  ;;  %3500 = vtanh.f32 %v3320_v54  ;;  %v2775_v51 = vpop.permute.xlu1 %2774  ;;  %vm2839_vm11 = vcmp.gt.f32.partialorder %v6505_v33, 0.0  ;;  %v5366_v13 = vmul.f32 8.0, %v3262_v26  ;;  %v5401_v34 = vadd.f32 %v3262_v26, %v5107_v52 }
 0x1f8   : > { %v2829_v45 = vadd.f32 1.0, %v3499_v19  ;;  %3502 = vtanh.f32 %v3321_v25  ;;  %v2800_v9 = vmul.f32 %v2775_v51, %v5161_v36  ;;  %v2894_v48 = vpop.permute.xlu0 %2893  ;;  %v3259_v36 = vsel %vm1745_vm6, 1.0, %v6470_v2 }
 0x1f9   : > { %2914 = vst.msk [vmem:[%s5229_s25 + $0x20] sm:$0xff] %vm2909_vm0, %v2894_v48  ;;  %v5330_v25 = vsel %vm1744_vm5, -65.0, %v5182_v38  ;;  %v1773_v19 = vmul.f32 8.0, %v3255_v28  ;;  %v1775_v48 = vmul.f32 8.0, %v3257_v49  ;;  %v5348_v38 = vsel %vm1747_vm8, -65.0, %v5195_v11  ;;  %6506 = vst [vmem:[#allocation12_spill] sm:$0xff] %v5366_v13 }
 0x1fa   : > { %v2861_v10 = vsel %vm2837_vm1, %v2829_v45, %v5130_v1  ;;  %v2808_v58 = vsub.f32 %v5259_v42, %v2800_v9  ;;  %v5320_v1 = vsel %vm1742_vm3, -65.0, %v5172_v3  ;;  %v1774_v9 = vmul.f32 8.0, %v3256_v39 }
 0x1fb   : > { %v2780_v54 = vpop.permute.xlu1 %2779  ;;  %2869 = vst [vmem:[%s5272_s22] sm:$0xff] %v2861_v10  ;;  %v5338_v3 = vsel %vm1745_vm6, -65.0, %v5185_v37  ;;  %v6504_v10 = vld [vmem:[#allocation20_spill] sm:$0xff]  ;;  %v5362_v2 = vmul.f32 8.0, %v3260_v20  ;;  %v5364_v11 = vmul.f32 8.0, %v3261_v63  ;;  %v5385_v13 = vadd.f32 %v3257_v49, %v5092_v17 }
 0x1fc   : > { %v3322_v0 = vadd.f32 -1.0, %v2808_v58  ;;  %v2801_v51 = vmul.f32 %v2780_v54, %v5157_v57  ;;  %v2898_v45 = vpop.permute.xlu0 %2897  ;;  %v5353_v57 = vsel %vm1748_vm9, -65.0, %v5199_v32  ;;  %vm2838_vm10 = vcmp.gt.f32.partialorder %v6504_v10, 0.0 }
 0x1fd   : > { %2916 = vst.msk [vmem:[%s5229_s25 + $0x30] sm:$0xff] %vm2909_vm0, %v2898_v45  ;;  %v5357_v58 = vmul.f32 8.0, %v3258_v43  ;;  %v5359_v54 = vmul.f32 8.0, %v3259_v36  ;;  %v5369_v32 = vadd.f32 %v1773_v19, %v5231_v60  ;;  %v5388_v60 = vadd.f32 %v3258_v43, %v5095_v27 }
 0x1fe   : > { %3504 = vtanh.f32 %v3322_v0  ;;  %v2809_v37 = vsub.f32 %v5303_v12, %v2801_v51  ;;  %v5373_v51 = vadd.f32 %v1774_v9, %v5233_v62  ;;  %v5376_v12 = vadd.f32 %v1775_v48, %v5235_v24 }
 0x1ff   : > { %v2785_v45 = vpop.permute.xlu1 %2784  ;;  %v5392_v62 = vadd.f32 %v3259_v36, %v5098_v14  ;;  %v5395_v24 = vadd.f32 %v3260_v20, %v5101_v61  ;;  %v5398_v28 = vadd.f32 %v3261_v63, %v5104_v7  ;;  %v1797_v17 = vmul.f32 0.04, %v5314_v40  ;;  %v6507_v36 = vld [vmem:[#allocation24_spill] sm:$0xff] }
 0x200   : > { %v3323_v16 = vadd.f32 -1.0, %v2809_v37  ;;  %v2802_v0 = vmul.f32 %v2785_v45, %v5179_v56  ;;  %v1798_v27 = vmul.f32 0.04, %v5320_v1  ;;  %v1799_v14 = vmul.f32 0.04, %v5325_v50 }
 0x201   : > { %v1800_v61 = vmul.f32 0.04, %v5330_v25  ;;  %vm2840_vm12 = vcmp.gt.f32.partialorder %v6507_v36, 0.0  ;;  %v1801_v52 = vmul.f32 0.04, %v5338_v3  ;;  %v1805_v63 = vadd.f32 5.0, %v1797_v17 }
 0x202   : > { %3506 = vtanh.f32 %v3323_v16  ;;  %v2810_v56 = vsub.f32 %v5306_v23, %v2802_v0  ;;  %v1802_v20 = vmul.f32 0.04, %v5343_v35  ;;  %v1804_v37 = vmul.f32 0.04, %v5353_v57 }
 0x203   : > { %v2790_v29 = vpop.permute.xlu1 %2789  ;;  %v1806_v45 = vadd.f32 5.0, %v1798_v27  ;;  %v1807_v0 = vadd.f32 5.0, %v1799_v14  ;;  %v1813_v14 = vmul.f32 %v1805_v63, %v5314_v40 }
 0x204   : > { %v3501_v16 = vpop.eup %3500  ;;  %v3324_v39 = vadd.f32 -1.0, %v2810_v56  ;;  %v2803_v49 = vmul.f32 %v2790_v29, %v5165_v4  ;;  %v1803_v4 = vmul.f32 0.04, %v5348_v38 }
 0x205   : > { %v3503_v43 = vpop.eup %3502  ;;  %v2830_v7 = vadd.f32 1.0, %v3501_v16  ;;  %v1808_v16 = vadd.f32 5.0, %v1800_v61 }
 0x206   : > { %v2831_v26 = vadd.f32 1.0, %v3503_v43  ;;  %3508 = vtanh.f32 %v3324_v39  ;;  %v2811_v19 = vsub.f32 %v5276_v44, %v2803_v49  ;;  %v6508_v39 = vld [vmem:[#allocation23_spill] sm:$0xff]  ;;  %v1809_v49 = vadd.f32 5.0, %v1801_v52 }
 0x207   : > { %v2862_v9 = vsel %vm2838_vm10, %v2830_v7, %v5205_v55  ;;  %v2795_v48 = vpop.permute.xlu1 %2794  ;;  %vm2841_vm13 = vcmp.gt.f32.partialorder %v6508_v39, 0.0  ;;  %v1810_v55 = vadd.f32 5.0, %v1802_v20  ;;  %v1811_v10 = vadd.f32 5.0, %v1803_v4 }
 0x208   : > { %v2863_v56 = vsel %vm2839_vm11, %v2831_v26, %v5211_v22  ;;  %v3325_v29 = vadd.f32 -1.0, %v2811_v19  ;;  %v2804_v17 = vmul.f32 %v2795_v48, %v5192_v59  ;;  %2870 = vst [vmem:[%s5272_s22 + $0x8] sm:$0xff] %v2862_v9  ;;  %v1812_v43 = vadd.f32 5.0, %v1804_v37 }
 0x209   : > { %2871 = vst [vmem:[%s5272_s22 + $0x10] sm:$0xff] %v2863_v56  ;;  %v1814_v22 = vmul.f32 %v1806_v45, %v5320_v1  ;;  %v1815_v59 = vmul.f32 %v1807_v0, %v5325_v50  ;;  %v1816_v61 = vmul.f32 %v1808_v16, %v5330_v25  ;;  %v1817_v26 = vmul.f32 %v1809_v49, %v5338_v3 }
 0x20a   : > { %3510 = vtanh.f32 %v3325_v29  ;;  %v2812_v27 = vsub.f32 %v5279_v47, %v2804_v17  ;;  %v1818_v52 = vmul.f32 %v1810_v55, %v5343_v35  ;;  %v1819_v4 = vmul.f32 %v1811_v10, %v5348_v38 }
 0x20b   : > { %v3505_v33 = vpop.eup %3504  ;;  %v2886_v7 = vpop.permute.xlu1 %2885  ;;  %v1820_v63 = vmul.f32 %v1812_v43, %v5353_v57  ;;  %v1821_v9 = vadd.f32 %v1813_v14, %v4023_v18  ;;  %v1822_v48 = vadd.f32 %v1814_v22, %v4032_v30  ;;  %v1823_v37 = vadd.f32 %v1815_v59, %v4018_v46  ;;  %v6509_v43 = vld [vmem:[#allocation17_spill] sm:$0xff]  ;;  %v6513_v59 = vld [vmem:[#allocation28_spill] sm:$0xff] }
 0x20c   : > { %v2832_v20 = vadd.f32 1.0, %v3505_v33  ;;  %v3326_v19 = vadd.f32 -1.0, %v2812_v27  ;;  %2910 = vst.msk [vmem:[%s5229_s25] sm:$0xff] %vm2909_vm0, %v2886_v7  ;;  %v1824_v45 = vadd.f32 %v1816_v61, %v4026_v53  ;;  %v1825_v56 = vadd.f32 %v1817_v26, %v4059_v6  ;;  %v6510_v27 = vld [vmem:[#allocation15_spill] sm:$0xff]  ;;  %v6514_v61 = vld [vmem:[#allocation12_spill] sm:$0xff] }
 0x20d   : > { %v1826_v29 = vadd.f32 %v1818_v52, %v4057_v5  ;;  %v1784_v49 = vadd.f32 %v5357_v58, %v5238_v41  ;;  %v1785_v55 = vadd.f32 %v5359_v54, %v5240_v21  ;;  %v1786_v10 = vadd.f32 %v5362_v2, %v5242_v31  ;;  %v6511_v41 = vld [vmem:[#allocation25_spill] sm:$0xff]  ;;  %v6512_v31 = vld [vmem:[#allocation30_spill] sm:$0xff] }
 0x20e   : > { %v2864_v0 = vsel %vm2840_vm12, %v2832_v20, %v5259_v42  ;;  %3512 = vtanh.f32 %v3326_v19  ;;  %v1827_v36 = vadd.f32 %v1819_v4, %v6509_v43  ;;  %v1828_v14 = vadd.f32 %v1820_v63, %v6510_v27  ;;  %v6515_v19 = vld [vmem:[#allocation26_spill] sm:$0xff]  ;;  %v6516_v4 = vld [vmem:[#allocation27_spill] sm:$0xff] }
 0x20f   : > { %v3507_v17 = vpop.eup %3506  ;;  %2872 = vst [vmem:[%s5272_s22 + $0x18] sm:$0xff] %v2864_v0  ;;  %v2888_v16 = vpop.permute.xlu1 %2887  ;;  %v1829_v22 = vsub.f32 %v1821_v9, %v5369_v32  ;;  %v1830_v33 = vsub.f32 %v1822_v48, %v5373_v51  ;;  %v1787_v58 = vadd.f32 %v5364_v11, %v6511_v41  ;;  %v1831_v21 = vsub.f32 %v1823_v37, %v5376_v12 }
 0x210   : > { %v2833_v42 = vadd.f32 1.0, %v3507_v17  ;;  %2911 = vst.msk [vmem:[%s5229_s25 + $0x8] sm:$0xff] %vm2909_vm0, %v2888_v16  ;;  %v1832_v54 = vsub.f32 %v1824_v45, %v1784_v49  ;;  %v1833_v2 = vsub.f32 %v1825_v56, %v1785_v55  ;;  %v1788_v26 = vadd.f32 %v6514_v61, %v6513_v59  ;;  %v6517_v45 = vld [vmem:[#allocation29_spill] sm:$0xff] }
 0x211   : > { %v1834_v52 = vsub.f32 %v1826_v29, %v1786_v10  ;;  %vm2843_vm14 = vcmp.gt.f32.partialorder %v6515_v19, 0.0  ;;  %vm2842_vm15 = vcmp.gt.f32.partialorder %v6516_v4, 0.0  ;;  %v1835_v11 = vsub.f32 %v1827_v36, %v1787_v58 }
 0x212   : > { %v2865_v7 = vsel %vm2841_vm13, %v2833_v42, %v6512_v31  ;;  %v1836_v48 = vsub.f32 %v1828_v14, %v1788_v26  ;;  %v1837_v39 = vadd.f32 %v1829_v22, %v5314_v40  ;;  %v1838_v37 = vadd.f32 %v1830_v33, %v5320_v1 }
 0x213   : > { %v3509_v20 = vpop.eup %3508  ;;  %2873 = vst [vmem:[%s5272_s22 + $0x20] sm:$0xff] %v2865_v7  ;;  %v2892_v63 = vpop.permute.xlu1 %2891  ;;  %vm2844_vm1 = vcmp.gt.f32.partialorder %v6517_v45, 0.0  ;;  %v1839_v0 = vadd.f32 %v1831_v21, %v5325_v50  ;;  %v1840_v56 = vadd.f32 %v1832_v54, %v5330_v25  ;;  %v1841_v29 = vadd.f32 %v1833_v2, %v5338_v3 }
 0x214   : > { %v2834_v9 = vadd.f32 1.0, %v3509_v20  ;;  %2913 = vst.msk [vmem:[%s5229_s25 + $0x18] sm:$0xff] %vm2909_vm0, %v2892_v63  ;;  %v1842_v16 = vadd.f32 %v1834_v52, %v5343_v35  ;;  %v1845_v36 = vmul.f32 0.98, %v5369_v32  ;;  %v1846_v42 = vmul.f32 0.98, %v5373_v51 }
 0x215   : > { %v1843_v14 = vadd.f32 %v1835_v11, %v5348_v38  ;;  %v1847_v22 = vmul.f32 0.98, %v5376_v12  ;;  %v1848_v50 = vmul.f32 0.98, %v1784_v49  ;;  %v1849_v25 = vmul.f32 0.98, %v1785_v55 }
 0x216   : > { %v2866_v17 = vsel %vm2842_vm15, %v2834_v9, %v5306_v23  ;;  %v1844_v23 = vadd.f32 %v1836_v48, %v5353_v57  ;;  %v1853_v3 = vmul.f32 0.004, %v1837_v39  ;;  %v1854_v35 = vmul.f32 0.004, %v1838_v37 }
 0x217   : > { %v3511_v40 = vpop.eup %3510  ;;  %2874 = vst [vmem:[%s5272_s22 + $0x28] sm:$0xff] %v2866_v17  ;;  %v2896_v1 = vpop.permute.xlu1 %2895  ;;  %v1850_v32 = vmul.f32 0.98, %v1786_v10  ;;  %v1851_v51 = vmul.f32 0.98, %v1787_v58  ;;  %vm1869_vm2 = vcmp.gt.f32.partialorder %v1837_v39, 30.0 }
 0x218   : > { %v2835_v33 = vadd.f32 1.0, %v3511_v40  ;;  %2915 = vst.msk [vmem:[%s5229_s25 + $0x28] sm:$0xff] %vm2909_vm0, %v2896_v1  ;;  %v1855_v41 = vmul.f32 0.004, %v1839_v0  ;;  %v1852_v21 = vmul.f32 0.98, %v1788_v26  ;;  %v1861_v58 = vadd.f32 %v1853_v3, %v1845_v36 }
 0x219   : > { %v1856_v12 = vmul.f32 0.004, %v1840_v56  ;;  %v1857_v54 = vmul.f32 0.004, %v1841_v29  ;;  %v1858_v2 = vmul.f32 0.004, %v1842_v16  ;;  %v5492_v7 = vadd.f32 %v1854_v35, %v1846_v42 }
 0x21a   : > { %v2867_v38 = vsel %vm2843_vm14, %v2835_v33, %v5276_v44  ;;  %v1859_v31 = vmul.f32 0.004, %v1843_v14  ;;  %vm1870_vm3 = vcmp.gt.f32.partialorder %v1838_v37, 30.0  ;;  %v1860_v10 = vmul.f32 0.004, %v1844_v23 }
 0x21b   : > { %v3513_v49 = vpop.eup %3512  ;;  %2875 = vst [vmem:[%s5272_s22 + $0x30] sm:$0xff] %v2867_v38  ;;  %v2900_v55 = vpop.permute.xlu1 %2899  ;;  %v5494_v59 = vadd.f32 %v1855_v41, %v1847_v22  ;;  %vm1871_vm4 = vcmp.gt.f32.partialorder %v1839_v0, 30.0  ;;  %vm1872_vm5 = vcmp.gt.f32.partialorder %v1840_v56, 30.0  ;;  %vm1873_vm6 = vcmp.gt.f32.partialorder %v1841_v29, 30.0 }
 0x21c   : > { %v2836_v57 = vadd.f32 1.0, %v3513_v49  ;;  %2917 = vst.msk [vmem:[%s5229_s25 + $0x38] sm:$0xff] %vm2909_vm0, %v2900_v55  ;;  %vm1874_vm7 = vcmp.gt.f32.partialorder %v1842_v16, 30.0  ;;  %vm1875_vm8 = vcmp.gt.f32.partialorder %v1843_v14, 30.0  ;;  %vm1876_vm9 = vcmp.gt.f32.partialorder %v1844_v23, 30.0  ;;  %s3554_s25 = sshll.u32 %s3653_s16, 4  ;;  %s3555_s25 = int_to_ptr.vmem [resolvable:$false] %s3554_s25 }
 0x21d   : > { %v5500_v61 = vadd.f32 %v1856_v12, %v1848_v50  ;;  %v5502_v26 = vadd.f32 %v1857_v54, %v1849_v25  ;;  %v5504_v52 = vadd.f32 %v1858_v2, %v1850_v32  ;;  %v5506_v20 = vadd.f32 %v1859_v31, %v1851_v51  ;;  %s3556_s20 = scalar_lea.vmem %s3555_s25, 2048  ;;  %p3557_p7 = scmp.lt.s32.totalorder %s5755_s26, %s3555_s25 }
 0x21e   : > { %v2868_v44 = vsel %vm2844_vm1, %v2836_v57, %v5279_v47  ;;  %v6518_v19 = vmov 0.0   ;;  %v5525_v36 = vsel %vm1869_vm2, -65.0, %v1837_v39  ;;  %v5528_v42 = vsel %vm1870_vm3, -65.0, %v1838_v37  ;;  %p3558_p8 = scmp.lt.s32.totalorder %s3556_s20, %s3550_s19 }
 0x21f   : > { %2876 = vst [vmem:[%s5272_s22 + $0x38] sm:$0xff] %v2868_v44  ;;  %v3263_v4 = vsel %vm1869_vm2, 1.0, %v6518_v19  ;;  %v3264_v63 = vsel %vm1870_vm3, 1.0, %v6518_v19  ;;  %v3265_v47 = vsel %vm1871_vm4, 1.0, %v6518_v19  ;;  %v3266_v11 = vsel %vm1872_vm5, 1.0, %v6518_v19 }
 0x220   : > { %v3267_v9 = vsel %vm1873_vm6, 1.0, %v6518_v19  ;;  %v3268_v48 = vsel %vm1874_vm7, 1.0, %v6518_v19  ;;  %v3269_v45 = vsel %vm1875_vm8, 1.0, %v6518_v19  ;;  %v3270_v17 = vsel %vm1876_vm9, 1.0, %v6518_v19  ;;  %p3559_p10 = por %p3558_p8, %p3557_p7 }
 0x221   : > { %v5531_v40 = vsel %vm1871_vm4, -65.0, %v1839_v0  ;;  %v5534_v1 = vsel %vm1872_vm5, -65.0, %v1840_v56  ;;  %v5537_v22 = vsel %vm1873_vm6, -65.0, %v1841_v29  ;;  %v5540_v50 = vsel %vm1874_vm7, -65.0, %v1842_v16 }
 0x222   : > { %v5543_v25 = vsel %vm1875_vm8, -65.0, %v1843_v14  ;;  %v5546_v39 = vsel %vm1876_vm9, -65.0, %v1844_v23  ;;  %v1901_v37 = vmul.f32 8.0, %v3263_v4  ;;  %v1902_v33 = vmul.f32 8.0, %v3264_v63  ;;  %p3560_p0 = pnand %p3559_p10, %p3553_p5 }
 0x223   : > { %v1903_v3 = vmul.f32 8.0, %v3265_v47  ;;  %v1904_v0 = vmul.f32 8.0, %v3266_v11  ;;  %v1905_v35 = vmul.f32 8.0, %v3267_v9  ;;  %v1906_v32 = vmul.f32 8.0, %v3268_v48 }
 0x224   : > { %v1907_v56 = vmul.f32 8.0, %v3269_v45  ;;  %v1908_v51 = vmul.f32 8.0, %v3270_v17  ;;  %v5549_v29 = vadd.f32 %v3263_v4, %v5379_v8  ;;  %v5552_v16 = vadd.f32 %v3264_v63, %v5382_v15 }
 0x225   : > { %v5555_v14 = vadd.f32 %v3265_v47, %v5385_v13  ;;  %v5558_v23 = vadd.f32 %v3266_v11, %v5388_v60  ;;  %v5561_v41 = vadd.f32 %v3267_v9, %v5392_v62  ;;  %v5564_v38 = vadd.f32 %v3268_v48, %v5395_v24 }
 0x226   : > { %v5567_v12 = vadd.f32 %v3269_v45, %v5398_v28  ;;  %v5570_v8 = vadd.f32 %v3270_v17, %v5401_v34  ;;  %v1868_v15 = vadd.f32 %v1860_v10, %v1852_v21  ;;  %v1925_v54 = vmul.f32 0.04, %v5525_v36 }
 0x227   : > { %v1926_v13 = vmul.f32 0.04, %v5528_v42  ;;  %v1927_v60 = vmul.f32 0.04, %v5531_v40  ;;  %v1909_v49 = vadd.f32 %v1901_v37, %v1861_v58  ;;  %v1928_v62 = vmul.f32 0.04, %v5534_v1 }
 0x228   : > { %6519 = vst [vmem:[#allocation13_spill] sm:$0xff] %v5567_v12  ;;  %6520 = vst [vmem:[#allocation14_spill] sm:$0xff] %v5570_v8  ;;  %v1929_v55 = vmul.f32 0.04, %v5537_v22  ;;  %v1930_v24 = vmul.f32 0.04, %v5540_v50 }
 0x229   : > { %v1931_v28 = vmul.f32 0.04, %v5543_v25  ;;  %v1932_v2 = vmul.f32 0.04, %v5546_v39  ;;  %v1933_v34 = vadd.f32 5.0, %v1925_v54  ;;  %v1934_v31 = vadd.f32 5.0, %v1926_v13 }
 0x22a   : > { %v1935_v21 = vadd.f32 5.0, %v1927_v60  ;;  %v1936_v57 = vadd.f32 5.0, %v1928_v62  ;;  %v1937_v10 = vadd.f32 5.0, %v1929_v55  ;;  %v1938_v44 = vadd.f32 5.0, %v1930_v24 }
 0x22b   : > { %v1939_v4 = vadd.f32 5.0, %v1931_v28  ;;  %v1940_v63 = vadd.f32 5.0, %v1932_v2  ;;  %v1941_v58 = vmul.f32 %v1933_v34, %v5525_v36  ;;  %v1942_v47 = vmul.f32 %v1934_v31, %v5528_v42 }
 0x22c   : > { %v1943_v11 = vmul.f32 %v1935_v21, %v5531_v40  ;;  %v1944_v9 = vmul.f32 %v1936_v57, %v5534_v1  ;;  %v1945_v48 = vmul.f32 %v1937_v10, %v5537_v22  ;;  %v1946_v45 = vmul.f32 %v1938_v44, %v5540_v50 }
 0x22d   : > { %v1947_v17 = vmul.f32 %v1939_v4, %v5543_v25  ;;  %v1948_v37 = vmul.f32 %v1940_v63, %v5546_v39  ;;  %v1949_v54 = vadd.f32 %v1941_v58, %v4023_v18  ;;  %v1950_v13 = vadd.f32 %v1942_v47, %v4032_v30 }
 0x22e   : > { %v1910_v60 = vadd.f32 %v1902_v33, %v5492_v7  ;;  %v1951_v62 = vadd.f32 %v1943_v11, %v4018_v46  ;;  %v1952_v55 = vadd.f32 %v1944_v9, %v4026_v53  ;;  %v1953_v24 = vadd.f32 %v1945_v48, %v4059_v6 }
 0x22f   : > { %v1911_v28 = vadd.f32 %v1903_v3, %v5494_v59  ;;  %v1912_v2 = vadd.f32 %v1904_v0, %v5500_v61  ;;  %v1954_v34 = vadd.f32 %v1946_v45, %v4057_v5  ;;  %v1955_v31 = vadd.f32 %v1947_v17, %v6509_v43 }
 0x230   : > { %v1913_v21 = vadd.f32 %v1905_v35, %v5502_v26  ;;  %v1956_v57 = vadd.f32 %v1948_v37, %v6510_v27  ;;  %v1957_v10 = vsub.f32 %v1949_v54, %v1909_v49  ;;  %v1958_v7 = vsub.f32 %v1950_v13, %v1910_v60 }
 0x231   : > { %v1914_v33 = vadd.f32 %v1906_v32, %v5504_v52  ;;  %v1915_v44 = vadd.f32 %v1907_v56, %v5506_v20  ;;  %v1959_v4 = vsub.f32 %v1951_v62, %v1911_v28  ;;  %v1960_v63 = vsub.f32 %v1952_v55, %v1912_v2 }
 0x232   : > { %v1916_v58 = vadd.f32 %v1908_v51, %v1868_v15  ;;  %v1961_v59 = vsub.f32 %v1953_v24, %v1913_v21  ;;  %v1965_v47 = vadd.f32 %v1957_v10, %v5525_v36  ;;  %v1966_v11 = vadd.f32 %v1958_v7, %v5528_v42 }
 0x233   : > { %v1962_v3 = vsub.f32 %v1954_v34, %v1914_v33  ;;  %v1963_v61 = vsub.f32 %v1955_v31, %v1915_v44  ;;  %v1967_v26 = vadd.f32 %v1959_v4, %v5531_v40  ;;  %v1968_v35 = vadd.f32 %v1960_v63, %v5534_v1 }
 0x234   : > { %v1964_v0 = vsub.f32 %v1956_v57, %v1916_v58  ;;  %v1969_v9 = vadd.f32 %v1961_v59, %v5537_v22  ;;  %v1973_v32 = vmul.f32 0.98, %v1909_v49  ;;  %v1974_v56 = vmul.f32 0.98, %v1910_v60 }
 0x235   : > { %v1970_v52 = vadd.f32 %v1962_v3, %v5540_v50  ;;  %v1971_v20 = vadd.f32 %v1963_v61, %v5543_v25  ;;  %v1975_v15 = vmul.f32 0.98, %v1911_v28  ;;  %v1981_v48 = vmul.f32 0.004, %v1965_v47 }
 0x236   : > { %v1972_v51 = vadd.f32 %v1964_v0, %v5546_v39  ;;  %v1982_v45 = vmul.f32 0.004, %v1966_v11  ;;  %v1976_v36 = vmul.f32 0.98, %v1912_v2  ;;  %v1983_v17 = vmul.f32 0.004, %v1967_v26 }
 0x237   : > { %v1984_v42 = vmul.f32 0.004, %v1968_v35  ;;  %v1977_v37 = vmul.f32 0.98, %v1913_v21  ;;  %v1978_v40 = vmul.f32 0.98, %v1914_v33  ;;  %v1989_v55 = vadd.f32 %v1981_v48, %v1973_v32 }
 0x238   : > { %v1979_v54 = vmul.f32 0.98, %v1915_v44  ;;  %v1980_v1 = vmul.f32 0.98, %v1916_v58  ;;  %v1985_v13 = vmul.f32 0.004, %v1969_v9  ;;  %v1990_v25 = vadd.f32 %v1982_v45, %v1974_v56 }
 0x239   : > { %v1986_v22 = vmul.f32 0.004, %v1970_v52  ;;  %v1987_v62 = vmul.f32 0.004, %v1971_v20  ;;  %v1988_v50 = vmul.f32 0.004, %v1972_v51  ;;  %v5610_v49 = vadd.f32 %v1983_v17, %v1975_v15 }
 0x23a   : > { %v5612_v60 = vadd.f32 %v1984_v42, %v1976_v36  ;;  %vm1997_vm0 = vcmp.gt.f32.partialorder %v1965_v47, 30.0  ;;  %vm1998_vm10 = vcmp.gt.f32.partialorder %v1966_v11, 30.0  ;;  %vm1999_vm11 = vcmp.gt.f32.partialorder %v1967_v26, 30.0 }
 0x23b   : > { %vm2000_vm12 = vcmp.gt.f32.partialorder %v1968_v35, 30.0  ;;  %vm2001_vm13 = vcmp.gt.f32.partialorder %v1969_v9, 30.0  ;;  %vm2002_vm14 = vcmp.gt.f32.partialorder %v1970_v52, 30.0  ;;  %v5614_v39 = vadd.f32 %v1985_v13, %v1977_v37 }
 0x23c   : > { %v5616_v24 = vadd.f32 %v1986_v22, %v1978_v40  ;;  %vm2003_vm15 = vcmp.gt.f32.partialorder %v1971_v20, 30.0  ;;  %vm2004_vm1 = vcmp.gt.f32.partialorder %v1972_v51, 30.0  ;;  %v5618_v28 = vadd.f32 %v1987_v62, %v1979_v54 }
 0x23d   : > { %v5620_v2 = vadd.f32 %v1988_v50, %v1980_v1  ;;  %v5624_v34 = vsel %vm1997_vm0, 1.0, %v6518_v19  ;;  %v5628_v31 = vsel %vm1998_vm10, 1.0, %v6518_v19  ;;  %v5632_v21 = vsel %vm1999_vm11, 1.0, %v6518_v19 }
 0x23e   : > { %v5636_v57 = vsel %vm2000_vm12, 1.0, %v6518_v19  ;;  %v5640_v10 = vsel %vm2001_vm13, 1.0, %v6518_v19  ;;  %v5644_v7 = vsel %vm2002_vm14, 1.0, %v6518_v19  ;;  %v5648_v33 = vsel %vm2003_vm15, 1.0, %v6518_v19 }
 0x23f   : > { %6521 = vst [vmem:[#allocation16_spill] sm:$0xff] %v5644_v7  ;;  %6522 = vst [vmem:[#allocation18_spill] sm:$0xff] %v5648_v33  ;;  %v5652_v44 = vsel %vm2004_vm1, 1.0, %v6518_v19  ;;  %v5655_v4 = vsel %vm1997_vm0, -65.0, %v1965_v47  ;;  %v5658_v63 = vsel %vm1998_vm10, -65.0, %v1966_v11  ;;  %v5661_v58 = vsel %vm1999_vm11, -65.0, %v1967_v26 }
 0x240   : > { %6523 = vst [vmem:[#allocation22_spill] sm:$0xff] %v5652_v44  ;;  %v5664_v59 = vsel %vm2000_vm12, -65.0, %v1968_v35  ;;  %v5667_v3 = vsel %vm2001_vm13, -65.0, %v1969_v9  ;;  %v2029_v61 = vmul.f32 8.0, %v5624_v34  ;;  %v5671_v0 = vsel %vm2002_vm14, -65.0, %v1970_v52 }
 0x241   : > { %v5674_v47 = vsel %vm2003_vm15, -65.0, %v1971_v20  ;;  %v5677_v11 = vsel %vm2004_vm1, -65.0, %v1972_v51  ;;  %v2030_v26 = vmul.f32 8.0, %v5628_v31  ;;  %v2031_v32 = vmul.f32 8.0, %v5632_v21 }
 0x242   : > { %v2032_v35 = vmul.f32 8.0, %v5636_v57  ;;  %v2033_v9 = vmul.f32 8.0, %v5640_v10  ;;  %v2034_v56 = vmul.f32 8.0, %v5644_v7  ;;  %v2035_v15 = vmul.f32 8.0, %v5648_v33 }
 0x243   : > { %v2036_v52 = vmul.f32 8.0, %v5652_v44  ;;  %v2053_v20 = vmul.f32 0.04, %v5655_v4  ;;  %v2054_v48 = vmul.f32 0.04, %v5658_v63  ;;  %v2037_v51 = vadd.f32 %v2029_v61, %v1989_v55 }
 0x244   : > { %v2055_v45 = vmul.f32 0.04, %v5661_v58  ;;  %v2056_v36 = vmul.f32 0.04, %v5664_v59  ;;  %v2057_v17 = vmul.f32 0.04, %v5667_v3  ;;  %v2038_v42 = vadd.f32 %v2030_v26, %v1990_v25 }
 0x245   : > { %v2058_v37 = vmul.f32 0.04, %v5671_v0  ;;  %v2059_v40 = vmul.f32 0.04, %v5674_v47  ;;  %v2060_v54 = vmul.f32 0.04, %v5677_v11 }
 0x246   : > { %v2061_v1 = vadd.f32 5.0, %v2053_v20  ;;  %v2062_v13 = vadd.f32 5.0, %v2054_v48  ;;  %v2063_v22 = vadd.f32 5.0, %v2055_v45  ;;  %v2064_v62 = vadd.f32 5.0, %v2056_v36 }
 0x247   : > { %v2065_v50 = vadd.f32 5.0, %v2057_v17  ;;  %v2066_v44 = vadd.f32 5.0, %v2058_v37  ;;  %v2067_v55 = vadd.f32 5.0, %v2059_v40  ;;  %v2068_v61 = vadd.f32 5.0, %v2060_v54 }
 0x248   : > { %v2069_v8 = vmul.f32 %v2061_v1, %v5655_v4  ;;  %v2070_v33 = vmul.f32 %v2062_v13, %v5658_v63  ;;  %v2071_v25 = vmul.f32 %v2063_v22, %v5661_v58  ;;  %v2072_v26 = vmul.f32 %v2064_v62, %v5664_v59 }
 0x249   : > { %v2073_v12 = vmul.f32 %v2065_v50, %v5667_v3  ;;  %v2074_v7 = vmul.f32 %v2066_v44, %v5671_v0  ;;  %v2075_v20 = vmul.f32 %v2067_v55, %v5674_v47  ;;  %v2076_v48 = vmul.f32 %v2068_v61, %v5677_v11 }
 0x24a   : > { %v2077_v45 = vadd.f32 %v2069_v8, %v4023_v18  ;;  %v2078_v36 = vadd.f32 %v2070_v33, %v4032_v30  ;;  %v2079_v17 = vadd.f32 %v2071_v25, %v4018_v46  ;;  %v2080_v37 = vadd.f32 %v2072_v26, %v4026_v53 }
 0x24b   : > { %v2039_v40 = vadd.f32 %v2031_v32, %v5610_v49  ;;  %v2081_v54 = vadd.f32 %v2073_v12, %v4059_v6  ;;  %v2082_v1 = vadd.f32 %v2074_v7, %v4057_v5  ;;  %v2083_v44 = vadd.f32 %v2075_v20, %v6509_v43 }
 0x24c   : > { %v2040_v13 = vadd.f32 %v2032_v35, %v5612_v60  ;;  %v2041_v22 = vadd.f32 %v2033_v9, %v5614_v39  ;;  %v2042_v8 = vadd.f32 %v2034_v56, %v5616_v24  ;;  %v2085_v33 = vsub.f32 %v2077_v45, %v2037_v51 }
 0x24d   : > { %v2043_v62 = vadd.f32 %v2035_v15, %v5618_v28  ;;  %v2084_v50 = vadd.f32 %v2076_v48, %v6510_v27  ;;  %v2086_v55 = vsub.f32 %v2078_v36, %v2038_v42  ;;  %v2087_v49 = vsub.f32 %v2079_v17, %v2039_v40 }
 0x24e   : > { %v2088_v32 = vsub.f32 %v2080_v37, %v2040_v13  ;;  %v2089_v12 = vsub.f32 %v2081_v54, %v2041_v22  ;;  %v2090_v61 = vsub.f32 %v2082_v1, %v2042_v8  ;;  %v2044_v7 = vadd.f32 %v2036_v52, %v5620_v2 }
 0x24f   : > { %v2091_v25 = vsub.f32 %v2083_v44, %v2043_v62  ;;  %v5717_v60 = vadd.f32 %v2085_v33, %v5655_v4  ;;  %v5720_v35 = vadd.f32 %v2086_v55, %v5658_v63  ;;  %v5723_v24 = vadd.f32 %v2087_v49, %v5661_v58 }
 0x250   : > { %v2092_v39 = vsub.f32 %v2084_v50, %v2044_v7  ;;  %v5727_v28 = vadd.f32 %v2088_v32, %v5664_v59  ;;  %v5730_v9 = vadd.f32 %v2089_v12, %v5667_v3  ;;  %v5733_v2 = vadd.f32 %v2090_v61, %v5671_v0 }
 0x251   : > { %v5736_v4 = vadd.f32 %v2091_v25, %v5674_v47  ;;  %v2101_v56 = vmul.f32 0.98, %v2037_v51  ;;  %v2102_v15 = vmul.f32 0.98, %v2038_v42  ;;  %v2109_v63 = vmul.f32 0.004, %v5717_v60 }
 0x252   : > { %v2103_v52 = vmul.f32 0.98, %v2039_v40  ;;  %v2104_v58 = vmul.f32 0.98, %v2040_v13  ;;  %v2105_v26 = vmul.f32 0.98, %v2041_v22  ;;  %v5740_v59 = vadd.f32 %v2092_v39, %v5677_v11 }
 0x253   : > { %v2106_v20 = vmul.f32 0.98, %v2042_v8  ;;  %v2110_v3 = vmul.f32 0.004, %v5720_v35  ;;  %v2111_v0 = vmul.f32 0.004, %v5723_v24  ;;  %v5748_v17 = vadd.f32 %v2109_v63, %v2101_v56 }
 0x254   : > { %v2107_v48 = vmul.f32 0.98, %v2043_v62  ;;  %v2108_v45 = vmul.f32 0.98, %v2044_v7  ;;  %v2112_v47 = vmul.f32 0.004, %v5727_v28 }
 0x255   : > { %v2113_v51 = vmul.f32 0.004, %v5730_v9  ;;  %v2114_v42 = vmul.f32 0.004, %v5733_v2  ;;  %v2115_v36 = vmul.f32 0.004, %v5736_v4  ;;  %v5758_v37 = vadd.f32 %v2110_v3, %v2102_v15 }
 0x256   : > { %vm2125_vm2 = vcmp.gt.f32.partialorder %v5717_v60, 30.0  ;;  %vm2126_vm3 = vcmp.gt.f32.partialorder %v5720_v35, 30.0  ;;  %vm2127_vm4 = vcmp.gt.f32.partialorder %v5723_v24, 30.0  ;;  %vm2128_vm5 = vcmp.gt.f32.partialorder %v5727_v28, 30.0 }
 0x257   : > { %v2116_v11 = vmul.f32 0.004, %v5740_v59  ;;  %v5760_v40 = vadd.f32 %v2111_v0, %v2103_v52  ;;  %vm2129_vm6 = vcmp.gt.f32.partialorder %v5730_v9, 30.0  ;;  %v5763_v54 = vadd.f32 %v2112_v47, %v2104_v58 }
 0x258   : > { %vm2130_vm7 = vcmp.gt.f32.partialorder %v5733_v2, 30.0  ;;  %vm2131_vm8 = vcmp.gt.f32.partialorder %v5736_v4, 30.0  ;;  %vm2132_vm9 = vcmp.gt.f32.partialorder %v5740_v59, 30.0  ;;  %v5771_v1 = vsel %vm2125_vm2, 1.0, %v6518_v19 }
 0x259   : > { %v5776_v44 = vsel %vm2126_vm3, 1.0, %v6518_v19  ;;  %v5781_v13 = vsel %vm2127_vm4, 1.0, %v6518_v19  ;;  %v5786_v22 = vsel %vm2128_vm5, 1.0, %v6518_v19  ;;  %v2121_v8 = vadd.f32 %v2113_v51, %v2105_v26 }
 0x25a   : > { %v2122_v33 = vadd.f32 %v2114_v42, %v2106_v20  ;;  %v5795_v62 = vadd.f32 %v2115_v36, %v2107_v48  ;;  %v5800_v50 = vsel %vm2129_vm6, 1.0, %v6518_v19 }
 0x25b   : > { %6524 = vst [vmem:[#allocation19_spill] sm:$0xff] %v5800_v50 }
 0x25c   : > { %3563 = shalt.err (!%p3560_p0)
}
 0x25d   : > { %s3564_s13 = scalar_lea.hbm %s5793_s10, 1024  ;;  %s3568_s24 = scalar_lea.hbm %s6395_s6, 2048 }
 0x25e   : > { %p3565_p2 = scmp.ne.s32.totalorder %s5793_s10, %s3564_s13  ;;  %p3569_p3 = scmp.lt.s32.totalorder %s5793_s10, %s6395_s6 }
 0x25f   : > { %p3570_p6 = scmp.lt.s32.totalorder %s3568_s24, %s3564_s13 }
 0x260   : > { %p3566_p9 = pnand %p3565_p2, %p6525_p13 }
 0x261   : > { %p3571_p11 = por %p3570_p6, %p3569_p3 }
 0x262   : > { %p3567_p1 = pneg %p3566_p9 }
 0x264   : > { %p3572_p12 = pnand %p3571_p11, %p3567_p1 }
 0x266   : > { %3575 = shalt.err (!%p3572_p12)
}
 0x267   : > { %s3654_s19 = smov 128   ;;  %s3655_s25 = smov 8   ;;  %v2124_v55 = vadd.f32 %v2116_v11, %v2108_v45  ;;  %v5831_v49 = vsel %vm2130_vm7, 1.0, %v6518_v19  ;;  %v5836_v32 = vsel %vm2131_vm8, 1.0, %v6518_v19  ;;  %v5841_v12 = vsel %vm2132_vm9, 1.0, %v6518_v19 }
 0x268   : > { %3406 = dma.vmem_to_hbm [thread:$0]  (%p6525_p13), %s5755_s26, 1024, %s5793_s10, %s2924_s12, %s3654_s19, %s3654_s19, %s3655_s25   ;;  %6526 = vst [vmem:[#allocation20_spill] sm:$0xff] %v5831_v49  ;;  %6527 = vst [vmem:[#allocation21_spill] sm:$0xff] %v5836_v32  ;;  %v2157_v61 = vmul.f32 8.0, %v5771_v1  ;;  %v2158_v7 = vmul.f32 8.0, %v5776_v44  ;;  %v2159_v25 = vmul.f32 8.0, %v5781_v13 }
 0x269   : > { %6528 = vst [vmem:[#allocation24_spill] sm:$0xff] %v5841_v12  ;;  %v2160_v39 = vmul.f32 8.0, %v5786_v22  ;;  %v5850_v56 = vsel %vm2125_vm2, -65.0, %v5717_v60  ;;  %v5855_v15 = vsel %vm2126_vm3, -65.0, %v5720_v35  ;;  %v5860_v63 = vsel %vm2127_vm4, -65.0, %v5723_v24  ;;  %s376_s26 = scalar_lea.vmem [#allocation5], %s3171_s21 }
 0x26a   : > { %v2161_v52 = vmul.f32 8.0, %v5800_v50  ;;  %v5866_v58 = vsel %vm2128_vm5, -65.0, %v5727_v28  ;;  %v5871_v60 = vsel %vm2129_vm6, -65.0, %v5730_v9  ;;  %v5876_v35 = vsel %vm2130_vm7, -65.0, %v5733_v2  ;;  %s2947_s15 = sshll.u32 %s376_s26, 4  ;;  %s6540_s21 = sshll.u32 %s3723_s9, 10  ;;  %s6345_s15 = int_to_ptr.vmem [resolvable:$true] %s2947_s15 }
 0x26b   : > { %v2162_v24 = vmul.f32 8.0, %v5831_v49  ;;  %v5882_v26 = vsel %vm2131_vm8, -65.0, %v5736_v4  ;;  %v5887_v28 = vsel %vm2132_vm9, -65.0, %v5740_v59  ;;  %v2163_v9 = vmul.f32 8.0, %v5836_v32  ;;  %s6343_s20 = scalar_lea.hbm %s6394_s5, %s6540_s21  ;;  %s2919_s13 = scalar_lea.sflag [#allocation4], %s3799_s14 }
 0x26c   : > { %v2164_v20 = vmul.f32 8.0, %v5841_v12  ;;  %v5892_v3 = vadd.f32 %v2157_v61, %v5748_v17  ;;  %v5895_v2 = vadd.f32 %v2158_v7, %v5758_v37  ;;  %v5898_v0 = vadd.f32 %v2159_v25, %v5760_v40  ;;  %s3576_s9 = scalar_lea.vmem %s6345_s15, 1024  ;;  %s3656_s22 = smov [#allocation5]  }
 0x26d   : > { %v5901_v4 = vadd.f32 %v2160_v39, %v5763_v54  ;;  %v5903_v48 = vadd.f32 %v2161_v52, %v2121_v8  ;;  %v2181_v59 = vmul.f32 0.04, %v5850_v56  ;;  %v2182_v45 = vmul.f32 0.04, %v5855_v15  ;;  %p3577_p4 = scmp.ne.s32.totalorder %s6345_s15, %s3576_s9  ;;  %s3580_s23 = sshll.u32 %s3656_s22, 4  ;;  %s3581_s23 = int_to_ptr.vmem [resolvable:$false] %s3580_s23 }
 0x26e   : > { %v2183_v47 = vmul.f32 0.04, %v5860_v63  ;;  %v2170_v51 = vadd.f32 %v2162_v24, %v2122_v33  ;;  %v2184_v42 = vmul.f32 0.04, %v5866_v58  ;;  %v2185_v36 = vmul.f32 0.04, %v5871_v60  ;;  %p3583_p8 = scmp.lt.s32.totalorder %s6345_s15, %s3581_s23 }
 0x26f   : > { %v2186_v17 = vmul.f32 0.04, %v5876_v35  ;;  %v2187_v11 = vmul.f32 0.04, %v5882_v26  ;;  %v2188_v37 = vmul.f32 0.04, %v5887_v28  ;;  %p3578_p5 = pnand %p3577_p4, %p6525_p13 }
 0x270   : > { %v2189_v40 = vadd.f32 5.0, %v2181_v59  ;;  %v2190_v54 = vadd.f32 5.0, %v2182_v45  ;;  %v2191_v8 = vadd.f32 5.0, %v2183_v47  ;;  %v2192_v61 = vadd.f32 5.0, %v2184_v42  ;;  %s3582_s24 = scalar_lea.vmem %s3581_s23, 2048 }
 0x271   : > { %v2193_v7 = vadd.f32 5.0, %v2185_v36  ;;  %v2194_v25 = vadd.f32 5.0, %v2186_v17  ;;  %v2195_v39 = vadd.f32 5.0, %v2187_v11  ;;  %v2196_v52 = vadd.f32 5.0, %v2188_v37  ;;  %p3579_p7 = pneg %p3578_p5  ;;  %p3584_p10 = scmp.lt.s32.totalorder %s3582_s24, %s3576_s9 }
 0x272   : > { %v2197_v33 = vmul.f32 %v2189_v40, %v5850_v56  ;;  %v2198_v24 = vmul.f32 %v2190_v54, %v5855_v15  ;;  %v2199_v12 = vmul.f32 %v2191_v8, %v5860_v63  ;;  %v2200_v32 = vmul.f32 %v2192_v61, %v5866_v58 }
 0x273   : > { %v2201_v49 = vmul.f32 %v2193_v7, %v5871_v60  ;;  %v2202_v50 = vmul.f32 %v2194_v25, %v5876_v35  ;;  %v2203_v59 = vmul.f32 %v2195_v39, %v5882_v26  ;;  %v2204_v45 = vmul.f32 %v2196_v52, %v5887_v28  ;;  %p3585_p0 = por %p3584_p10, %p3583_p8 }
 0x274   : > { %v2205_v47 = vadd.f32 %v2197_v33, %v4023_v18  ;;  %v2206_v42 = vadd.f32 %v2198_v24, %v4032_v30  ;;  %v2207_v36 = vadd.f32 %v2199_v12, %v4018_v46  ;;  %v2208_v17 = vadd.f32 %v2200_v32, %v4026_v53  ;;  %v6530_v24 = vld [vmem:[#allocation13_spill] sm:$0xff] }
 0x275   : > { %v2209_v11 = vadd.f32 %v2201_v49, %v4059_v6  ;;  %v2210_v37 = vadd.f32 %v2202_v50, %v4057_v5  ;;  %v2171_v40 = vadd.f32 %v2163_v9, %v5795_v62  ;;  %v2172_v54 = vadd.f32 %v2164_v20, %v2124_v55  ;;  %p3586_p2 = pnand %p3585_p0, %p3579_p7 }
 0x276   : > { %v2211_v8 = vadd.f32 %v2203_v59, %v6509_v43  ;;  %v2212_v61 = vadd.f32 %v2204_v45, %v6510_v27  ;;  %v2213_v7 = vsub.f32 %v2205_v47, %v5892_v3  ;;  %v2214_v25 = vsub.f32 %v2206_v42, %v5895_v2  ;;  %v6531_v59 = vld [vmem:[#allocation18_spill] sm:$0xff] }
 0x277   : > { %v2215_v39 = vsub.f32 %v2207_v36, %v5898_v0  ;;  %v2216_v12 = vsub.f32 %v2208_v17, %v5901_v4  ;;  %v2045_v49 = vadd.f32 %v5624_v34, %v5549_v29  ;;  %v2217_v50 = vsub.f32 %v2209_v11, %v5903_v48  ;;  %v6529_v29 = vld [vmem:[#allocation16_spill] sm:$0xff] }
 0x278   : > { %v2218_v32 = vsub.f32 %v2210_v37, %v2170_v51  ;;  %v2219_v62 = vsub.f32 %v2211_v8, %v2171_v40  ;;  %v2046_v55 = vadd.f32 %v5628_v31, %v5552_v16  ;;  %v2047_v9 = vadd.f32 %v5632_v21, %v5555_v14  ;;  %v6532_v16 = vld [vmem:[#allocation14_spill] sm:$0xff] }
 0x279   : > { %v2048_v20 = vadd.f32 %v5636_v57, %v5558_v23  ;;  %v2220_v52 = vsub.f32 %v2212_v61, %v2172_v54  ;;  %v5945_v33 = vadd.f32 %v5640_v10, %v5561_v41  ;;  %v5949_v34 = vadd.f32 %v6529_v29, %v5564_v38  ;;  %v6533_v31 = vld [vmem:[#allocation22_spill] sm:$0xff] }
 0x27a   : > { %v5953_v45 = vadd.f32 %v6531_v59, %v6530_v24  ;;  %v5957_v47 = vadd.f32 %v6533_v31, %v6532_v16  ;;  %v2221_v14 = vadd.f32 %v2213_v7, %v5850_v56  ;;  %v2222_v23 = vadd.f32 %v2214_v25, %v5855_v15 }
 0x27b   : > { %v2223_v21 = vadd.f32 %v2215_v39, %v5860_v63  ;;  %v2224_v41 = vadd.f32 %v2216_v12, %v5866_v58  ;;  %v2225_v57 = vadd.f32 %v2217_v50, %v5871_v60  ;;  %v2226_v38 = vadd.f32 %v2218_v32, %v5876_v35 }
 0x27c   : > { %v2227_v10 = vadd.f32 %v2219_v62, %v5882_v26  ;;  %v2229_v42 = vmul.f32 0.98, %v5892_v3  ;;  %v2228_v36 = vadd.f32 %v2220_v52, %v5887_v28  ;;  %v2230_v17 = vmul.f32 0.98, %v5895_v2 }
 0x27d   : > { %v2231_v56 = vmul.f32 0.98, %v5898_v0  ;;  %v2232_v15 = vmul.f32 0.98, %v5901_v4  ;;  %v5972_v63 = vadd.f32 %v5771_v1, %v2045_v49  ;;  %v2233_v58 = vmul.f32 0.98, %v5903_v48 }
 0x27e   : > { %v2234_v60 = vmul.f32 0.98, %v2170_v51  ;;  %v2235_v11 = vmul.f32 0.98, %v2171_v40  ;;  %v5976_v35 = vadd.f32 %v5776_v44, %v2046_v55  ;;  %v2236_v26 = vmul.f32 0.98, %v2172_v54 }
 0x27f   : > { %v2237_v3 = vmul.f32 0.004, %v2221_v14  ;;  %v2238_v37 = vmul.f32 0.004, %v2222_v23  ;;  %v5979_v28 = vadd.f32 %v5781_v13, %v2047_v9  ;;  %v2239_v2 = vmul.f32 0.004, %v2223_v21 }
 0x280   : > { %v2240_v0 = vmul.f32 0.004, %v2224_v41  ;;  %v2241_v8 = vmul.f32 0.004, %v2225_v57  ;;  %v5982_v4 = vadd.f32 %v5786_v22, %v2048_v20  ;;  %v2242_v1 = vmul.f32 0.004, %v2226_v38 }
 0x281   : > { %v2243_v61 = vmul.f32 0.004, %v2227_v10  ;;  %v2244_v48 = vmul.f32 0.004, %v2228_v36  ;;  %vm2253_vm0 = vcmp.gt.f32.partialorder %v2221_v14, 30.0  ;;  %vm2254_vm10 = vcmp.gt.f32.partialorder %v2222_v23, 30.0 }
 0x282   : > { %vm2255_vm11 = vcmp.gt.f32.partialorder %v2223_v21, 30.0  ;;  %vm2256_vm12 = vcmp.gt.f32.partialorder %v2224_v41, 30.0  ;;  %v2245_v44 = vadd.f32 %v2237_v3, %v2229_v42  ;;  %v2246_v51 = vadd.f32 %v2238_v37, %v2230_v17 }
 0x283   : > { %vm2257_vm13 = vcmp.gt.f32.partialorder %v2225_v57, 30.0  ;;  %vm2258_vm14 = vcmp.gt.f32.partialorder %v2226_v38, 30.0  ;;  %v2247_v40 = vadd.f32 %v2239_v2, %v2231_v56  ;;  %v2248_v13 = vadd.f32 %v2240_v0, %v2232_v15 }
 0x284   : > { %vm2259_vm15 = vcmp.gt.f32.partialorder %v2227_v10, 30.0  ;;  %vm2260_vm1 = vcmp.gt.f32.partialorder %v2228_v36, 30.0  ;;  %v5986_v54 = vsel %vm2253_vm0, 1.0, %v6518_v19  ;;  %v5990_v22 = vsel %vm2254_vm10, 1.0, %v6518_v19 }
 0x285   : > { %v5994_v7 = vsel %vm2255_vm11, 1.0, %v6518_v19  ;;  %v5998_v25 = vsel %vm2256_vm12, 1.0, %v6518_v19  ;;  %v2249_v39 = vadd.f32 %v2241_v8, %v2233_v58  ;;  %v2250_v12 = vadd.f32 %v2242_v1, %v2234_v60 }
 0x286   : > { %v6002_v49 = vsel %vm2257_vm13, 1.0, %v6518_v19  ;;  %v6006_v50 = vsel %vm2258_vm14, 1.0, %v6518_v19  ;;  %v2251_v32 = vadd.f32 %v2243_v61, %v2235_v11  ;;  %v2252_v62 = vadd.f32 %v2244_v48, %v2236_v26 }
 0x287   : > { %v6010_v55 = vsel %vm2259_vm15, 1.0, %v6518_v19  ;;  %v6014_v9 = vsel %vm2260_vm1, 1.0, %v6518_v19  ;;  %v2285_v20 = vmul.f32 8.0, %v5986_v54  ;;  %v2286_v52 = vmul.f32 8.0, %v5990_v22 }
 0x288   : > { %v2287_v29 = vmul.f32 8.0, %v5994_v7  ;;  %v2288_v24 = vmul.f32 8.0, %v5998_v25  ;;  %v6021_v59 = vsel %vm2253_vm0, -65.0, %v2221_v14  ;;  %v6024_v16 = vsel %vm2254_vm10, -65.0, %v2222_v23 }
 0x289   : > { %v2289_v31 = vmul.f32 8.0, %v6002_v49  ;;  %v2290_v42 = vmul.f32 8.0, %v6006_v50  ;;  %v6029_v17 = vsel %vm2255_vm11, -65.0, %v2223_v21  ;;  %v6032_v56 = vsel %vm2256_vm12, -65.0, %v2224_v41 }
 0x28a   : > { %v6035_v15 = vsel %vm2257_vm13, -65.0, %v2225_v57  ;;  %v2291_v58 = vmul.f32 8.0, %v6010_v55  ;;  %v6039_v14 = vsel %vm2258_vm14, -65.0, %v2226_v38  ;;  %v6042_v23 = vsel %vm2259_vm15, -65.0, %v2227_v10 }
 0x28b   : > { %v6045_v60 = vsel %vm2260_vm1, -65.0, %v2228_v36  ;;  %v2292_v21 = vmul.f32 8.0, %v6014_v9  ;;  %v6048_v11 = vadd.f32 %v2285_v20, %v2245_v44  ;;  %v6050_v41 = vadd.f32 %v2286_v52, %v2246_v51 }
 0x28c   : > { %v6052_v26 = vadd.f32 %v2287_v29, %v2247_v40  ;;  %v6054_v57 = vadd.f32 %v2288_v24, %v2248_v13  ;;  %v6056_v3 = vadd.f32 %v2289_v31, %v2249_v39  ;;  %v6058_v38 = vadd.f32 %v2290_v42, %v2250_v12 }
 0x28d   : > { %v2309_v10 = vmul.f32 0.04, %v6021_v59  ;;  %v2310_v37 = vmul.f32 0.04, %v6024_v16  ;;  %v2299_v36 = vadd.f32 %v2291_v58, %v2251_v32  ;;  %v2311_v2 = vmul.f32 0.04, %v6029_v17 }
 0x28e   : > { %v2312_v0 = vmul.f32 0.04, %v6032_v56  ;;  %v2313_v8 = vmul.f32 0.04, %v6035_v15  ;;  %v2300_v1 = vadd.f32 %v2292_v21, %v2252_v62  ;;  %v2314_v61 = vmul.f32 0.04, %v6039_v14 }
 0x28f   : > { %v2315_v48 = vmul.f32 0.04, %v6042_v23  ;;  %v2316_v44 = vmul.f32 0.04, %v6045_v60  ;;  %v2317_v51 = vadd.f32 5.0, %v2309_v10  ;;  %v2318_v40 = vadd.f32 5.0, %v2310_v37 }
 0x290   : > { %v2319_v13 = vadd.f32 5.0, %v2311_v2  ;;  %v2320_v39 = vadd.f32 5.0, %v2312_v0  ;;  %v2321_v12 = vadd.f32 5.0, %v2313_v8  ;;  %v2322_v20 = vadd.f32 5.0, %v2314_v61 }
 0x291   : > { %v2323_v32 = vadd.f32 5.0, %v2315_v48  ;;  %v2324_v52 = vadd.f32 5.0, %v2316_v44  ;;  %v2325_v29 = vmul.f32 %v2317_v51, %v6021_v59  ;;  %v2326_v24 = vmul.f32 %v2318_v40, %v6024_v16 }
 0x292   : > { %v2327_v62 = vmul.f32 %v2319_v13, %v6029_v17  ;;  %v2328_v31 = vmul.f32 %v2320_v39, %v6032_v56  ;;  %v2329_v42 = vmul.f32 %v2321_v12, %v6035_v15  ;;  %v2330_v58 = vmul.f32 %v2322_v20, %v6039_v14  ;;  %v6534_v20 = vld [vmem:[#allocation19_spill] sm:$0xff] }
 0x293   : > { %v2331_v21 = vmul.f32 %v2323_v32, %v6042_v23  ;;  %v2332_v10 = vmul.f32 %v2324_v52, %v6045_v60  ;;  %v2333_v37 = vadd.f32 %v2325_v29, %v4023_v18  ;;  %v2334_v2 = vadd.f32 %v2326_v24, %v4032_v30 }
 0x294   : > { %v2335_v0 = vadd.f32 %v2327_v62, %v4018_v46  ;;  %v2336_v8 = vadd.f32 %v2328_v31, %v4026_v53  ;;  %v2337_v61 = vadd.f32 %v2329_v42, %v4059_v6  ;;  %v2338_v48 = vadd.f32 %v2330_v58, %v4057_v5  ;;  %v6535_v62 = vld [vmem:[#allocation20_spill] sm:$0xff]  ;;  %v6536_v42 = vld [vmem:[#allocation21_spill] sm:$0xff] }
 0x295   : > { %v2339_v44 = vadd.f32 %v2331_v21, %v6509_v43  ;;  %v2340_v51 = vadd.f32 %v2332_v10, %v6510_v27  ;;  %v2341_v40 = vsub.f32 %v2333_v37, %v6048_v11  ;;  %v2342_v13 = vsub.f32 %v2334_v2, %v6050_v41  ;;  %v6537_v21 = vld [vmem:[#allocation24_spill] sm:$0xff] }
 0x296   : > { %v2343_v39 = vsub.f32 %v2335_v0, %v6052_v26  ;;  %v2344_v12 = vsub.f32 %v2336_v8, %v6054_v57  ;;  %v2177_v32 = vadd.f32 %v6534_v20, %v5945_v33  ;;  %v2345_v52 = vsub.f32 %v2337_v61, %v6056_v3 }
 0x297   : > { %v2346_v29 = vsub.f32 %v2338_v48, %v6058_v38  ;;  %v2347_v24 = vsub.f32 %v2339_v44, %v2299_v36  ;;  %v2178_v31 = vadd.f32 %v6535_v62, %v5949_v34  ;;  %v2179_v58 = vadd.f32 %v6536_v42, %v5953_v45 }
 0x298   : > { %v2180_v10 = vadd.f32 %v6537_v21, %v5957_v47  ;;  %v2348_v37 = vsub.f32 %v2340_v51, %v2300_v1  ;;  %v6100_v2 = vadd.f32 %v5986_v54, %v5972_v63  ;;  %v6104_v33 = vadd.f32 %v5990_v22, %v5976_v35 }
 0x299   : > { %v6108_v0 = vadd.f32 %v5994_v7, %v5979_v28  ;;  %v6112_v34 = vadd.f32 %v5998_v25, %v5982_v4  ;;  %v2349_v45 = vadd.f32 %v2341_v40, %v6021_v59  ;;  %v2350_v47 = vadd.f32 %v2342_v13, %v6024_v16 }
 0x29a   : > { %v2351_v8 = vadd.f32 %v2343_v39, %v6029_v17  ;;  %v2352_v63 = vadd.f32 %v2344_v12, %v6032_v56  ;;  %v2353_v54 = vadd.f32 %v2345_v52, %v6035_v15  ;;  %v2354_v35 = vadd.f32 %v2346_v29, %v6039_v14 }
 0x29b   : > { %v2355_v22 = vadd.f32 %v2347_v24, %v6042_v23  ;;  %v2357_v28 = vmul.f32 0.98, %v6048_v11  ;;  %v2356_v7 = vadd.f32 %v2348_v37, %v6045_v60  ;;  %v2358_v4 = vmul.f32 0.98, %v6050_v41 }
 0x29c   : > { %v2359_v25 = vmul.f32 0.98, %v6052_v26  ;;  %v2360_v59 = vmul.f32 0.98, %v6054_v57  ;;  %v6127_v16 = vadd.f32 %v6002_v49, %v2177_v32  ;;  %v2361_v17 = vmul.f32 0.98, %v6056_v3 }
 0x29d   : > { %v2362_v56 = vmul.f32 0.98, %v6058_v38  ;;  %v2363_v15 = vmul.f32 0.98, %v2299_v36  ;;  %v6132_v14 = vadd.f32 %v6006_v50, %v2178_v31  ;;  %v2364_v23 = vmul.f32 0.98, %v2300_v1 }
 0x29e   : > { %v2365_v11 = vmul.f32 0.004, %v2349_v45  ;;  %v2366_v60 = vmul.f32 0.004, %v2350_v47  ;;  %v6135_v41 = vadd.f32 %v6010_v55, %v2179_v58  ;;  %v2367_v26 = vmul.f32 0.004, %v2351_v8 }
 0x29f   : > { %v2368_v61 = vmul.f32 0.004, %v2352_v63  ;;  %v2369_v57 = vmul.f32 0.004, %v2353_v54  ;;  %v6138_v49 = vadd.f32 %v6014_v9, %v2180_v10  ;;  %v2370_v48 = vmul.f32 0.004, %v2354_v35 }
 0x2a0   : > { %v2371_v3 = vmul.f32 0.004, %v2355_v22  ;;  %v2372_v44 = vmul.f32 0.004, %v2356_v7  ;;  %vm2381_vm2 = vcmp.gt.f32.partialorder %v2349_v45, 30.0  ;;  %vm2382_vm3 = vcmp.gt.f32.partialorder %v2350_v47, 30.0 }
 0x2a1   : > { %vm2383_vm4 = vcmp.gt.f32.partialorder %v2351_v8, 30.0  ;;  %vm2384_vm5 = vcmp.gt.f32.partialorder %v2352_v63, 30.0  ;;  %vm2385_vm6 = vcmp.gt.f32.partialorder %v2353_v54, 30.0  ;;  %vm2386_vm7 = vcmp.gt.f32.partialorder %v2354_v35, 30.0 }
 0x2a2   : > { %vm2387_vm8 = vcmp.gt.f32.partialorder %v2355_v22, 30.0  ;;  %vm2388_vm9 = vcmp.gt.f32.partialorder %v2356_v7, 30.0  ;;  %v2373_v50 = vadd.f32 %v2365_v11, %v2357_v28  ;;  %v2374_v55 = vadd.f32 %v2366_v60, %v2358_v4 }
 0x2a3   : > { %v2375_v38 = vadd.f32 %v2367_v26, %v2359_v25  ;;  %v2376_v36 = vadd.f32 %v2368_v61, %v2360_v59  ;;  %v3295_v1 = vsel %vm2381_vm2, 1.0, %v6518_v19  ;;  %v3296_v9 = vsel %vm2382_vm3, 1.0, %v6518_v19 }
 0x2a4   : > { %v6146_v51 = vsel %vm2383_vm4, 1.0, %v6518_v19  ;;  %v6150_v40 = vsel %vm2384_vm5, 1.0, %v6518_v19  ;;  %v6154_v13 = vsel %vm2385_vm6, 1.0, %v6518_v19  ;;  %v6158_v39 = vsel %vm2386_vm7, 1.0, %v6518_v19 }
 0x2a5   : > { %v6162_v12 = vsel %vm2387_vm8, 1.0, %v6518_v19  ;;  %v6166_v20 = vsel %vm2388_vm9, 1.0, %v6518_v19  ;;  %v2377_v32 = vadd.f32 %v2369_v57, %v2361_v17  ;;  %v2378_v52 = vadd.f32 %v2370_v48, %v2362_v56 }
 0x2a6   : > { %v2379_v29 = vadd.f32 %v2371_v3, %v2363_v15  ;;  %v2380_v24 = vadd.f32 %v2372_v44, %v2364_v23  ;;  %v2413_v62 = vmul.f32 8.0, %v3295_v1  ;;  %v2414_v31 = vmul.f32 8.0, %v3296_v9 }
 0x2a7   : > { %v2415_v42 = vmul.f32 8.0, %v6146_v51  ;;  %v2416_v58 = vmul.f32 8.0, %v6150_v40  ;;  %v2417_v21 = vmul.f32 8.0, %v6154_v13  ;;  %v2418_v10 = vmul.f32 8.0, %v6158_v39 }
 0x2a8   : > { %v2419_v37 = vmul.f32 8.0, %v6162_v12  ;;  %v2420_v28 = vmul.f32 8.0, %v6166_v20  ;;  %v2405_v4 = vsel %vm2381_vm2, -65.0, %v2349_v45  ;;  %v2406_v25 = vsel %vm2382_vm3, -65.0, %v2350_v47 }
 0x2a9   : > { %v2407_v59 = vsel %vm2383_vm4, -65.0, %v2351_v8  ;;  %v2408_v17 = vsel %vm2384_vm5, -65.0, %v2352_v63  ;;  %v2409_v56 = vsel %vm2385_vm6, -65.0, %v2353_v54  ;;  %v2410_v15 = vsel %vm2386_vm7, -65.0, %v2354_v35 }
 0x2aa   : > { %v2411_v23 = vsel %vm2387_vm8, -65.0, %v2355_v22  ;;  %v2412_v11 = vsel %vm2388_vm9, -65.0, %v2356_v7  ;;  %v2421_v60 = vadd.f32 %v2413_v62, %v2373_v50  ;;  %v2422_v26 = vadd.f32 %v2414_v31, %v2374_v55 }
 0x2ab   : > { %v2423_v61 = vadd.f32 %v2415_v42, %v2375_v38  ;;  %v2424_v57 = vadd.f32 %v2416_v58, %v2376_v36  ;;  %v2425_v48 = vadd.f32 %v2417_v21, %v2377_v32  ;;  %v2426_v45 = vadd.f32 %v2418_v10, %v2378_v52 }
 0x2ac   : > { %v2427_v3 = vadd.f32 %v2419_v37, %v2379_v29  ;;  %v6182_v47 = vadd.f32 %v2420_v28, %v2380_v24  ;;  %v6185_v8 = vadd.f32 %v3295_v1, %v6100_v2  ;;  %v2437_v63 = vmul.f32 0.04, %v2405_v4 }
 0x2ad   : > { %v2438_v54 = vmul.f32 0.04, %v2406_v25  ;;  %v2439_v44 = vmul.f32 0.04, %v2407_v59  ;;  %v6188_v35 = vadd.f32 %v3296_v9, %v6104_v33  ;;  %v2440_v22 = vmul.f32 0.04, %v2408_v17 }
 0x2ae   : > { %v2441_v7 = vmul.f32 0.04, %v2409_v56  ;;  %v2442_v50 = vmul.f32 0.04, %v2410_v15  ;;  %v2443_v55 = vmul.f32 0.04, %v2411_v23 }
 0x2af   : > { %6538 = vst [vmem:[#allocation23_spill] sm:$0xff] %v6188_v35  ;;  %v2444_v38 = vmul.f32 0.04, %v2412_v11  ;;  %v2445_v36 = vadd.f32 5.0, %v2437_v63  ;;  %v2446_v32 = vadd.f32 5.0, %v2438_v54  ;;  %v2447_v52 = vadd.f32 5.0, %v2439_v44 }
 0x2b0   : > { %v2448_v29 = vadd.f32 5.0, %v2440_v22  ;;  %v2449_v24 = vadd.f32 5.0, %v2441_v7  ;;  %v2450_v62 = vadd.f32 5.0, %v2442_v50  ;;  %v2451_v31 = vadd.f32 5.0, %v2443_v55 }
 0x2b1   : > { %v2452_v2 = vadd.f32 5.0, %v2444_v38  ;;  %v2453_v1 = vmul.f32 %v2445_v36, %v2405_v4  ;;  %v2454_v42 = vmul.f32 %v2446_v32, %v2406_v25  ;;  %v2455_v58 = vmul.f32 %v2447_v52, %v2407_v59 }
 0x2b2   : > { %v2456_v21 = vmul.f32 %v2448_v29, %v2408_v17  ;;  %v2457_v10 = vmul.f32 %v2449_v24, %v2409_v56  ;;  %v2458_v33 = vmul.f32 %v2450_v62, %v2410_v15  ;;  %v2459_v9 = vmul.f32 %v2451_v31, %v2411_v23 }
 0x2b3   : > { %v2460_v37 = vmul.f32 %v2452_v2, %v2412_v11  ;;  %v2461_v28 = vadd.f32 %v2453_v1, %v4023_v18  ;;  %v2462_v35 = vadd.f32 %v2454_v42, %v4032_v30  ;;  %v2463_v63 = vadd.f32 %v2455_v58, %v4018_v46 }
 0x2b4   : > { %v2464_v54 = vadd.f32 %v2456_v21, %v4026_v53  ;;  %v2465_v44 = vadd.f32 %v2457_v10, %v4059_v6  ;;  %v2466_v22 = vadd.f32 %v2458_v33, %v4057_v5  ;;  %v2467_v7 = vadd.f32 %v2459_v9, %v6509_v43 }
 0x2b5   : > { %v2468_v50 = vadd.f32 %v2460_v37, %v6510_v27  ;;  %v2469_v55 = vsub.f32 %v2461_v28, %v2421_v60  ;;  %v2470_v38 = vsub.f32 %v2462_v35, %v2422_v26  ;;  %v2471_v36 = vsub.f32 %v2463_v63, %v2423_v61 }
 0x2b6   : > { %v2472_v32 = vsub.f32 %v2464_v54, %v2424_v57  ;;  %v2473_v52 = vsub.f32 %v2465_v44, %v2425_v48  ;;  %v2474_v29 = vsub.f32 %v2466_v22, %v2426_v45  ;;  %v6200_v24 = vadd.f32 %v6146_v51, %v6108_v0 }
 0x2b7   : > { %v6204_v62 = vadd.f32 %v6150_v40, %v6112_v34  ;;  %v2475_v31 = vsub.f32 %v2467_v7, %v2427_v3  ;;  %v2476_v2 = vsub.f32 %v2468_v50, %v6182_v47  ;;  %v2477_v1 = vadd.f32 %v2469_v55, %v2405_v4 }
 0x2b8   : > { %v2478_v42 = vadd.f32 %v2470_v38, %v2406_v25  ;;  %v2479_v58 = vadd.f32 %v2471_v36, %v2407_v59  ;;  %v2480_v21 = vadd.f32 %v2472_v32, %v2408_v17  ;;  %v2481_v35 = vadd.f32 %v2473_v52, %v2409_v56 }
 0x2b9   : > { %v2482_v10 = vadd.f32 %v2474_v29, %v2410_v15  ;;  %v2483_v33 = vadd.f32 %v2475_v31, %v2411_v23  ;;  %v2485_v9 = vmul.f32 0.98, %v2421_v60  ;;  %v2484_v37 = vadd.f32 %v2476_v2, %v2412_v11 }
 0x2ba   : > { %v2486_v28 = vmul.f32 0.98, %v2422_v26  ;;  %v2487_v63 = vmul.f32 0.98, %v2423_v61  ;;  %v2488_v0 = vmul.f32 0.98, %v2424_v57  ;;  %v6209_v51 = vadd.f32 %v6154_v13, %v6127_v16 }
 0x2bb   : > { %v2489_v34 = vmul.f32 0.98, %v2425_v48  ;;  %v2490_v40 = vmul.f32 0.98, %v2426_v45  ;;  %v2491_v54 = vmul.f32 0.98, %v2427_v3  ;;  %v6213_v4 = vadd.f32 %v6158_v39, %v6132_v14 }
 0x2bc   : > { %v2493_v25 = vmul.f32 0.004, %v2477_v1  ;;  %v2494_v59 = vmul.f32 0.004, %v2478_v42  ;;  %v2495_v17 = vmul.f32 0.004, %v2479_v58  ;;  %v6217_v56 = vadd.f32 %v6162_v12, %v6135_v41 }
 0x2bd   : > { %v2496_v15 = vmul.f32 0.004, %v2480_v21  ;;  %v2497_v23 = vmul.f32 0.004, %v2481_v35  ;;  %v2498_v11 = vmul.f32 0.004, %v2482_v10  ;;  %v6221_v16 = vadd.f32 %v6166_v20, %v6138_v49 }
 0x2be   : > { %v2492_v13 = vmul.f32 0.98, %v6182_v47  ;;  %v2499_v60 = vmul.f32 0.004, %v2483_v33  ;;  %v2500_v26 = vmul.f32 0.004, %v2484_v37  ;;  %v2501_v14 = vadd.f32 %v2493_v25, %v2485_v9 }
 0x2bf   : > { %v2502_v39 = vadd.f32 %v2494_v59, %v2486_v28  ;;  %v2503_v61 = vadd.f32 %v2495_v17, %v2487_v63  ;;  %v2504_v57 = vadd.f32 %v2496_v15, %v2488_v0  ;;  %v2505_v48 = vadd.f32 %v2497_v23, %v2489_v34  ;;  %v6539_v23 = vld [vmem:[#allocation23_spill] sm:$0xff] }
 0x2c0   : > { %v2506_v45 = vadd.f32 %v2498_v11, %v2490_v40  ;;  %vm2509_vm0 = vcmp.gt.f32.partialorder %v2477_v1, 30.0  ;;  %vm2510_vm10 = vcmp.gt.f32.partialorder %v2478_v42, 30.0  ;;  %vm2511_vm11 = vcmp.gt.f32.partialorder %v2479_v58, 30.0 }
 0x2c1   : > { %vm2512_vm12 = vcmp.gt.f32.partialorder %v2480_v21, 30.0  ;;  %vm2513_vm13 = vcmp.gt.f32.partialorder %v2481_v35, 30.0  ;;  %vm2514_vm14 = vcmp.gt.f32.partialorder %v2482_v10, 30.0  ;;  %v2507_v41 = vadd.f32 %v2499_v60, %v2491_v54 }
 0x2c2   : > { %v2508_v12 = vadd.f32 %v2500_v26, %v2492_v13  ;;  %vm2515_vm15 = vcmp.gt.f32.partialorder %v2483_v33, 30.0  ;;  %vm2516_vm1 = vcmp.gt.f32.partialorder %v2484_v37, 30.0  ;;  %v3303_v49 = vsel %vm2509_vm0, 1.0, %v6518_v19 }
 0x2c3   : > { %v3304_v20 = vsel %vm2510_vm10, 1.0, %v6518_v19  ;;  %v3305_v3 = vsel %vm2511_vm11, 1.0, %v6518_v19  ;;  %v3306_v47 = vsel %vm2512_vm12, 1.0, %v6518_v19  ;;  %v3307_v44 = vsel %vm2513_vm13, 1.0, %v6518_v19 }
 0x2c4   : > { %v3308_v22 = vsel %vm2514_vm14, 1.0, %v6518_v19  ;;  %v3309_v7 = vsel %vm2515_vm15, 1.0, %v6518_v19  ;;  %v3310_v50 = vsel %vm2516_vm1, 1.0, %v6518_v19  ;;  %v6241_v55 = vsel %vm2509_vm0, -65.0, %v2477_v1 }
 0x2c5   : > { %v6244_v38 = vsel %vm2510_vm10, -65.0, %v2478_v42  ;;  %v6247_v36 = vsel %vm2511_vm11, -65.0, %v2479_v58  ;;  %v6250_v32 = vsel %vm2512_vm12, -65.0, %v2480_v21  ;;  %v6253_v52 = vsel %vm2513_vm13, -65.0, %v2481_v35 }
 0x2c6   : > { %v6256_v29 = vsel %vm2514_vm14, -65.0, %v2482_v10  ;;  %v2541_v31 = vmul.f32 8.0, %v3303_v49  ;;  %v2542_v2 = vmul.f32 8.0, %v3304_v20  ;;  %v2543_v9 = vmul.f32 8.0, %v3305_v3 }
 0x2c7   : > { %v2544_v1 = vmul.f32 8.0, %v3306_v47  ;;  %v2545_v28 = vmul.f32 8.0, %v3307_v44  ;;  %v2546_v63 = vmul.f32 8.0, %v3308_v22  ;;  %v6259_v42 = vsel %vm2515_vm15, -65.0, %v2483_v33 }
 0x2c8   : > { %v6262_v58 = vsel %vm2516_vm1, -65.0, %v2484_v37  ;;  %v2547_v21 = vmul.f32 8.0, %v3309_v7  ;;  %v2548_v0 = vmul.f32 8.0, %v3310_v50  ;;  %v2549_v34 = vadd.f32 %v2541_v31, %v2501_v14 }
 0x2c9   : > { %v2550_v35 = vadd.f32 %v2542_v2, %v2502_v39  ;;  %v2551_v40 = vadd.f32 %v2543_v9, %v2503_v61  ;;  %v2552_v54 = vadd.f32 %v2544_v1, %v2504_v57  ;;  %v2553_v10 = vadd.f32 %v2545_v28, %v2505_v48 }
 0x2ca   : > { %v2554_v25 = vadd.f32 %v2546_v63, %v2506_v45  ;;  %v2555_v59 = vadd.f32 %v2547_v21, %v2507_v41  ;;  %v2556_v17 = vadd.f32 %v2548_v0, %v2508_v12  ;;  %v6265_v15 = vadd.f32 %v3303_v49, %v6185_v8 }
 0x2cb   : > { %v6268_v11 = vadd.f32 %v3304_v20, %v6539_v23  ;;  %v6271_v33 = vadd.f32 %v3305_v3, %v6200_v24  ;;  %v6274_v37 = vadd.f32 %v3306_v47, %v6204_v62  ;;  %v6277_v13 = vadd.f32 %v3307_v44, %v6209_v51 }
 0x2cc   : > { %v6280_v60 = vadd.f32 %v3308_v22, %v6213_v4  ;;  %v2565_v26 = vmul.f32 0.04, %v6241_v55  ;;  %v2566_v8 = vmul.f32 0.04, %v6244_v38  ;;  %v6285_v14 = vadd.f32 %v3309_v7, %v6217_v56 }
 0x2cd   : > { %v2567_v39 = vmul.f32 0.04, %v6247_v36  ;;  %v2568_v24 = vmul.f32 0.04, %v6250_v32  ;;  %v2569_v62 = vmul.f32 0.04, %v6253_v52  ;;  %v6291_v61 = vadd.f32 %v3310_v50, %v6221_v16 }
 0x2ce   : > { %v2570_v51 = vmul.f32 0.04, %v6256_v29  ;;  %v2571_v4 = vmul.f32 0.04, %v6259_v42  ;;  %v2572_v57 = vmul.f32 0.04, %v6262_v58 }
 0x2cf   : > { %v2573_v48 = vadd.f32 5.0, %v2565_v26  ;;  %v2574_v45 = vadd.f32 5.0, %v2566_v8  ;;  %v2575_v41 = vadd.f32 5.0, %v2567_v39  ;;  %v2576_v56 = vadd.f32 5.0, %v2568_v24 }
 0x2d0   : > { %v2577_v12 = vadd.f32 5.0, %v2569_v62  ;;  %v2578_v49 = vadd.f32 5.0, %v2570_v51  ;;  %v2579_v20 = vadd.f32 5.0, %v2571_v4  ;;  %v2580_v3 = vadd.f32 5.0, %v2572_v57 }
 0x2d1   : > { %v2581_v47 = vmul.f32 %v2573_v48, %v6241_v55  ;;  %v2582_v44 = vmul.f32 %v2574_v45, %v6244_v38  ;;  %v2583_v16 = vmul.f32 %v2575_v41, %v6247_v36  ;;  %v2584_v22 = vmul.f32 %v2576_v56, %v6250_v32 }
 0x2d2   : > { %v2585_v7 = vmul.f32 %v2577_v12, %v6253_v52  ;;  %v2586_v50 = vmul.f32 %v2578_v49, %v6256_v29  ;;  %v2587_v31 = vmul.f32 %v2579_v20, %v6259_v42  ;;  %v2588_v2 = vmul.f32 %v2580_v3, %v6262_v58 }
 0x2d3   : > { %v2589_v9 = vadd.f32 %v2581_v47, %v4023_v18  ;;  %v2590_v1 = vadd.f32 %v2582_v44, %v4032_v30  ;;  %v2591_v28 = vadd.f32 %v2583_v16, %v4018_v46  ;;  %v2592_v63 = vadd.f32 %v2584_v22, %v4026_v53 }
 0x2d4   : > { %v2593_v21 = vadd.f32 %v2585_v7, %v4059_v6  ;;  %v2594_v0 = vadd.f32 %v2586_v50, %v4057_v5  ;;  %v2595_v23 = vadd.f32 %v2587_v31, %v6509_v43  ;;  %v2596_v26 = vadd.f32 %v2588_v2, %v6510_v27 }
 0x2d5   : > { %v2597_v8 = vsub.f32 %v2589_v9, %v2549_v34  ;;  %v2598_v39 = vsub.f32 %v2590_v1, %v2550_v35  ;;  %v2599_v24 = vsub.f32 %v2591_v28, %v2551_v40  ;;  %v2600_v62 = vsub.f32 %v2592_v63, %v2552_v54 }
 0x2d6   : > { %v2601_v51 = vsub.f32 %v2593_v21, %v2553_v10  ;;  %v2602_v18 = vsub.f32 %v2594_v0, %v2554_v25  ;;  %v2603_v4 = vsub.f32 %v2595_v23, %v2555_v59  ;;  %v2604_v30 = vsub.f32 %v2596_v26, %v2556_v17 }
 0x2d7   : > { %v2605_v46 = vadd.f32 %v2597_v8, %v6241_v55  ;;  %v2606_v53 = vadd.f32 %v2598_v39, %v6244_v38  ;;  %v2607_v6 = vadd.f32 %v2599_v24, %v6247_v36  ;;  %v2608_v5 = vadd.f32 %v2600_v62, %v6250_v32 }
 0x2d8   : > { %v2609_v43 = vadd.f32 %v2601_v51, %v6253_v52  ;;  %v2610_v27 = vadd.f32 %v2602_v18, %v6256_v29  ;;  %v2611_v34 = vadd.f32 %v2603_v4, %v6259_v42  ;;  %v2612_v35 = vadd.f32 %v2604_v30, %v6262_v58 }
 0x2d9   : > { %vm2613_vm2 = vcmp.gt.f32.partialorder %v2605_v46, 30.0  ;;  %vm2614_vm3 = vcmp.gt.f32.partialorder %v2606_v53, 30.0  ;;  %vm2615_vm4 = vcmp.gt.f32.partialorder %v2607_v6, 30.0  ;;  %vm2616_vm5 = vcmp.gt.f32.partialorder %v2608_v5, 30.0 }
 0x2da   : > { %vm2617_vm6 = vcmp.gt.f32.partialorder %v2609_v43, 30.0  ;;  %vm2618_vm7 = vcmp.gt.f32.partialorder %v2610_v27, 30.0  ;;  %vm2619_vm8 = vcmp.gt.f32.partialorder %v2611_v34, 30.0  ;;  %vm2620_vm9 = vcmp.gt.f32.partialorder %v2612_v35, 30.0 }
 0x2db   : > { %v3311_v55 = vsel %vm2613_vm2, 1.0, %v6518_v19  ;;  %v3312_v38 = vsel %vm2614_vm3, 1.0, %v6518_v19  ;;  %v3313_v36 = vsel %vm2615_vm4, 1.0, %v6518_v19  ;;  %v3314_v32 = vsel %vm2616_vm5, 1.0, %v6518_v19 }
 0x2dc   : > { %v3315_v52 = vsel %vm2617_vm6, 1.0, %v6518_v19  ;;  %v3316_v29 = vsel %vm2618_vm7, 1.0, %v6518_v19  ;;  %v3317_v42 = vsel %vm2619_vm8, 1.0, %v6518_v19  ;;  %v3318_v58 = vsel %vm2620_vm9, 1.0, %v6518_v19 }
 0x2dd   : > { %v2637_v40 = vadd.f32 %v3311_v55, %v6265_v15  ;;  %v2638_v54 = vadd.f32 %v3312_v38, %v6268_v11  ;;  %v2639_v10 = vadd.f32 %v3313_v36, %v6271_v33  ;;  %v2640_v25 = vadd.f32 %v3314_v32, %v6274_v37 }
 0x2de   : > { %v2641_v59 = vadd.f32 %v3315_v52, %v6277_v13  ;;  %v2642_v17 = vadd.f32 %v3316_v29, %v6280_v60  ;;  %v2643_v57 = vadd.f32 %v3317_v42, %v6285_v14  ;;  %v2644_v19 = vadd.f32 %v3318_v58, %v6291_v61 }
 0x2df   : > { %v2645_v48 = vmul.f32 0.0625, %v2637_v40  ;;  %v2646_v15 = vmul.f32 0.0625, %v2638_v54  ;;  %v2647_v45 = vmul.f32 0.0625, %v2639_v10  ;;  %v2648_v11 = vmul.f32 0.0625, %v2640_v25 }
 0x2e0   : > { %v2649_v33 = vmul.f32 0.0625, %v2641_v59  ;;  %v2650_v41 = vmul.f32 0.0625, %v2642_v17  ;;  %v2651_v37 = vmul.f32 0.0625, %v2643_v57  ;;  %v2652_v56 = vmul.f32 0.0625, %v2644_v19 }
 0x2e1   : > { %2653 = vst [vmem:[%s376_s26] sm:$0xff] %v2645_v48  ;;  %2654 = vst [vmem:[%s376_s26 + $0x8] sm:$0xff] %v2646_v15 }
 0x2e2   : > { %2655 = vst [vmem:[%s376_s26 + $0x10] sm:$0xff] %v2647_v45  ;;  %2656 = vst [vmem:[%s376_s26 + $0x18] sm:$0xff] %v2648_v11 }
 0x2e3   : > { %2657 = vst [vmem:[%s376_s26 + $0x20] sm:$0xff] %v2649_v33  ;;  %2658 = vst [vmem:[%s376_s26 + $0x28] sm:$0xff] %v2650_v41 }
 0x2e4   : > { %2659 = vst [vmem:[%s376_s26 + $0x30] sm:$0xff] %v2651_v37  ;;  %2660 = vst [vmem:[%s376_s26 + $0x38] sm:$0xff] %v2652_v56 }
 0x2e5   : > { %3589 = shalt.err (!%p3586_p2)
}
 0x2e6   : > { %s3590_s16 = scalar_lea.hbm %s6343_s20, 1024  ;;  %s3594_s21 = scalar_lea.hbm %s6394_s5, 2048 }
 0x2e7   : > { %p3591_p9 = scmp.ne.s32.totalorder %s6343_s20, %s3590_s16  ;;  %p3595_p6 = scmp.lt.s32.totalorder %s6343_s20, %s6394_s5 }
 0x2e8   : > { %p3596_p11 = scmp.lt.s32.totalorder %s3594_s21, %s3590_s16 }
 0x2e9   : > { %p3592_p1 = pnand %p3591_p9, %p6525_p13 }
 0x2ea   : > { %p3597_p12 = por %p3596_p11, %p3595_p6 }
 0x2eb   : > { %p3593_p3 = pneg %p3592_p1 }
 0x2ed   : > { %p3598_p4 = pnand %p3597_p12, %p3593_p3 }
 0x2ef   : > { %3601 = shalt.err (!%p3598_p4)
}
 0x2f0   : > { %3405 = dma.vmem_to_hbm [thread:$0]  (%p6525_p13), %s6345_s15, 1024, %s6343_s20, %s2919_s13, %s3654_s19, %s3654_s19, %s3655_s25  }
 0x2f1 PF: > { %s2986_s9 = sand.u32 1, %s3632_s27   ;;  %p6541_p5 = scmp.ne.s32.totalorder %s6448_s18, 0 }
 0x2f2   : > { %p6542_p7 = scmp.ge.s32.totalorder %s3644_s30, 2  ;;  %s2987_s22 = scalar_lea.sflag [#allocation4], %s2986_s9 }
 0x2f4   : > { %p3414_p8 = pnand %p6542_p7, %p6541_p5 }
 0x2f6   : > { %p3415_p10 = pneg %p3414_p8 }
 0x2f8   : > { %3623 = dma.done.wait (%p3415_p10), %s2987_s22, 1024  }
 0x2f9   : > { %3625 = vsyncadd (%p3415_p10), %s2987_s22, 4294966272  ;;  %s2996_s23 = scalar_lea.sflag [#allocation7], %s2986_s9 }
 0x2fa   : > { %3627 = dma.done.wait (%p3415_p10), %s2996_s23, 1024  }
 0x2fb   : > { %3629 = vsyncadd (%p3415_p10), %s2996_s23, 4294966272  ;;  %s6543_s17 = sld [smem:[#allocation11_spill]]  ;;  %p25_p13 = scmp.ge.s32.totalorder %s3727_s11, 4  }
 0x2fc   : > { %s6544_s27 = smov %s3636_s28  ;;  %s6545_s28 = smov %s3640_s29 }
 0x2fd   : > { %s6547_s30 = smov %s3727_s11  ;;  %27 = sbr.rel (!%p25_p13) target bundleno = 7 (0x7), region = 135 }
 0x301   : > { %s6546_s29 = smov %s6543_s17 }
 0x302   :  { %3017 = vsyncpa [#allocation3], 1 }
 0x303   :  { %3019 = vsyncpa [#allocation3 + $0x1], 1 }
 0x304   :  { %3020 = vsyncpa [#allocation4], 1 }
 0x305   :  { %3022 = vsyncpa [#allocation4 + $0x1], 1 }
 0x306   :  { %3023 = vsyncpa [#allocation7], 1 }
 0x307   :  { %3025 = vsyncpa [#allocation7 + $0x1], 1 }

</bundles_post_ra>
